<compile_context>
chip_gen: v5e
topology: v5e:2x2
jax: 0.10.0
libtpu: 0.0.40
codegen_flags: <defaults>
</compile_context>

<pallas_src>
import numpy as np
import jax
import jax.numpy as jnp
from jax.experimental import pallas as pl
from jax.experimental.pallas import tpu as pltpu


# ----------------------- static geometry (32x32 images) ----------------------

def _conv_out(n, k, s):
    return (n - k) // s + 1


IMG_HW = 32                      # matches BotNet._get_conv_output_dim
K1, S1, C1 = 8, 2, 32
K2, S2, C2 = 4, 2, 64
K3, S3, C3 = 3, 1, 64
H1 = _conv_out(IMG_HW, K1, S1)   # 13
H2 = _conv_out(H1, K2, S2)       # 5
H3 = _conv_out(H2, K3, S3)       # 3
N1, N2, N3 = H1 * H1, H2 * H2, H3 * H3          # 169, 25, 9
N1_EVEN = (N1 + 1) // 2                         # 85 even-parity conv1 rows
P2_DIM = C1 * K2 * K2                           # 512
P3_DIM = C2 * K3 * K3                           # 576
IMG_FEAT = C3 * N3                              # 576 == torch image_feature_dim


# ------------------------------- fused kernel --------------------------------

def _botnet_kernel(p1_ref, lid_ref,
                   c1w_ref, c1b_ref, c2w_ref, c2b_ref, c3w_ref, c3b_ref,
                   l1w_ref, l1b_ref, l2w_ref, l2b_ref, l3w_ref, l3b_ref,
                   fiw_ref, flw_ref, fb_ref, f2w_ref, f2b_ref, g_ref, beta_ref,
                   o_ref,
                   a1_ref, p2_ref, a2_ref, p3_ref, if_ref):
    """One batch element per grid step; everything stays in VMEM."""
    f32, bf16 = jnp.float32, jnp.bfloat16

    # ---- conv1 (+ folded BN shift, ReLU) ------------------------------------
    # p1 rows are the conv1 output positions, pre-reordered [even..., odd...].
    a1 = jnp.dot(p1_ref[0], c1w_ref[...], preferred_element_type=f32)
    a1_ref[...] = jnp.maximum(a1 + c1b_ref[...], 0.0)

    # ---- conv2: in-kernel im2col gather (contiguous static slices) ---------
    # conv1 row needed for output (y2, x2), kernel offset (dy, dx) is
    # r = 26*y2 + 2*x2 + q with q = 13*dy + dx; parity(r) == parity(q), so in
    # the parity-reordered a1 scratch the 5 rows over x2 are contiguous.
    for dy in range(K2):
        for dx in range(K2):
            q = H1 * dy + dx
            base = (N1_EVEN if q % 2 else 0) + q // 2
            col = C1 * (K2 * dy + dx)
            for y2 in range(H2):
                src = base + H1 * y2
                p2_ref[H2 * y2:H2 * y2 + H2, col:col + C1] = a1_ref[src:src + H2, :]
    a2 = jnp.dot(p2_ref[...].astype(bf16), c2w_ref[...], preferred_element_type=f32)
    a2_ref[...] = jnp.maximum(a2 + c2b_ref[...], 0.0)

    # ---- conv3: in-kernel im2col gather (stride 1 -> already contiguous) ----
    for dy in range(K3):
        for dx in range(K3):
            col = C2 * (K3 * dy + dx)
            for y3 in range(H3):
                src = H2 * (y3 + dy) + dx
                p3_ref[H3 * y3:H3 * y3 + H3, col:col + C2] = a2_ref[src:src + H3, :]
    a3 = jnp.dot(p3_ref[...].astype(bf16), c3w_ref[...], preferred_element_type=f32)
    a3 = jnp.maximum(a3 + c3b_ref[...], 0.0)                  # (N3, C3)

    # ---- NHWC flatten of the conv features into one (1, 576) row -----------
    for p in range(N3):
        if_ref[0:1, C3 * p:C3 * (p + 1)] = a3[p:p + 1, :]

    # ---- lidar MLP (Dropout = identity at inference) ------------------------
    # TODO(synk): training-mode dropout masks are not implemented.
    l = jnp.dot(lid_ref[0], l1w_ref[...], preferred_element_type=f32)
    l = jnp.maximum(l + l1b_ref[...], 0.0)
    l = jnp.dot(l.astype(bf16), l2w_ref[...], preferred_element_type=f32)
    l = jnp.maximum(l + l2b_ref[...], 0.0)
    l = jnp.dot(l.astype(bf16), l3w_ref[...], preferred_element_type=f32)
    l = jnp.maximum(l + l3b_ref[...], 0.0)

    # ---- combined_layers[0]: cat(img, lidar) @ W == img@Wi + lidar@Wl -------
    h = (jnp.dot(if_ref[...].astype(bf16), fiw_ref[...], preferred_element_type=f32)
         + jnp.dot(l.astype(bf16), flw_ref[...], preferred_element_type=f32)
         + fb_ref[...])
    h = jnp.maximum(h, 0.0)

    # ---- combined_layers[-2:]: Linear(512, out_dim) + LayerNorm(out_dim) ----
    y = jnp.dot(h.astype(bf16), f2w_ref[...], preferred_element_type=f32) + f2b_ref[...]
    mean = jnp.mean(y, axis=-1, keepdims=True)
    var = jnp.mean(jnp.square(y - mean), axis=-1, keepdims=True)
    o_ref[0] = (y - mean) * jax.lax.rsqrt(var + 1e-5) * g_ref[...] + beta_ref[...]


# ------------------------------ forward wrapper -------------------------------

def botnet_forward(image_nchw, lidar, params, model="online"):
    if model not in ("online", "target"):
        raise ValueError("Invalid model specified")
    # `online` and `target` share parameters in the reference module.

    B = image_nchw.shape[0]
    c_in = image_nchw.shape[1]
    patch1_dim = c_in * K1 * K1
    lidar_dim = lidar.shape[-1]
    out_dim = params["f2_b"].shape[-1]

    # NCHW -> NHWC once; conv1 im2col via one XLA patches op; reorder the conv1
    # output rows to [even..., odd...] parity so the in-kernel conv2 gather is
    # purely contiguous static slices.
    x = jnp.transpose(image_nchw, (0, 2, 3, 1)).astype(jnp.bfloat16)
    patches = jax.lax.conv_general_dilated_patches(
        x, filter_shape=(K1, K1), window_strides=(S1, S1), padding="VALID",
        dimension_numbers=("NHWC", "HWIO", "NHWC"))          # (B, H1, H1, 192)
    p1 = patches.reshape(B, N1, patch1_dim)
    p1 = jnp.concatenate([p1[:, 0::2], p1[:, 1::2]], axis=1)
    lid = lidar.reshape(B, 1, lidar_dim).astype(jnp.bfloat16)

    weights = (
        params["c1_w"], params["c1_b"], params["c2_w"], params["c2_b"],
        params["c3_w"], params["c3_b"],
        params["l1_w"], params["l1_b"], params["l2_w"], params["l2_b"],
        params["l3_w"], params["l3_b"],
        params["f1_w_img"], params["f1_w_lid"], params["f1_b"],
        params["f2_w"], params["f2_b"], params["ln_g"], params["ln_b"],
    )

    flops = 2 * B * (N1 * patch1_dim * C1 + N2 * P2_DIM * C2 + N3 * P3_DIM * C3
                     + lidar_dim * 256 + 256 * 128 + 128 * 64
                     + IMG_FEAT * 512 + 64 * 512 + 512 * out_dim)
    bytes_accessed = (p1.size * p1.dtype.itemsize + lid.size * lid.dtype.itemsize
                      + sum(w.size * w.dtype.itemsize for w in weights)
                      + B * out_dim * 4)

    out = pl.pallas_call(
        _botnet_kernel,
        out_shape=jax.ShapeDtypeStruct((B, 1, out_dim), jnp.float32),
        grid=(B,),
        in_specs=[
            pl.BlockSpec((1, N1, patch1_dim), lambda b: (b, 0, 0)),
            pl.BlockSpec((1, 1, lidar_dim), lambda b: (b, 0, 0)),
        ] + [pl.BlockSpec(w.shape, lambda b: (0, 0)) for w in weights],
        out_specs=pl.BlockSpec((1, 1, out_dim), lambda b: (b, 0, 0)),
        scratch_shapes=[
            pltpu.VMEM((N1, C1), jnp.float32),      # conv1 acts (parity order)
            pltpu.VMEM((N2, P2_DIM), jnp.float32),  # conv2 im2col
            pltpu.VMEM((N2, C2), jnp.float32),      # conv2 acts
            pltpu.VMEM((N3, P3_DIM), jnp.float32),  # conv3 im2col
            pltpu.VMEM((1, IMG_FEAT), jnp.float32), # flattened image features
        ],
        # Weights have constant index_maps so they are fetched once; if this is
        # ever scaled up, mark them pipeline_mode=pl.Buffered(1) to avoid
        # double-buffered weight VMEM (matters first on v7x's 64 MiB).
        compiler_params=pltpu.CompilerParams(
            dimension_semantics=("parallel",),
            vmem_limit_bytes=32 * 1024 * 1024,
        ),
        cost_estimate=pl.CostEstimate(flops=flops, transcendentals=2 * B,
                                      bytes_accessed=bytes_accessed),
    )(p1, lid, *weights)
    return out.reshape(B, out_dim)


# ---------------------------- parameter setup ---------------------------------

def _init_linear(key, fan_in, fan_out):
    kw, kb = jax.random.split(key)
    bound = 1.0 / np.sqrt(fan_in)
    w = jax.random.uniform(kw, (fan_in, fan_out), jnp.float32, -bound, bound)
    b = jax.random.uniform(kb, (1, fan_out), jnp.float32, -bound, bound)
    return w.astype(jnp.bfloat16), b


def _init_conv_bn_folded(key, in_ch, out_ch, k):
    """Conv weight in im2col layout with eval-mode BatchNorm folded in."""
    kw, kb, kg, kbe, km, kv = jax.random.split(key, 6)
    fan_in = in_ch * k * k
    bound = 1.0 / np.sqrt(fan_in)
    w = jax.random.uniform(kw, (fan_in, out_ch), jnp.float32, -bound, bound)
    conv_b = jax.random.uniform(kb, (out_ch,), jnp.float32, -bound, bound)
    gamma = 1.0 + 0.1 * jax.random.normal(kg, (out_ch,), jnp.float32)
    beta = 0.1 * jax.random.normal(kbe, (out_ch,), jnp.float32)
    run_mean = 0.1 * jax.random.normal(km, (out_ch,), jnp.float32)
    run_var = 1.0 + 0.1 * jnp.abs(jax.random.normal(kv, (out_ch,), jnp.float32))
    scale = gamma / jnp.sqrt(run_var + 1e-5)
    w_folded = (w * scale[None, :]).astype(jnp.bfloat16)      # BN scale folded
    shift = ((conv_b - run_mean) * scale + beta).reshape(1, out_ch)  # f32 shift
    return w_folded, shift


def init_botnet_params(key, image_channels, lidar_dim, output_dim):
    ks = jax.random.split(key, 8)
    p = {}
    p["c1_w"], p["c1_b"] = _init_conv_bn_folded(ks[0], image_channels, C1, K1)
    p["c2_w"], p["c2_b"] = _init_conv_bn_folded(ks[1], C1, C2, K2)
    p["c3_w"], p["c3_b"] = _init_conv_bn_folded(ks[2], C2, C3, K3)

    p["l1_w"], p["l1_b"] = _init_linear(ks[3], lidar_dim, 256)
    p["l2_w"], p["l2_b"] = _init_linear(ks[4], 256, 128)
    p["l3_w"], p["l3_b"] = _init_linear(ks[5], 128, 64)

    combined_dim = IMG_FEAT + 64
    kw, kb = jax.random.split(ks[6])
    bound = 1.0 / np.sqrt(combined_dim)
    f1_w = jax.random.uniform(kw, (combined_dim, 512), jnp.float32, -bound, bound)
    p["f1_b"] = jax.random.uniform(kb, (1, 512), jnp.float32, -bound, bound)
    # torch Flatten runs over NCHW (c, h, w); the kernel flattens NHWC (h, w, c).
    # Permute the image rows of the combined weight once at init so the fused
    # kernel consumes NHWC-flattened image features directly.  (Only valid for
    # freshly initialized weights; real torch weights would need the explicit
    # channel-order reordering for the conv rows too.)
    w_img = (f1_w[:IMG_FEAT].reshape(C3, H3, H3, 512)
             .transpose(1, 2, 0, 3).reshape(IMG_FEAT, 512))
    p["f1_w_img"] = w_img.astype(jnp.bfloat16)
    p["f1_w_lid"] = f1_w[IMG_FEAT:].astype(jnp.bfloat16)

    p["f2_w"], p["f2_b"] = _init_linear(ks[7], 512, output_dim)
    p["ln_g"] = jnp.ones((1, output_dim), jnp.float32)
    p["ln_b"] = jnp.zeros((1, output_dim), jnp.float32)
    return p


# ------------------------- pure-JAX reference (f32) ---------------------------

def botnet_reference(image_nchw, lidar, params):
    """f32 reference using the same folded weights / layout conventions."""
    B = image_nchw.shape[0]
    f32 = jnp.float32
    x = jnp.transpose(image_nchw, (0, 2, 3, 1)).astype(jnp.bfloat16).astype(f32)
    patches = jax.lax.conv_general_dilated_patches(
        x, filter_shape=(K1, K1), window_strides=(S1, S1), padding="VALID",
        dimension_numbers=("NHWC", "HWIO", "NHWC")).astype(f32)
    a = jnp.maximum(jnp.einsum("bhwk,kc->bhwc", patches,
                               params["c1_w"].astype(f32)) + params["c1_b"][0], 0.0)

    def conv(a, w, b, k, s, cin, cout):
        w_hwio = w.astype(f32).reshape(k, k, cin, cout)
        y = jax.lax.conv_general_dilated(
            a, w_hwio, (s, s), "VALID",
            dimension_numbers=("NHWC", "HWIO", "NHWC"))
        return jnp.maximum(y + b[0], 0.0)

    a = conv(a, params["c2_w"], params["c2_b"], K2, S2, C1, C2)
    a = conv(a, params["c3_w"], params["c3_b"], K3, S3, C2, C3)
    img = a.reshape(B, IMG_FEAT)                        # NHWC flatten

    l = lidar.astype(jnp.bfloat16).astype(f32)
    l = jnp.maximum(l @ params["l1_w"].astype(f32) + params["l1_b"], 0.0)
    l = jnp.maximum(l @ params["l2_w"].astype(f32) + params["l2_b"], 0.0)
    l = jnp.maximum(l @ params["l3_w"].astype(f32) + params["l3_b"], 0.0)

    h = jnp.maximum(img @ params["f1_w_img"].astype(f32)
                    + l @ params["f1_w_lid"].astype(f32) + params["f1_b"], 0.0)
    y = h @ params["f2_w"].astype(f32) + params["f2_b"]
    mean = y.mean(-1, keepdims=True)
    var = jnp.square(y - mean).mean(-1, keepdims=True)
    return (y - mean) * jax.lax.rsqrt(var + 1e-5) * params["ln_g"] + params["ln_b"]


# ----------------------------------- main -------------------------------------

if __name__ == "__main__":
    batch = 2
    image_channels = 3
    lidar_dim = 24
    output_dim = 8

    key = jax.random.PRNGKey(0)
    k_img, k_lidar, k_params = jax.random.split(key, 3)
    image = jax.random.normal(k_img, (batch, image_channels, IMG_HW, IMG_HW),
                              jnp.float32)
    lidar = jax.random.normal(k_lidar, (batch, lidar_dim), jnp.float32)
    params = init_botnet_params(k_params, image_channels, lidar_dim, output_dim)

    fwd = jax.jit(botnet_forward, static_argnames=("model",))
    out = jax.block_until_ready(fwd(image, lidar, params, model="online"))
    assert out.shape == (batch, output_dim)
    assert bool(jnp.all(jnp.isfinite(out)))

    ref = botnet_reference(image, lidar, params)
    err = float(jnp.max(jnp.abs(out - ref)))
    assert err < 0.2, f"max abs error vs f32 reference: {err}"

    print("KERNEL_OK")
</pallas_src>

<mosaic_0001>
module attributes {stable_mosaic.version = 11 : i64} {
  func.func @_botnet_kernel(%arg0: i32, %arg1: memref<1x169x192xbf16, #tpu.memory_space<vmem>>, %arg2: memref<1x1x24xbf16, #tpu.memory_space<vmem>>, %arg3: memref<192x32xbf16, #tpu.memory_space<vmem>>, %arg4: memref<1x32xf32, #tpu.memory_space<vmem>>, %arg5: memref<512x64xbf16, #tpu.memory_space<vmem>>, %arg6: memref<1x64xf32, #tpu.memory_space<vmem>>, %arg7: memref<576x64xbf16, #tpu.memory_space<vmem>>, %arg8: memref<1x64xf32, #tpu.memory_space<vmem>>, %arg9: memref<24x256xbf16, #tpu.memory_space<vmem>>, %arg10: memref<1x256xf32, #tpu.memory_space<vmem>>, %arg11: memref<256x128xbf16, #tpu.memory_space<vmem>>, %arg12: memref<1x128xf32, #tpu.memory_space<vmem>>, %arg13: memref<128x64xbf16, #tpu.memory_space<vmem>>, %arg14: memref<1x64xf32, #tpu.memory_space<vmem>>, %arg15: memref<576x512xbf16, #tpu.memory_space<vmem>>, %arg16: memref<64x512xbf16, #tpu.memory_space<vmem>>, %arg17: memref<1x512xf32, #tpu.memory_space<vmem>>, %arg18: memref<512x8xbf16, #tpu.memory_space<vmem>>, %arg19: memref<1x8xf32, #tpu.memory_space<vmem>>, %arg20: memref<1x8xf32, #tpu.memory_space<vmem>>, %arg21: memref<1x8xf32, #tpu.memory_space<vmem>>, %arg22: memref<1x1x8xf32, #tpu.memory_space<vmem>>, %arg23: memref<169x32xf32, #tpu.memory_space<vmem>>, %arg24: memref<25x512xf32, #tpu.memory_space<vmem>>, %arg25: memref<25x64xf32, #tpu.memory_space<vmem>>, %arg26: memref<9x576xf32, #tpu.memory_space<vmem>>, %arg27: memref<1x576xf32, #tpu.memory_space<vmem>>) attributes {dimension_semantics = [#tpu.dimension_semantics<parallel>], iteration_bounds = array<i64: 2>, scalar_prefetch = 0 : i64, scratch_operands = 5 : i64, tpu.core_type = #tpu.core_type<tc>, window_params = [{transform_indices = @transform_0, window_bounds = array<i64: 1, 169, 192>}, {transform_indices = @transform_1, window_bounds = array<i64: 1, 1, 24>}, {pipeline_mode = #tpu.pipeline_mode<synchronous>, transform_indices = @transform_2, window_bounds = array<i64: 192, 32>}, {pipeline_mode = #tpu.pipeline_mode<synchronous>, transform_indices = @transform_3, window_bounds = array<i64: 1, 32>}, {pipeline_mode = #tpu.pipeline_mode<synchronous>, transform_indices = @transform_4, window_bounds = array<i64: 512, 64>}, {pipeline_mode = #tpu.pipeline_mode<synchronous>, transform_indices = @transform_5, window_bounds = array<i64: 1, 64>}, {pipeline_mode = #tpu.pipeline_mode<synchronous>, transform_indices = @transform_6, window_bounds = array<i64: 576, 64>}, {pipeline_mode = #tpu.pipeline_mode<synchronous>, transform_indices = @transform_7, window_bounds = array<i64: 1, 64>}, {pipeline_mode = #tpu.pipeline_mode<synchronous>, transform_indices = @transform_8, window_bounds = array<i64: 24, 256>}, {pipeline_mode = #tpu.pipeline_mode<synchronous>, transform_indices = @transform_9, window_bounds = array<i64: 1, 256>}, {pipeline_mode = #tpu.pipeline_mode<synchronous>, transform_indices = @transform_10, window_bounds = array<i64: 256, 128>}, {pipeline_mode = #tpu.pipeline_mode<synchronous>, transform_indices = @transform_11, window_bounds = array<i64: 1, 128>}, {pipeline_mode = #tpu.pipeline_mode<synchronous>, transform_indices = @transform_12, window_bounds = array<i64: 128, 64>}, {pipeline_mode = #tpu.pipeline_mode<synchronous>, transform_indices = @transform_13, window_bounds = array<i64: 1, 64>}, {pipeline_mode = #tpu.pipeline_mode<synchronous>, transform_indices = @transform_14, window_bounds = array<i64: 576, 512>}, {pipeline_mode = #tpu.pipeline_mode<synchronous>, transform_indices = @transform_15, window_bounds = array<i64: 64, 512>}, {pipeline_mode = #tpu.pipeline_mode<synchronous>, transform_indices = @transform_16, window_bounds = array<i64: 1, 512>}, {pipeline_mode = #tpu.pipeline_mode<synchronous>, transform_indices = @transform_17, window_bounds = array<i64: 512, 8>}, {pipeline_mode = #tpu.pipeline_mode<synchronous>, transform_indices = @transform_18, window_bounds = array<i64: 1, 8>}, {pipeline_mode = #tpu.pipeline_mode<synchronous>, transform_indices = @transform_19, window_bounds = array<i64: 1, 8>}, {pipeline_mode = #tpu.pipeline_mode<synchronous>, transform_indices = @transform_20, window_bounds = array<i64: 1, 8>}, {transform_indices = @transform_21, window_bounds = array<i64: 1, 1, 8>}]} {
    %c0 = arith.constant 0 : index
    %c0_0 = arith.constant 0 : index
    %c0_1 = arith.constant 0 : index
    %0 = vector.load %arg1[%c0, %c0_0, %c0_1] : memref<1x169x192xbf16, #tpu.memory_space<vmem>>, vector<1x169x192xbf16>
    %1 = vector.shape_cast %0 : vector<1x169x192xbf16> to vector<169x192xbf16>
    %c0_2 = arith.constant 0 : index
    %c0_3 = arith.constant 0 : index
    %2 = vector.load %arg3[%c0_2, %c0_3] : memref<192x32xbf16, #tpu.memory_space<vmem>>, vector<192x32xbf16>
    %cst = arith.constant dense<0.000000e+00> : vector<169x32xf32>
    %3 = tpu.matmul %1, %2, %cst {dimension_numbers = #tpu.dot_dimension_numbers<[1], [0], [0], [1], [0, 0, 1, 1], [], []>} : vector<169x192xbf16>, vector<192x32xbf16>, vector<169x32xf32> -> vector<169x32xf32>
    %c0_4 = arith.constant 0 : index
    %c0_5 = arith.constant 0 : index
    %4 = vector.load %arg4[%c0_4, %c0_5] : memref<1x32xf32, #tpu.memory_space<vmem>>, vector<1x32xf32>
    %5 = vector.broadcast %4 : vector<1x32xf32> to vector<169x32xf32>
    %6 = arith.addf %3, %5 : vector<169x32xf32>
    %cst_6 = arith.constant 0.000000e+00 : f32
    %7 = vector.broadcast %cst_6 : f32 to vector<169x32xf32>
    %8 = arith.maximumf %6, %7 : vector<169x32xf32>
    %c0_7 = arith.constant 0 : index
    %c0_8 = arith.constant 0 : index
    %9 = vector.load %arg23[%c0_7, %c0_8] : memref<169x32xf32, #tpu.memory_space<vmem>>, vector<169x32xf32>
    tpu.vector_store %arg23[%c0_7, %c0_8], %8 {strides = array<i32>} : memref<169x32xf32, #tpu.memory_space<vmem>>, vector<169x32xf32>,
    %c0_9 = arith.constant 0 : index
    %c0_10 = arith.constant 0 : index
    %10 = vector.load %arg23[%c0_9, %c0_10] : memref<169x32xf32, #tpu.memory_space<vmem>>, vector<5x32xf32>
    %c0_11 = arith.constant 0 : index
    %c0_12 = arith.constant 0 : index
    %11 = vector.load %arg24[%c0_11, %c0_12] : memref<25x512xf32, #tpu.memory_space<vmem>>, vector<5x32xf32>
    tpu.vector_store %arg24[%c0_11, %c0_12], %10 {strides = array<i32>} : memref<25x512xf32, #tpu.memory_space<vmem>>, vector<5x32xf32>,
    %c13 = arith.constant 13 : index
    %c0_13 = arith.constant 0 : index
    %12 = vector.load %arg23[%c13, %c0_13] : memref<169x32xf32, #tpu.memory_space<vmem>>, vector<5x32xf32>
    %c5 = arith.constant 5 : index
    %c0_14 = arith.constant 0 : index
    %13 = vector.load %arg24[%c5, %c0_14] : memref<25x512xf32, #tpu.memory_space<vmem>>, vector<5x32xf32>
    tpu.vector_store %arg24[%c5, %c0_14], %12 {strides = array<i32>} : memref<25x512xf32, #tpu.memory_space<vmem>>, vector<5x32xf32>,
    %c26 = arith.constant 26 : index
    %c0_15 = arith.constant 0 : index
    %14 = vector.load %arg23[%c26, %c0_15] : memref<169x32xf32, #tpu.memory_space<vmem>>, vector<5x32xf32>
    %c10 = arith.constant 10 : index
    %c0_16 = arith.constant 0 : index
    %15 = vector.load %arg24[%c10, %c0_16] : memref<25x512xf32, #tpu.memory_space<vmem>>, vector<5x32xf32>
    tpu.vector_store %arg24[%c10, %c0_16], %14 {strides = array<i32>} : memref<25x512xf32, #tpu.memory_space<vmem>>, vector<5x32xf32>,
    %c39 = arith.constant 39 : index
    %c0_17 = arith.constant 0 : index
    %16 = vector.load %arg23[%c39, %c0_17] : memref<169x32xf32, #tpu.memory_space<vmem>>, vector<5x32xf32>
    %c15 = arith.constant 15 : index
    %c0_18 = arith.constant 0 : index
    %17 = vector.load %arg24[%c15, %c0_18] : memref<25x512xf32, #tpu.memory_space<vmem>>, vector<5x32xf32>
    tpu.vector_store %arg24[%c15, %c0_18], %16 {strides = array<i32>} : memref<25x512xf32, #tpu.memory_space<vmem>>, vector<5x32xf32>,
    %c52 = arith.constant 52 : index
    %c0_19 = arith.constant 0 : index
    %18 = vector.load %arg23[%c52, %c0_19] : memref<169x32xf32, #tpu.memory_space<vmem>>, vector<5x32xf32>
    %c20 = arith.constant 20 : index
    %c0_20 = arith.constant 0 : index
    %19 = vector.load %arg24[%c20, %c0_20] : memref<25x512xf32, #tpu.memory_space<vmem>>, vector<5x32xf32>
    tpu.vector_store %arg24[%c20, %c0_20], %18 {strides = array<i32>} : memref<25x512xf32, #tpu.memory_space<vmem>>, vector<5x32xf32>,
    %c85 = arith.constant 85 : index
    %c0_21 = arith.constant 0 : index
    %20 = vector.load %arg23[%c85, %c0_21] : memref<169x32xf32, #tpu.memory_space<vmem>>, vector<5x32xf32>
    %c0_22 = arith.constant 0 : index
    %c32 = arith.constant 32 : index
    %21 = vector.load %arg24[%c0_22, %c32] : memref<25x512xf32, #tpu.memory_space<vmem>>, vector<5x32xf32>
    tpu.vector_store %arg24[%c0_22, %c32], %20 {strides = array<i32>} : memref<25x512xf32, #tpu.memory_space<vmem>>, vector<5x32xf32>,
    %c98 = arith.constant 98 : index
    %c0_23 = arith.constant 0 : index
    %22 = vector.load %arg23[%c98, %c0_23] : memref<169x32xf32, #tpu.memory_space<vmem>>, vector<5x32xf32>
    %c5_24 = arith.constant 5 : index
    %c32_25 = arith.constant 32 : index
    %23 = vector.load %arg24[%c5_24, %c32_25] : memref<25x512xf32, #tpu.memory_space<vmem>>, vector<5x32xf32>
    tpu.vector_store %arg24[%c5_24, %c32_25], %22 {strides = array<i32>} : memref<25x512xf32, #tpu.memory_space<vmem>>, vector<5x32xf32>,
    %c111 = arith.constant 111 : index
    %c0_26 = arith.constant 0 : index
    %24 = vector.load %arg23[%c111, %c0_26] : memref<169x32xf32, #tpu.memory_space<vmem>>, vector<5x32xf32>
    %c10_27 = arith.constant 10 : index
    %c32_28 = arith.constant 32 : index
    %25 = vector.load %arg24[%c10_27, %c32_28] : memref<25x512xf32, #tpu.memory_space<vmem>>, vector<5x32xf32>
    tpu.vector_store %arg24[%c10_27, %c32_28], %24 {strides = array<i32>} : memref<25x512xf32, #tpu.memory_space<vmem>>, vector<5x32xf32>,
    %c124 = arith.constant 124 : index
    %c0_29 = arith.constant 0 : index
    %26 = vector.load %arg23[%c124, %c0_29] : memref<169x32xf32, #tpu.memory_space<vmem>>, vector<5x32xf32>
    %c15_30 = arith.constant 15 : index
    %c32_31 = arith.constant 32 : index
    %27 = vector.load %arg24[%c15_30, %c32_31] : memref<25x512xf32, #tpu.memory_space<vmem>>, vector<5x32xf32>
    tpu.vector_store %arg24[%c15_30, %c32_31], %26 {strides = array<i32>} : memref<25x512xf32, #tpu.memory_space<vmem>>, vector<5x32xf32>,
    %c137 = arith.constant 137 : index
    %c0_32 = arith.constant 0 : index
    %28 = vector.load %arg23[%c137, %c0_32] : memref<169x32xf32, #tpu.memory_space<vmem>>, vector<5x32xf32>
    %c20_33 = arith.constant 20 : index
    %c32_34 = arith.constant 32 : index
    %29 = vector.load %arg24[%c20_33, %c32_34] : memref<25x512xf32, #tpu.memory_space<vmem>>, vector<5x32xf32>
    tpu.vector_store %arg24[%c20_33, %c32_34], %28 {strides = array<i32>} : memref<25x512xf32, #tpu.memory_space<vmem>>, vector<5x32xf32>,
    %c1 = arith.constant 1 : index
    %c0_35 = arith.constant 0 : index
    %30 = vector.load %arg23[%c1, %c0_35] : memref<169x32xf32, #tpu.memory_space<vmem>>, vector<5x32xf32>
    %c0_36 = arith.constant 0 : index
    %c64 = arith.constant 64 : index
    %31 = vector.load %arg24[%c0_36, %c64] : memref<25x512xf32, #tpu.memory_space<vmem>>, vector<5x32xf32>
    tpu.vector_store %arg24[%c0_36, %c64], %30 {strides = array<i32>} : memref<25x512xf32, #tpu.memory_space<vmem>>, vector<5x32xf32>,
    %c14 = arith.constant 14 : index
    %c0_37 = arith.constant 0 : index
    %32 = vector.load %arg23[%c14, %c0_37] : memref<169x32xf32, #tpu.memory_space<vmem>>, vector<5x32xf32>
    %c5_38 = arith.constant 5 : index
    %c64_39 = arith.constant 64 : index
    %33 = vector.load %arg24[%c5_38, %c64_39] : memref<25x512xf32, #tpu.memory_space<vmem>>, vector<5x32xf32>
    tpu.vector_store %arg24[%c5_38, %c64_39], %32 {strides = array<i32>} : memref<25x512xf32, #tpu.memory_space<vmem>>, vector<5x32xf32>,
    %c27 = arith.constant 27 : index
    %c0_40 = arith.constant 0 : index
    %34 = vector.load %arg23[%c27, %c0_40] : memref<169x32xf32, #tpu.memory_space<vmem>>, vector<5x32xf32>
    %c10_41 = arith.constant 10 : index
    %c64_42 = arith.constant 64 : index
    %35 = vector.load %arg24[%c10_41, %c64_42] : memref<25x512xf32, #tpu.memory_space<vmem>>, vector<5x32xf32>
    tpu.vector_store %arg24[%c10_41, %c64_42], %34 {strides = array<i32>} : memref<25x512xf32, #tpu.memory_space<vmem>>, vector<5x32xf32>,
    %c40 = arith.constant 40 : index
    %c0_43 = arith.constant 0 : index
    %36 = vector.load %arg23[%c40, %c0_43] : memref<169x32xf32, #tpu.memory_space<vmem>>, vector<5x32xf32>
    %c15_44 = arith.constant 15 : index
    %c64_45 = arith.constant 64 : index
    %37 = vector.load %arg24[%c15_44, %c64_45] : memref<25x512xf32, #tpu.memory_space<vmem>>, vector<5x32xf32>
    tpu.vector_store %arg24[%c15_44, %c64_45], %36 {strides = array<i32>} : memref<25x512xf32, #tpu.memory_space<vmem>>, vector<5x32xf32>,
    %c53 = arith.constant 53 : index
    %c0_46 = arith.constant 0 : index
    %38 = vector.load %arg23[%c53, %c0_46] : memref<169x32xf32, #tpu.memory_space<vmem>>, vector<5x32xf32>
    %c20_47 = arith.constant 20 : index
    %c64_48 = arith.constant 64 : index
    %39 = vector.load %arg24[%c20_47, %c64_48] : memref<25x512xf32, #tpu.memory_space<vmem>>, vector<5x32xf32>
    tpu.vector_store %arg24[%c20_47, %c64_48], %38 {strides = array<i32>} : memref<25x512xf32, #tpu.memory_space<vmem>>, vector<5x32xf32>,
    %c86 = arith.constant 86 : index
    %c0_49 = arith.constant 0 : index
    %40 = vector.load %arg23[%c86, %c0_49] : memref<169x32xf32, #tpu.memory_space<vmem>>, vector<5x32xf32>
    %c0_50 = arith.constant 0 : index
    %c96 = arith.constant 96 : index
    %41 = vector.load %arg24[%c0_50, %c96] : memref<25x512xf32, #tpu.memory_space<vmem>>, vector<5x32xf32>
    tpu.vector_store %arg24[%c0_50, %c96], %40 {strides = array<i32>} : memref<25x512xf32, #tpu.memory_space<vmem>>, vector<5x32xf32>,
    %c99 = arith.constant 99 : index
    %c0_51 = arith.constant 0 : index
    %42 = vector.load %arg23[%c99, %c0_51] : memref<169x32xf32, #tpu.memory_space<vmem>>, vector<5x32xf32>
    %c5_52 = arith.constant 5 : index
    %c96_53 = arith.constant 96 : index
    %43 = vector.load %arg24[%c5_52, %c96_53] : memref<25x512xf32, #tpu.memory_space<vmem>>, vector<5x32xf32>
    tpu.vector_store %arg24[%c5_52, %c96_53], %42 {strides = array<i32>} : memref<25x512xf32, #tpu.memory_space<vmem>>, vector<5x32xf32>,
    %c112 = arith.constant 112 : index
    %c0_54 = arith.constant 0 : index
    %44 = vector.load %arg23[%c112, %c0_54] : memref<169x32xf32, #tpu.memory_space<vmem>>, vector<5x32xf32>
    %c10_55 = arith.constant 10 : index
    %c96_56 = arith.constant 96 : index
    %45 = vector.load %arg24[%c10_55, %c96_56] : memref<25x512xf32, #tpu.memory_space<vmem>>, vector<5x32xf32>
    tpu.vector_store %arg24[%c10_55, %c96_56], %44 {strides = array<i32>} : memref<25x512xf32, #tpu.memory_space<vmem>>, vector<5x32xf32>,
    %c125 = arith.constant 125 : index
    %c0_57 = arith.constant 0 : index
    %46 = vector.load %arg23[%c125, %c0_57] : memref<169x32xf32, #tpu.memory_space<vmem>>, vector<5x32xf32>
    %c15_58 = arith.constant 15 : index
    %c96_59 = arith.constant 96 : index
    %47 = vector.load %arg24[%c15_58, %c96_59] : memref<25x512xf32, #tpu.memory_space<vmem>>, vector<5x32xf32>
    tpu.vector_store %arg24[%c15_58, %c96_59], %46 {strides = array<i32>} : memref<25x512xf32, #tpu.memory_space<vmem>>, vector<5x32xf32>,
    %c138 = arith.constant 138 : index
    %c0_60 = arith.constant 0 : index
    %48 = vector.load %arg23[%c138, %c0_60] : memref<169x32xf32, #tpu.memory_space<vmem>>, vector<5x32xf32>
    %c20_61 = arith.constant 20 : index
    %c96_62 = arith.constant 96 : index
    %49 = vector.load %arg24[%c20_61, %c96_62] : memref<25x512xf32, #tpu.memory_space<vmem>>, vector<5x32xf32>
    tpu.vector_store %arg24[%c20_61, %c96_62], %48 {strides = array<i32>} : memref<25x512xf32, #tpu.memory_space<vmem>>, vector<5x32xf32>,
    %c91 = arith.constant 91 : index
    %c0_63 = arith.constant 0 : index
    %50 = vector.load %arg23[%c91, %c0_63] : memref<169x32xf32, #tpu.memory_space<vmem>>, vector<5x32xf32>
    %c0_64 = arith.constant 0 : index
    %c128 = arith.constant 128 : index
    %51 = vector.load %arg24[%c0_64, %c128] : memref<25x512xf32, #tpu.memory_space<vmem>>, vector<5x32xf32>
    tpu.vector_store %arg24[%c0_64, %c128], %50 {strides = array<i32>} : memref<25x512xf32, #tpu.memory_space<vmem>>, vector<5x32xf32>,
    %c104 = arith.constant 104 : index
    %c0_65 = arith.constant 0 : index
    %52 = vector.load %arg23[%c104, %c0_65] : memref<169x32xf32, #tpu.memory_space<vmem>>, vector<5x32xf32>
    %c5_66 = arith.constant 5 : index
    %c128_67 = arith.constant 128 : index
    %53 = vector.load %arg24[%c5_66, %c128_67] : memref<25x512xf32, #tpu.memory_space<vmem>>, vector<5x32xf32>
    tpu.vector_store %arg24[%c5_66, %c128_67], %52 {strides = array<i32>} : memref<25x512xf32, #tpu.memory_space<vmem>>, vector<5x32xf32>,
    %c117 = arith.constant 117 : index
    %c0_68 = arith.constant 0 : index
    %54 = vector.load %arg23[%c117, %c0_68] : memref<169x32xf32, #tpu.memory_space<vmem>>, vector<5x32xf32>
    %c10_69 = arith.constant 10 : index
    %c128_70 = arith.constant 128 : index
    %55 = vector.load %arg24[%c10_69, %c128_70] : memref<25x512xf32, #tpu.memory_space<vmem>>, vector<5x32xf32>
    tpu.vector_store %arg24[%c10_69, %c128_70], %54 {strides = array<i32>} : memref<25x512xf32, #tpu.memory_space<vmem>>, vector<5x32xf32>,
    %c130 = arith.constant 130 : index
    %c0_71 = arith.constant 0 : index
    %56 = vector.load %arg23[%c130, %c0_71] : memref<169x32xf32, #tpu.memory_space<vmem>>, vector<5x32xf32>
    %c15_72 = arith.constant 15 : index
    %c128_73 = arith.constant 128 : index
    %57 = vector.load %arg24[%c15_72, %c128_73] : memref<25x512xf32, #tpu.memory_space<vmem>>, vector<5x32xf32>
    tpu.vector_store %arg24[%c15_72, %c128_73], %56 {strides = array<i32>} : memref<25x512xf32, #tpu.memory_space<vmem>>, vector<5x32xf32>,
    %c143 = arith.constant 143 : index
    %c0_74 = arith.constant 0 : index
    %58 = vector.load %arg23[%c143, %c0_74] : memref<169x32xf32, #tpu.memory_space<vmem>>, vector<5x32xf32>
    %c20_75 = arith.constant 20 : index
    %c128_76 = arith.constant 128 : index
    %59 = vector.load %arg24[%c20_75, %c128_76] : memref<25x512xf32, #tpu.memory_space<vmem>>, vector<5x32xf32>
    tpu.vector_store %arg24[%c20_75, %c128_76], %58 {strides = array<i32>} : memref<25x512xf32, #tpu.memory_space<vmem>>, vector<5x32xf32>,
    %c7 = arith.constant 7 : index
    %c0_77 = arith.constant 0 : index
    %60 = vector.load %arg23[%c7, %c0_77] : memref<169x32xf32, #tpu.memory_space<vmem>>, vector<5x32xf32>
    %c0_78 = arith.constant 0 : index
    %c160 = arith.constant 160 : index
    %61 = vector.load %arg24[%c0_78, %c160] : memref<25x512xf32, #tpu.memory_space<vmem>>, vector<5x32xf32>
    tpu.vector_store %arg24[%c0_78, %c160], %60 {strides = array<i32>} : memref<25x512xf32, #tpu.memory_space<vmem>>, vector<5x32xf32>,
    %c20_79 = arith.constant 20 : index
    %c0_80 = arith.constant 0 : index
    %62 = vector.load %arg23[%c20_79, %c0_80] : memref<169x32xf32, #tpu.memory_space<vmem>>, vector<5x32xf32>
    %c5_81 = arith.constant 5 : index
    %c160_82 = arith.constant 160 : index
    %63 = vector.load %arg24[%c5_81, %c160_82] : memref<25x512xf32, #tpu.memory_space<vmem>>, vector<5x32xf32>
    tpu.vector_store %arg24[%c5_81, %c160_82], %62 {strides = array<i32>} : memref<25x512xf32, #tpu.memory_space<vmem>>, vector<5x32xf32>,
    %c33 = arith.constant 33 : index
    %c0_83 = arith.constant 0 : index
    %64 = vector.load %arg23[%c33, %c0_83] : memref<169x32xf32, #tpu.memory_space<vmem>>, vector<5x32xf32>
    %c10_84 = arith.constant 10 : index
    %c160_85 = arith.constant 160 : index
    %65 = vector.load %arg24[%c10_84, %c160_85] : memref<25x512xf32, #tpu.memory_space<vmem>>, vector<5x32xf32>
    tpu.vector_store %arg24[%c10_84, %c160_85], %64 {strides = array<i32>} : memref<25x512xf32, #tpu.memory_space<vmem>>, vector<5x32xf32>,
    %c46 = arith.constant 46 : index
    %c0_86 = arith.constant 0 : index
    %66 = vector.load %arg23[%c46, %c0_86] : memref<169x32xf32, #tpu.memory_space<vmem>>, vector<5x32xf32>
    %c15_87 = arith.constant 15 : index
    %c160_88 = arith.constant 160 : index
    %67 = vector.load %arg24[%c15_87, %c160_88] : memref<25x512xf32, #tpu.memory_space<vmem>>, vector<5x32xf32>
    tpu.vector_store %arg24[%c15_87, %c160_88], %66 {strides = array<i32>} : memref<25x512xf32, #tpu.memory_space<vmem>>, vector<5x32xf32>,
    %c59 = arith.constant 59 : index
    %c0_89 = arith.constant 0 : index
    %68 = vector.load %arg23[%c59, %c0_89] : memref<169x32xf32, #tpu.memory_space<vmem>>, vector<5x32xf32>
    %c20_90 = arith.constant 20 : index
    %c160_91 = arith.constant 160 : index
    %69 = vector.load %arg24[%c20_90, %c160_91] : memref<25x512xf32, #tpu.memory_space<vmem>>, vector<5x32xf32>
    tpu.vector_store %arg24[%c20_90, %c160_91], %68 {strides = array<i32>} : memref<25x512xf32, #tpu.memory_space<vmem>>, vector<5x32xf32>,
    %c92 = arith.constant 92 : index
    %c0_92 = arith.constant 0 : index
    %70 = vector.load %arg23[%c92, %c0_92] : memref<169x32xf32, #tpu.memory_space<vmem>>, vector<5x32xf32>
    %c0_93 = arith.constant 0 : index
    %c192 = arith.constant 192 : index
    %71 = vector.load %arg24[%c0_93, %c192] : memref<25x512xf32, #tpu.memory_space<vmem>>, vector<5x32xf32>
    tpu.vector_store %arg24[%c0_93, %c192], %70 {strides = array<i32>} : memref<25x512xf32, #tpu.memory_space<vmem>>, vector<5x32xf32>,
    %c105 = arith.constant 105 : index
    %c0_94 = arith.constant 0 : index
    %72 = vector.load %arg23[%c105, %c0_94] : memref<169x32xf32, #tpu.memory_space<vmem>>, vector<5x32xf32>
    %c5_95 = arith.constant 5 : index
    %c192_96 = arith.constant 192 : index
    %73 = vector.load %arg24[%c5_95, %c192_96] : memref<25x512xf32, #tpu.memory_space<vmem>>, vector<5x32xf32>
    tpu.vector_store %arg24[%c5_95, %c192_96], %72 {strides = array<i32>} : memref<25x512xf32, #tpu.memory_space<vmem>>, vector<5x32xf32>,
    %c118 = arith.constant 118 : index
    %c0_97 = arith.constant 0 : index
    %74 = vector.load %arg23[%c118, %c0_97] : memref<169x32xf32, #tpu.memory_space<vmem>>, vector<5x32xf32>
    %c10_98 = arith.constant 10 : index
    %c192_99 = arith.constant 192 : index
    %75 = vector.load %arg24[%c10_98, %c192_99] : memref<25x512xf32, #tpu.memory_space<vmem>>, vector<5x32xf32>
    tpu.vector_store %arg24[%c10_98, %c192_99], %74 {strides = array<i32>} : memref<25x512xf32, #tpu.memory_space<vmem>>, vector<5x32xf32>,
    %c131 = arith.constant 131 : index
    %c0_100 = arith.constant 0 : index
    %76 = vector.load %arg23[%c131, %c0_100] : memref<169x32xf32, #tpu.memory_space<vmem>>, vector<5x32xf32>
    %c15_101 = arith.constant 15 : index
    %c192_102 = arith.constant 192 : index
    %77 = vector.load %arg24[%c15_101, %c192_102] : memref<25x512xf32, #tpu.memory_space<vmem>>, vector<5x32xf32>
    tpu.vector_store %arg24[%c15_101, %c192_102], %76 {strides = array<i32>} : memref<25x512xf32, #tpu.memory_space<vmem>>, vector<5x32xf32>,
    %c144 = arith.constant 144 : index
    %c0_103 = arith.constant 0 : index
    %78 = vector.load %arg23[%c144, %c0_103] : memref<169x32xf32, #tpu.memory_space<vmem>>, vector<5x32xf32>
    %c20_104 = arith.constant 20 : index
    %c192_105 = arith.constant 192 : index
    %79 = vector.load %arg24[%c20_104, %c192_105] : memref<25x512xf32, #tpu.memory_space<vmem>>, vector<5x32xf32>
    tpu.vector_store %arg24[%c20_104, %c192_105], %78 {strides = array<i32>} : memref<25x512xf32, #tpu.memory_space<vmem>>, vector<5x32xf32>,
    %c8 = arith.constant 8 : index
    %c0_106 = arith.constant 0 : index
    %80 = vector.load %arg23[%c8, %c0_106] : memref<169x32xf32, #tpu.memory_space<vmem>>, vector<5x32xf32>
    %c0_107 = arith.constant 0 : index
    %c224 = arith.constant 224 : index
    %81 = vector.load %arg24[%c0_107, %c224] : memref<25x512xf32, #tpu.memory_space<vmem>>, vector<5x32xf32>
    tpu.vector_store %arg24[%c0_107, %c224], %80 {strides = array<i32>} : memref<25x512xf32, #tpu.memory_space<vmem>>, vector<5x32xf32>,
    %c21 = arith.constant 21 : index
    %c0_108 = arith.constant 0 : index
    %82 = vector.load %arg23[%c21, %c0_108] : memref<169x32xf32, #tpu.memory_space<vmem>>, vector<5x32xf32>
    %c5_109 = arith.constant 5 : index
    %c224_110 = arith.constant 224 : index
    %83 = vector.load %arg24[%c5_109, %c224_110] : memref<25x512xf32, #tpu.memory_space<vmem>>, vector<5x32xf32>
    tpu.vector_store %arg24[%c5_109, %c224_110], %82 {strides = array<i32>} : memref<25x512xf32, #tpu.memory_space<vmem>>, vector<5x32xf32>,
    %c34 = arith.constant 34 : index
    %c0_111 = arith.constant 0 : index
    %84 = vector.load %arg23[%c34, %c0_111] : memref<169x32xf32, #tpu.memory_space<vmem>>, vector<5x32xf32>
    %c10_112 = arith.constant 10 : index
    %c224_113 = arith.constant 224 : index
    %85 = vector.load %arg24[%c10_112, %c224_113] : memref<25x512xf32, #tpu.memory_space<vmem>>, vector<5x32xf32>
    tpu.vector_store %arg24[%c10_112, %c224_113], %84 {strides = array<i32>} : memref<25x512xf32, #tpu.memory_space<vmem>>, vector<5x32xf32>,
    %c47 = arith.constant 47 : index
    %c0_114 = arith.constant 0 : index
    %86 = vector.load %arg23[%c47, %c0_114] : memref<169x32xf32, #tpu.memory_space<vmem>>, vector<5x32xf32>
    %c15_115 = arith.constant 15 : index
    %c224_116 = arith.constant 224 : index
    %87 = vector.load %arg24[%c15_115, %c224_116] : memref<25x512xf32, #tpu.memory_space<vmem>>, vector<5x32xf32>
    tpu.vector_store %arg24[%c15_115, %c224_116], %86 {strides = array<i32>} : memref<25x512xf32, #tpu.memory_space<vmem>>, vector<5x32xf32>,
    %c60 = arith.constant 60 : index
    %c0_117 = arith.constant 0 : index
    %88 = vector.load %arg23[%c60, %c0_117] : memref<169x32xf32, #tpu.memory_space<vmem>>, vector<5x32xf32>
    %c20_118 = arith.constant 20 : index
    %c224_119 = arith.constant 224 : index
    %89 = vector.load %arg24[%c20_118, %c224_119] : memref<25x512xf32, #tpu.memory_space<vmem>>, vector<5x32xf32>
    tpu.vector_store %arg24[%c20_118, %c224_119], %88 {strides = array<i32>} : memref<25x512xf32, #tpu.memory_space<vmem>>, vector<5x32xf32>,
    %c13_120 = arith.constant 13 : index
    %c0_121 = arith.constant 0 : index
    %90 = vector.load %arg23[%c13_120, %c0_121] : memref<169x32xf32, #tpu.memory_space<vmem>>, vector<5x32xf32>
    %c0_122 = arith.constant 0 : index
    %c256 = arith.constant 256 : index
    %91 = vector.load %arg24[%c0_122, %c256] : memref<25x512xf32, #tpu.memory_space<vmem>>, vector<5x32xf32>
    tpu.vector_store %arg24[%c0_122, %c256], %90 {strides = array<i32>} : memref<25x512xf32, #tpu.memory_space<vmem>>, vector<5x32xf32>,
    %c26_123 = arith.constant 26 : index
    %c0_124 = arith.constant 0 : index
    %92 = vector.load %arg23[%c26_123, %c0_124] : memref<169x32xf32, #tpu.memory_space<vmem>>, vector<5x32xf32>
    %c5_125 = arith.constant 5 : index
    %c256_126 = arith.constant 256 : index
    %93 = vector.load %arg24[%c5_125, %c256_126] : memref<25x512xf32, #tpu.memory_space<vmem>>, vector<5x32xf32>
    tpu.vector_store %arg24[%c5_125, %c256_126], %92 {strides = array<i32>} : memref<25x512xf32, #tpu.memory_space<vmem>>, vector<5x32xf32>,
    %c39_127 = arith.constant 39 : index
    %c0_128 = arith.constant 0 : index
    %94 = vector.load %arg23[%c39_127, %c0_128] : memref<169x32xf32, #tpu.memory_space<vmem>>, vector<5x32xf32>
    %c10_129 = arith.constant 10 : index
    %c256_130 = arith.constant 256 : index
    %95 = vector.load %arg24[%c10_129, %c256_130] : memref<25x512xf32, #tpu.memory_space<vmem>>, vector<5x32xf32>
    tpu.vector_store %arg24[%c10_129, %c256_130], %94 {strides = array<i32>} : memref<25x512xf32, #tpu.memory_space<vmem>>, vector<5x32xf32>,
    %c52_131 = arith.constant 52 : index
    %c0_132 = arith.constant 0 : index
    %96 = vector.load %arg23[%c52_131, %c0_132] : memref<169x32xf32, #tpu.memory_space<vmem>>, vector<5x32xf32>
    %c15_133 = arith.constant 15 : index
    %c256_134 = arith.constant 256 : index
    %97 = vector.load %arg24[%c15_133, %c256_134] : memref<25x512xf32, #tpu.memory_space<vmem>>, vector<5x32xf32>
    tpu.vector_store %arg24[%c15_133, %c256_134], %96 {strides = array<i32>} : memref<25x512xf32, #tpu.memory_space<vmem>>, vector<5x32xf32>,
    %c65 = arith.constant 65 : index
    %c0_135 = arith.constant 0 : index
    %98 = vector.load %arg23[%c65, %c0_135] : memref<169x32xf32, #tpu.memory_space<vmem>>, vector<5x32xf32>
    %c20_136 = arith.constant 20 : index
    %c256_137 = arith.constant 256 : index
    %99 = vector.load %arg24[%c20_136, %c256_137] : memref<25x512xf32, #tpu.memory_space<vmem>>, vector<5x32xf32>
    tpu.vector_store %arg24[%c20_136, %c256_137], %98 {strides = array<i32>} : memref<25x512xf32, #tpu.memory_space<vmem>>, vector<5x32xf32>,
    %c98_138 = arith.constant 98 : index
    %c0_139 = arith.constant 0 : index
    %100 = vector.load %arg23[%c98_138, %c0_139] : memref<169x32xf32, #tpu.memory_space<vmem>>, vector<5x32xf32>
    %c0_140 = arith.constant 0 : index
    %c288 = arith.constant 288 : index
    %101 = vector.load %arg24[%c0_140, %c288] : memref<25x512xf32, #tpu.memory_space<vmem>>, vector<5x32xf32>
    tpu.vector_store %arg24[%c0_140, %c288], %100 {strides = array<i32>} : memref<25x512xf32, #tpu.memory_space<vmem>>, vector<5x32xf32>,
    %c111_141 = arith.constant 111 : index
    %c0_142 = arith.constant 0 : index
    %102 = vector.load %arg23[%c111_141, %c0_142] : memref<169x32xf32, #tpu.memory_space<vmem>>, vector<5x32xf32>
    %c5_143 = arith.constant 5 : index
    %c288_144 = arith.constant 288 : index
    %103 = vector.load %arg24[%c5_143, %c288_144] : memref<25x512xf32, #tpu.memory_space<vmem>>, vector<5x32xf32>
    tpu.vector_store %arg24[%c5_143, %c288_144], %102 {strides = array<i32>} : memref<25x512xf32, #tpu.memory_space<vmem>>, vector<5x32xf32>,
    %c124_145 = arith.constant 124 : index
    %c0_146 = arith.constant 0 : index
    %104 = vector.load %arg23[%c124_145, %c0_146] : memref<169x32xf32, #tpu.memory_space<vmem>>, vector<5x32xf32>
    %c10_147 = arith.constant 10 : index
    %c288_148 = arith.constant 288 : index
    %105 = vector.load %arg24[%c10_147, %c288_148] : memref<25x512xf32, #tpu.memory_space<vmem>>, vector<5x32xf32>
    tpu.vector_store %arg24[%c10_147, %c288_148], %104 {strides = array<i32>} : memref<25x512xf32, #tpu.memory_space<vmem>>, vector<5x32xf32>,
    %c137_149 = arith.constant 137 : index
    %c0_150 = arith.constant 0 : index
    %106 = vector.load %arg23[%c137_149, %c0_150] : memref<169x32xf32, #tpu.memory_space<vmem>>, vector<5x32xf32>
    %c15_151 = arith.constant 15 : index
    %c288_152 = arith.constant 288 : index
    %107 = vector.load %arg24[%c15_151, %c288_152] : memref<25x512xf32, #tpu.memory_space<vmem>>, vector<5x32xf32>
    tpu.vector_store %arg24[%c15_151, %c288_152], %106 {strides = array<i32>} : memref<25x512xf32, #tpu.memory_space<vmem>>, vector<5x32xf32>,
    %c150 = arith.constant 150 : index
    %c0_153 = arith.constant 0 : index
    %108 = vector.load %arg23[%c150, %c0_153] : memref<169x32xf32, #tpu.memory_space<vmem>>, vector<5x32xf32>
    %c20_154 = arith.constant 20 : index
    %c288_155 = arith.constant 288 : index
    %109 = vector.load %arg24[%c20_154, %c288_155] : memref<25x512xf32, #tpu.memory_space<vmem>>, vector<5x32xf32>
    tpu.vector_store %arg24[%c20_154, %c288_155], %108 {strides = array<i32>} : memref<25x512xf32, #tpu.memory_space<vmem>>, vector<5x32xf32>,
    %c14_156 = arith.constant 14 : index
    %c0_157 = arith.constant 0 : index
    %110 = vector.load %arg23[%c14_156, %c0_157] : memref<169x32xf32, #tpu.memory_space<vmem>>, vector<5x32xf32>
    %c0_158 = arith.constant 0 : index
    %c320 = arith.constant 320 : index
    %111 = vector.load %arg24[%c0_158, %c320] : memref<25x512xf32, #tpu.memory_space<vmem>>, vector<5x32xf32>
    tpu.vector_store %arg24[%c0_158, %c320], %110 {strides = array<i32>} : memref<25x512xf32, #tpu.memory_space<vmem>>, vector<5x32xf32>,
    %c27_159 = arith.constant 27 : index
    %c0_160 = arith.constant 0 : index
    %112 = vector.load %arg23[%c27_159, %c0_160] : memref<169x32xf32, #tpu.memory_space<vmem>>, vector<5x32xf32>
    %c5_161 = arith.constant 5 : index
    %c320_162 = arith.constant 320 : index
    %113 = vector.load %arg24[%c5_161, %c320_162] : memref<25x512xf32, #tpu.memory_space<vmem>>, vector<5x32xf32>
    tpu.vector_store %arg24[%c5_161, %c320_162], %112 {strides = array<i32>} : memref<25x512xf32, #tpu.memory_space<vmem>>, vector<5x32xf32>,
    %c40_163 = arith.constant 40 : index
    %c0_164 = arith.constant 0 : index
    %114 = vector.load %arg23[%c40_163, %c0_164] : memref<169x32xf32, #tpu.memory_space<vmem>>, vector<5x32xf32>
    %c10_165 = arith.constant 10 : index
    %c320_166 = arith.constant 320 : index
    %115 = vector.load %arg24[%c10_165, %c320_166] : memref<25x512xf32, #tpu.memory_space<vmem>>, vector<5x32xf32>
    tpu.vector_store %arg24[%c10_165, %c320_166], %114 {strides = array<i32>} : memref<25x512xf32, #tpu.memory_space<vmem>>, vector<5x32xf32>,
    %c53_167 = arith.constant 53 : index
    %c0_168 = arith.constant 0 : index
    %116 = vector.load %arg23[%c53_167, %c0_168] : memref<169x32xf32, #tpu.memory_space<vmem>>, vector<5x32xf32>
    %c15_169 = arith.constant 15 : index
    %c320_170 = arith.constant 320 : index
    %117 = vector.load %arg24[%c15_169, %c320_170] : memref<25x512xf32, #tpu.memory_space<vmem>>, vector<5x32xf32>
    tpu.vector_store %arg24[%c15_169, %c320_170], %116 {strides = array<i32>} : memref<25x512xf32, #tpu.memory_space<vmem>>, vector<5x32xf32>,
    %c66 = arith.constant 66 : index
    %c0_171 = arith.constant 0 : index
    %118 = vector.load %arg23[%c66, %c0_171] : memref<169x32xf32, #tpu.memory_space<vmem>>, vector<5x32xf32>
    %c20_172 = arith.constant 20 : index
    %c320_173 = arith.constant 320 : index
    %119 = vector.load %arg24[%c20_172, %c320_173] : memref<25x512xf32, #tpu.memory_space<vmem>>, vector<5x32xf32>
    tpu.vector_store %arg24[%c20_172, %c320_173], %118 {strides = array<i32>} : memref<25x512xf32, #tpu.memory_space<vmem>>, vector<5x32xf32>,
    %c99_174 = arith.constant 99 : index
    %c0_175 = arith.constant 0 : index
    %120 = vector.load %arg23[%c99_174, %c0_175] : memref<169x32xf32, #tpu.memory_space<vmem>>, vector<5x32xf32>
    %c0_176 = arith.constant 0 : index
    %c352 = arith.constant 352 : index
    %121 = vector.load %arg24[%c0_176, %c352] : memref<25x512xf32, #tpu.memory_space<vmem>>, vector<5x32xf32>
    tpu.vector_store %arg24[%c0_176, %c352], %120 {strides = array<i32>} : memref<25x512xf32, #tpu.memory_space<vmem>>, vector<5x32xf32>,
    %c112_177 = arith.constant 112 : index
    %c0_178 = arith.constant 0 : index
    %122 = vector.load %arg23[%c112_177, %c0_178] : memref<169x32xf32, #tpu.memory_space<vmem>>, vector<5x32xf32>
    %c5_179 = arith.constant 5 : index
    %c352_180 = arith.constant 352 : index
    %123 = vector.load %arg24[%c5_179, %c352_180] : memref<25x512xf32, #tpu.memory_space<vmem>>, vector<5x32xf32>
    tpu.vector_store %arg24[%c5_179, %c352_180], %122 {strides = array<i32>} : memref<25x512xf32, #tpu.memory_space<vmem>>, vector<5x32xf32>,
    %c125_181 = arith.constant 125 : index
    %c0_182 = arith.constant 0 : index
    %124 = vector.load %arg23[%c125_181, %c0_182] : memref<169x32xf32, #tpu.memory_space<vmem>>, vector<5x32xf32>
    %c10_183 = arith.constant 10 : index
    %c352_184 = arith.constant 352 : index
    %125 = vector.load %arg24[%c10_183, %c352_184] : memref<25x512xf32, #tpu.memory_space<vmem>>, vector<5x32xf32>
    tpu.vector_store %arg24[%c10_183, %c352_184], %124 {strides = array<i32>} : memref<25x512xf32, #tpu.memory_space<vmem>>, vector<5x32xf32>,
    %c138_185 = arith.constant 138 : index
    %c0_186 = arith.constant 0 : index
    %126 = vector.load %arg23[%c138_185, %c0_186] : memref<169x32xf32, #tpu.memory_space<vmem>>, vector<5x32xf32>
    %c15_187 = arith.constant 15 : index
    %c352_188 = arith.constant 352 : index
    %127 = vector.load %arg24[%c15_187, %c352_188] : memref<25x512xf32, #tpu.memory_space<vmem>>, vector<5x32xf32>
    tpu.vector_store %arg24[%c15_187, %c352_188], %126 {strides = array<i32>} : memref<25x512xf32, #tpu.memory_space<vmem>>, vector<5x32xf32>,
    %c151 = arith.constant 151 : index
    %c0_189 = arith.constant 0 : index
    %128 = vector.load %arg23[%c151, %c0_189] : memref<169x32xf32, #tpu.memory_space<vmem>>, vector<5x32xf32>
    %c20_190 = arith.constant 20 : index
    %c352_191 = arith.constant 352 : index
    %129 = vector.load %arg24[%c20_190, %c352_191] : memref<25x512xf32, #tpu.memory_space<vmem>>, vector<5x32xf32>
    tpu.vector_store %arg24[%c20_190, %c352_191], %128 {strides = array<i32>} : memref<25x512xf32, #tpu.memory_space<vmem>>, vector<5x32xf32>,
    %c104_192 = arith.constant 104 : index
    %c0_193 = arith.constant 0 : index
    %130 = vector.load %arg23[%c104_192, %c0_193] : memref<169x32xf32, #tpu.memory_space<vmem>>, vector<5x32xf32>
    %c0_194 = arith.constant 0 : index
    %c384 = arith.constant 384 : index
    %131 = vector.load %arg24[%c0_194, %c384] : memref<25x512xf32, #tpu.memory_space<vmem>>, vector<5x32xf32>
    tpu.vector_store %arg24[%c0_194, %c384], %130 {strides = array<i32>} : memref<25x512xf32, #tpu.memory_space<vmem>>, vector<5x32xf32>,
    %c117_195 = arith.constant 117 : index
    %c0_196 = arith.constant 0 : index
    %132 = vector.load %arg23[%c117_195, %c0_196] : memref<169x32xf32, #tpu.memory_space<vmem>>, vector<5x32xf32>
    %c5_197 = arith.constant 5 : index
    %c384_198 = arith.constant 384 : index
    %133 = vector.load %arg24[%c5_197, %c384_198] : memref<25x512xf32, #tpu.memory_space<vmem>>, vector<5x32xf32>
    tpu.vector_store %arg24[%c5_197, %c384_198], %132 {strides = array<i32>} : memref<25x512xf32, #tpu.memory_space<vmem>>, vector<5x32xf32>,
    %c130_199 = arith.constant 130 : index
    %c0_200 = arith.constant 0 : index
    %134 = vector.load %arg23[%c130_199, %c0_200] : memref<169x32xf32, #tpu.memory_space<vmem>>, vector<5x32xf32>
    %c10_201 = arith.constant 10 : index
    %c384_202 = arith.constant 384 : index
    %135 = vector.load %arg24[%c10_201, %c384_202] : memref<25x512xf32, #tpu.memory_space<vmem>>, vector<5x32xf32>
    tpu.vector_store %arg24[%c10_201, %c384_202], %134 {strides = array<i32>} : memref<25x512xf32, #tpu.memory_space<vmem>>, vector<5x32xf32>,
    %c143_203 = arith.constant 143 : index
    %c0_204 = arith.constant 0 : index
    %136 = vector.load %arg23[%c143_203, %c0_204] : memref<169x32xf32, #tpu.memory_space<vmem>>, vector<5x32xf32>
    %c15_205 = arith.constant 15 : index
    %c384_206 = arith.constant 384 : index
    %137 = vector.load %arg24[%c15_205, %c384_206] : memref<25x512xf32, #tpu.memory_space<vmem>>, vector<5x32xf32>
    tpu.vector_store %arg24[%c15_205, %c384_206], %136 {strides = array<i32>} : memref<25x512xf32, #tpu.memory_space<vmem>>, vector<5x32xf32>,
    %c156 = arith.constant 156 : index
    %c0_207 = arith.constant 0 : index
    %138 = vector.load %arg23[%c156, %c0_207] : memref<169x32xf32, #tpu.memory_space<vmem>>, vector<5x32xf32>
    %c20_208 = arith.constant 20 : index
    %c384_209 = arith.constant 384 : index
    %139 = vector.load %arg24[%c20_208, %c384_209] : memref<25x512xf32, #tpu.memory_space<vmem>>, vector<5x32xf32>
    tpu.vector_store %arg24[%c20_208, %c384_209], %138 {strides = array<i32>} : memref<25x512xf32, #tpu.memory_space<vmem>>, vector<5x32xf32>,
    %c20_210 = arith.constant 20 : index
    %c0_211 = arith.constant 0 : index
    %140 = vector.load %arg23[%c20_210, %c0_211] : memref<169x32xf32, #tpu.memory_space<vmem>>, vector<5x32xf32>
    %c0_212 = arith.constant 0 : index
    %c416 = arith.constant 416 : index
    %141 = vector.load %arg24[%c0_212, %c416] : memref<25x512xf32, #tpu.memory_space<vmem>>, vector<5x32xf32>
    tpu.vector_store %arg24[%c0_212, %c416], %140 {strides = array<i32>} : memref<25x512xf32, #tpu.memory_space<vmem>>, vector<5x32xf32>,
    %c33_213 = arith.constant 33 : index
    %c0_214 = arith.constant 0 : index
    %142 = vector.load %arg23[%c33_213, %c0_214] : memref<169x32xf32, #tpu.memory_space<vmem>>, vector<5x32xf32>
    %c5_215 = arith.constant 5 : index
    %c416_216 = arith.constant 416 : index
    %143 = vector.load %arg24[%c5_215, %c416_216] : memref<25x512xf32, #tpu.memory_space<vmem>>, vector<5x32xf32>
    tpu.vector_store %arg24[%c5_215, %c416_216], %142 {strides = array<i32>} : memref<25x512xf32, #tpu.memory_space<vmem>>, vector<5x32xf32>,
    %c46_217 = arith.constant 46 : index
    %c0_218 = arith.constant 0 : index
    %144 = vector.load %arg23[%c46_217, %c0_218] : memref<169x32xf32, #tpu.memory_space<vmem>>, vector<5x32xf32>
    %c10_219 = arith.constant 10 : index
    %c416_220 = arith.constant 416 : index
    %145 = vector.load %arg24[%c10_219, %c416_220] : memref<25x512xf32, #tpu.memory_space<vmem>>, vector<5x32xf32>
    tpu.vector_store %arg24[%c10_219, %c416_220], %144 {strides = array<i32>} : memref<25x512xf32, #tpu.memory_space<vmem>>, vector<5x32xf32>,
    %c59_221 = arith.constant 59 : index
    %c0_222 = arith.constant 0 : index
    %146 = vector.load %arg23[%c59_221, %c0_222] : memref<169x32xf32, #tpu.memory_space<vmem>>, vector<5x32xf32>
    %c15_223 = arith.constant 15 : index
    %c416_224 = arith.constant 416 : index
    %147 = vector.load %arg24[%c15_223, %c416_224] : memref<25x512xf32, #tpu.memory_space<vmem>>, vector<5x32xf32>
    tpu.vector_store %arg24[%c15_223, %c416_224], %146 {strides = array<i32>} : memref<25x512xf32, #tpu.memory_space<vmem>>, vector<5x32xf32>,
    %c72 = arith.constant 72 : index
    %c0_225 = arith.constant 0 : index
    %148 = vector.load %arg23[%c72, %c0_225] : memref<169x32xf32, #tpu.memory_space<vmem>>, vector<5x32xf32>
    %c20_226 = arith.constant 20 : index
    %c416_227 = arith.constant 416 : index
    %149 = vector.load %arg24[%c20_226, %c416_227] : memref<25x512xf32, #tpu.memory_space<vmem>>, vector<5x32xf32>
    tpu.vector_store %arg24[%c20_226, %c416_227], %148 {strides = array<i32>} : memref<25x512xf32, #tpu.memory_space<vmem>>, vector<5x32xf32>,
    %c105_228 = arith.constant 105 : index
    %c0_229 = arith.constant 0 : index
    %150 = vector.load %arg23[%c105_228, %c0_229] : memref<169x32xf32, #tpu.memory_space<vmem>>, vector<5x32xf32>
    %c0_230 = arith.constant 0 : index
    %c448 = arith.constant 448 : index
    %151 = vector.load %arg24[%c0_230, %c448] : memref<25x512xf32, #tpu.memory_space<vmem>>, vector<5x32xf32>
    tpu.vector_store %arg24[%c0_230, %c448], %150 {strides = array<i32>} : memref<25x512xf32, #tpu.memory_space<vmem>>, vector<5x32xf32>,
    %c118_231 = arith.constant 118 : index
    %c0_232 = arith.constant 0 : index
    %152 = vector.load %arg23[%c118_231, %c0_232] : memref<169x32xf32, #tpu.memory_space<vmem>>, vector<5x32xf32>
    %c5_233 = arith.constant 5 : index
    %c448_234 = arith.constant 448 : index
    %153 = vector.load %arg24[%c5_233, %c448_234] : memref<25x512xf32, #tpu.memory_space<vmem>>, vector<5x32xf32>
    tpu.vector_store %arg24[%c5_233, %c448_234], %152 {strides = array<i32>} : memref<25x512xf32, #tpu.memory_space<vmem>>, vector<5x32xf32>,
    %c131_235 = arith.constant 131 : index
    %c0_236 = arith.constant 0 : index
    %154 = vector.load %arg23[%c131_235, %c0_236] : memref<169x32xf32, #tpu.memory_space<vmem>>, vector<5x32xf32>
    %c10_237 = arith.constant 10 : index
    %c448_238 = arith.constant 448 : index
    %155 = vector.load %arg24[%c10_237, %c448_238] : memref<25x512xf32, #tpu.memory_space<vmem>>, vector<5x32xf32>
    tpu.vector_store %arg24[%c10_237, %c448_238], %154 {strides = array<i32>} : memref<25x512xf32, #tpu.memory_space<vmem>>, vector<5x32xf32>,
    %c144_239 = arith.constant 144 : index
    %c0_240 = arith.constant 0 : index
    %156 = vector.load %arg23[%c144_239, %c0_240] : memref<169x32xf32, #tpu.memory_space<vmem>>, vector<5x32xf32>
    %c15_241 = arith.constant 15 : index
    %c448_242 = arith.constant 448 : index
    %157 = vector.load %arg24[%c15_241, %c448_242] : memref<25x512xf32, #tpu.memory_space<vmem>>, vector<5x32xf32>
    tpu.vector_store %arg24[%c15_241, %c448_242], %156 {strides = array<i32>} : memref<25x512xf32, #tpu.memory_space<vmem>>, vector<5x32xf32>,
    %c157 = arith.constant 157 : index
    %c0_243 = arith.constant 0 : index
    %158 = vector.load %arg23[%c157, %c0_243] : memref<169x32xf32, #tpu.memory_space<vmem>>, vector<5x32xf32>
    %c20_244 = arith.constant 20 : index
    %c448_245 = arith.constant 448 : index
    %159 = vector.load %arg24[%c20_244, %c448_245] : memref<25x512xf32, #tpu.memory_space<vmem>>, vector<5x32xf32>
    tpu.vector_store %arg24[%c20_244, %c448_245], %158 {strides = array<i32>} : memref<25x512xf32, #tpu.memory_space<vmem>>, vector<5x32xf32>,
    %c21_246 = arith.constant 21 : index
    %c0_247 = arith.constant 0 : index
    %160 = vector.load %arg23[%c21_246, %c0_247] : memref<169x32xf32, #tpu.memory_space<vmem>>, vector<5x32xf32>
    %c0_248 = arith.constant 0 : index
    %c480 = arith.constant 480 : index
    %161 = vector.load %arg24[%c0_248, %c480] : memref<25x512xf32, #tpu.memory_space<vmem>>, vector<5x32xf32>
    tpu.vector_store %arg24[%c0_248, %c480], %160 {strides = array<i32>} : memref<25x512xf32, #tpu.memory_space<vmem>>, vector<5x32xf32>,
    %c34_249 = arith.constant 34 : index
    %c0_250 = arith.constant 0 : index
    %162 = vector.load %arg23[%c34_249, %c0_250] : memref<169x32xf32, #tpu.memory_space<vmem>>, vector<5x32xf32>
    %c5_251 = arith.constant 5 : index
    %c480_252 = arith.constant 480 : index
    %163 = vector.load %arg24[%c5_251, %c480_252] : memref<25x512xf32, #tpu.memory_space<vmem>>, vector<5x32xf32>
    tpu.vector_store %arg24[%c5_251, %c480_252], %162 {strides = array<i32>} : memref<25x512xf32, #tpu.memory_space<vmem>>, vector<5x32xf32>,
    %c47_253 = arith.constant 47 : index
    %c0_254 = arith.constant 0 : index
    %164 = vector.load %arg23[%c47_253, %c0_254] : memref<169x32xf32, #tpu.memory_space<vmem>>, vector<5x32xf32>
    %c10_255 = arith.constant 10 : index
    %c480_256 = arith.constant 480 : index
    %165 = vector.load %arg24[%c10_255, %c480_256] : memref<25x512xf32, #tpu.memory_space<vmem>>, vector<5x32xf32>
    tpu.vector_store %arg24[%c10_255, %c480_256], %164 {strides = array<i32>} : memref<25x512xf32, #tpu.memory_space<vmem>>, vector<5x32xf32>,
    %c60_257 = arith.constant 60 : index
    %c0_258 = arith.constant 0 : index
    %166 = vector.load %arg23[%c60_257, %c0_258] : memref<169x32xf32, #tpu.memory_space<vmem>>, vector<5x32xf32>
    %c15_259 = arith.constant 15 : index
    %c480_260 = arith.constant 480 : index
    %167 = vector.load %arg24[%c15_259, %c480_260] : memref<25x512xf32, #tpu.memory_space<vmem>>, vector<5x32xf32>
    tpu.vector_store %arg24[%c15_259, %c480_260], %166 {strides = array<i32>} : memref<25x512xf32, #tpu.memory_space<vmem>>, vector<5x32xf32>,
    %c73 = arith.constant 73 : index
    %c0_261 = arith.constant 0 : index
    %168 = vector.load %arg23[%c73, %c0_261] : memref<169x32xf32, #tpu.memory_space<vmem>>, vector<5x32xf32>
    %c20_262 = arith.constant 20 : index
    %c480_263 = arith.constant 480 : index
    %169 = vector.load %arg24[%c20_262, %c480_263] : memref<25x512xf32, #tpu.memory_space<vmem>>, vector<5x32xf32>
    tpu.vector_store %arg24[%c20_262, %c480_263], %168 {strides = array<i32>} : memref<25x512xf32, #tpu.memory_space<vmem>>, vector<5x32xf32>,
    %c0_264 = arith.constant 0 : index
    %c0_265 = arith.constant 0 : index
    %170 = vector.load %arg24[%c0_264, %c0_265] : memref<25x512xf32, #tpu.memory_space<vmem>>, vector<25x512xf32>
    %171 = arith.truncf %170 : vector<25x512xf32> to vector<25x512xbf16>
    %c0_266 = arith.constant 0 : index
    %c0_267 = arith.constant 0 : index
    %172 = vector.load %arg5[%c0_266, %c0_267] : memref<512x64xbf16, #tpu.memory_space<vmem>>, vector<512x64xbf16>
    %cst_268 = arith.constant dense<0.000000e+00> : vector<25x64xf32>
    %173 = tpu.matmul %171, %172, %cst_268 {dimension_numbers = #tpu.dot_dimension_numbers<[1], [0], [0], [1], [0, 0, 1, 1], [], []>} : vector<25x512xbf16>, vector<512x64xbf16>, vector<25x64xf32> -> vector<25x64xf32>
    %c0_269 = arith.constant 0 : index
    %c0_270 = arith.constant 0 : index
    %174 = vector.load %arg6[%c0_269, %c0_270] : memref<1x64xf32, #tpu.memory_space<vmem>>, vector<1x64xf32>
    %175 = vector.broadcast %174 : vector<1x64xf32> to vector<25x64xf32>
    %176 = arith.addf %173, %175 : vector<25x64xf32>
    %cst_271 = arith.constant 0.000000e+00 : f32
    %177 = vector.broadcast %cst_271 : f32 to vector<25x64xf32>
    %178 = arith.maximumf %176, %177 : vector<25x64xf32>
    %c0_272 = arith.constant 0 : index
    %c0_273 = arith.constant 0 : index
    %179 = vector.load %arg25[%c0_272, %c0_273] : memref<25x64xf32, #tpu.memory_space<vmem>>, vector<25x64xf32>
    tpu.vector_store %arg25[%c0_272, %c0_273], %178 {strides = array<i32>} : memref<25x64xf32, #tpu.memory_space<vmem>>, vector<25x64xf32>,
    %c0_274 = arith.constant 0 : index
    %c0_275 = arith.constant 0 : index
    %180 = vector.load %arg25[%c0_274, %c0_275] : memref<25x64xf32, #tpu.memory_space<vmem>>, vector<3x64xf32>
    %c0_276 = arith.constant 0 : index
    %c0_277 = arith.constant 0 : index
    %181 = vector.load %arg26[%c0_276, %c0_277] : memref<9x576xf32, #tpu.memory_space<vmem>>, vector<3x64xf32>
    tpu.vector_store %arg26[%c0_276, %c0_277], %180 {strides = array<i32>} : memref<9x576xf32, #tpu.memory_space<vmem>>, vector<3x64xf32>,
    %c5_278 = arith.constant 5 : index
    %c0_279 = arith.constant 0 : index
    %182 = vector.load %arg25[%c5_278, %c0_279] : memref<25x64xf32, #tpu.memory_space<vmem>>, vector<3x64xf32>
    %c3 = arith.constant 3 : index
    %c0_280 = arith.constant 0 : index
    %183 = vector.load %arg26[%c3, %c0_280] : memref<9x576xf32, #tpu.memory_space<vmem>>, vector<3x64xf32>
    tpu.vector_store %arg26[%c3, %c0_280], %182 {strides = array<i32>} : memref<9x576xf32, #tpu.memory_space<vmem>>, vector<3x64xf32>,
    %c10_281 = arith.constant 10 : index
    %c0_282 = arith.constant 0 : index
    %184 = vector.load %arg25[%c10_281, %c0_282] : memref<25x64xf32, #tpu.memory_space<vmem>>, vector<3x64xf32>
    %c6 = arith.constant 6 : index
    %c0_283 = arith.constant 0 : index
    %185 = vector.load %arg26[%c6, %c0_283] : memref<9x576xf32, #tpu.memory_space<vmem>>, vector<3x64xf32>
    tpu.vector_store %arg26[%c6, %c0_283], %184 {strides = array<i32>} : memref<9x576xf32, #tpu.memory_space<vmem>>, vector<3x64xf32>,
    %c1_284 = arith.constant 1 : index
    %c0_285 = arith.constant 0 : index
    %186 = vector.load %arg25[%c1_284, %c0_285] : memref<25x64xf32, #tpu.memory_space<vmem>>, vector<3x64xf32>
    %c0_286 = arith.constant 0 : index
    %c64_287 = arith.constant 64 : index
    %187 = vector.load %arg26[%c0_286, %c64_287] : memref<9x576xf32, #tpu.memory_space<vmem>>, vector<3x64xf32>
    tpu.vector_store %arg26[%c0_286, %c64_287], %186 {strides = array<i32>} : memref<9x576xf32, #tpu.memory_space<vmem>>, vector<3x64xf32>,
    %c6_288 = arith.constant 6 : index
    %c0_289 = arith.constant 0 : index
    %188 = vector.load %arg25[%c6_288, %c0_289] : memref<25x64xf32, #tpu.memory_space<vmem>>, vector<3x64xf32>
    %c3_290 = arith.constant 3 : index
    %c64_291 = arith.constant 64 : index
    %189 = vector.load %arg26[%c3_290, %c64_291] : memref<9x576xf32, #tpu.memory_space<vmem>>, vector<3x64xf32>
    tpu.vector_store %arg26[%c3_290, %c64_291], %188 {strides = array<i32>} : memref<9x576xf32, #tpu.memory_space<vmem>>, vector<3x64xf32>,
    %c11 = arith.constant 11 : index
    %c0_292 = arith.constant 0 : index
    %190 = vector.load %arg25[%c11, %c0_292] : memref<25x64xf32, #tpu.memory_space<vmem>>, vector<3x64xf32>
    %c6_293 = arith.constant 6 : index
    %c64_294 = arith.constant 64 : index
    %191 = vector.load %arg26[%c6_293, %c64_294] : memref<9x576xf32, #tpu.memory_space<vmem>>, vector<3x64xf32>
    tpu.vector_store %arg26[%c6_293, %c64_294], %190 {strides = array<i32>} : memref<9x576xf32, #tpu.memory_space<vmem>>, vector<3x64xf32>,
    %c2 = arith.constant 2 : index
    %c0_295 = arith.constant 0 : index
    %192 = vector.load %arg25[%c2, %c0_295] : memref<25x64xf32, #tpu.memory_space<vmem>>, vector<3x64xf32>
    %c0_296 = arith.constant 0 : index
    %c128_297 = arith.constant 128 : index
    %193 = vector.load %arg26[%c0_296, %c128_297] : memref<9x576xf32, #tpu.memory_space<vmem>>, vector<3x64xf32>
    tpu.vector_store %arg26[%c0_296, %c128_297], %192 {strides = array<i32>} : memref<9x576xf32, #tpu.memory_space<vmem>>, vector<3x64xf32>,
    %c7_298 = arith.constant 7 : index
    %c0_299 = arith.constant 0 : index
    %194 = vector.load %arg25[%c7_298, %c0_299] : memref<25x64xf32, #tpu.memory_space<vmem>>, vector<3x64xf32>
    %c3_300 = arith.constant 3 : index
    %c128_301 = arith.constant 128 : index
    %195 = vector.load %arg26[%c3_300, %c128_301] : memref<9x576xf32, #tpu.memory_space<vmem>>, vector<3x64xf32>
    tpu.vector_store %arg26[%c3_300, %c128_301], %194 {strides = array<i32>} : memref<9x576xf32, #tpu.memory_space<vmem>>, vector<3x64xf32>,
    %c12 = arith.constant 12 : index
    %c0_302 = arith.constant 0 : index
    %196 = vector.load %arg25[%c12, %c0_302] : memref<25x64xf32, #tpu.memory_space<vmem>>, vector<3x64xf32>
    %c6_303 = arith.constant 6 : index
    %c128_304 = arith.constant 128 : index
    %197 = vector.load %arg26[%c6_303, %c128_304] : memref<9x576xf32, #tpu.memory_space<vmem>>, vector<3x64xf32>
    tpu.vector_store %arg26[%c6_303, %c128_304], %196 {strides = array<i32>} : memref<9x576xf32, #tpu.memory_space<vmem>>, vector<3x64xf32>,
    %c5_305 = arith.constant 5 : index
    %c0_306 = arith.constant 0 : index
    %198 = vector.load %arg25[%c5_305, %c0_306] : memref<25x64xf32, #tpu.memory_space<vmem>>, vector<3x64xf32>
    %c0_307 = arith.constant 0 : index
    %c192_308 = arith.constant 192 : index
    %199 = vector.load %arg26[%c0_307, %c192_308] : memref<9x576xf32, #tpu.memory_space<vmem>>, vector<3x64xf32>
    tpu.vector_store %arg26[%c0_307, %c192_308], %198 {strides = array<i32>} : memref<9x576xf32, #tpu.memory_space<vmem>>, vector<3x64xf32>,
    %c10_309 = arith.constant 10 : index
    %c0_310 = arith.constant 0 : index
    %200 = vector.load %arg25[%c10_309, %c0_310] : memref<25x64xf32, #tpu.memory_space<vmem>>, vector<3x64xf32>
    %c3_311 = arith.constant 3 : index
    %c192_312 = arith.constant 192 : index
    %201 = vector.load %arg26[%c3_311, %c192_312] : memref<9x576xf32, #tpu.memory_space<vmem>>, vector<3x64xf32>
    tpu.vector_store %arg26[%c3_311, %c192_312], %200 {strides = array<i32>} : memref<9x576xf32, #tpu.memory_space<vmem>>, vector<3x64xf32>,
    %c15_313 = arith.constant 15 : index
    %c0_314 = arith.constant 0 : index
    %202 = vector.load %arg25[%c15_313, %c0_314] : memref<25x64xf32, #tpu.memory_space<vmem>>, vector<3x64xf32>
    %c6_315 = arith.constant 6 : index
    %c192_316 = arith.constant 192 : index
    %203 = vector.load %arg26[%c6_315, %c192_316] : memref<9x576xf32, #tpu.memory_space<vmem>>, vector<3x64xf32>
    tpu.vector_store %arg26[%c6_315, %c192_316], %202 {strides = array<i32>} : memref<9x576xf32, #tpu.memory_space<vmem>>, vector<3x64xf32>,
    %c6_317 = arith.constant 6 : index
    %c0_318 = arith.constant 0 : index
    %204 = vector.load %arg25[%c6_317, %c0_318] : memref<25x64xf32, #tpu.memory_space<vmem>>, vector<3x64xf32>
    %c0_319 = arith.constant 0 : index
    %c256_320 = arith.constant 256 : index
    %205 = vector.load %arg26[%c0_319, %c256_320] : memref<9x576xf32, #tpu.memory_space<vmem>>, vector<3x64xf32>
    tpu.vector_store %arg26[%c0_319, %c256_320], %204 {strides = array<i32>} : memref<9x576xf32, #tpu.memory_space<vmem>>, vector<3x64xf32>,
    %c11_321 = arith.constant 11 : index
    %c0_322 = arith.constant 0 : index
    %206 = vector.load %arg25[%c11_321, %c0_322] : memref<25x64xf32, #tpu.memory_space<vmem>>, vector<3x64xf32>
    %c3_323 = arith.constant 3 : index
    %c256_324 = arith.constant 256 : index
    %207 = vector.load %arg26[%c3_323, %c256_324] : memref<9x576xf32, #tpu.memory_space<vmem>>, vector<3x64xf32>
    tpu.vector_store %arg26[%c3_323, %c256_324], %206 {strides = array<i32>} : memref<9x576xf32, #tpu.memory_space<vmem>>, vector<3x64xf32>,
    %c16 = arith.constant 16 : index
    %c0_325 = arith.constant 0 : index
    %208 = vector.load %arg25[%c16, %c0_325] : memref<25x64xf32, #tpu.memory_space<vmem>>, vector<3x64xf32>
    %c6_326 = arith.constant 6 : index
    %c256_327 = arith.constant 256 : index
    %209 = vector.load %arg26[%c6_326, %c256_327] : memref<9x576xf32, #tpu.memory_space<vmem>>, vector<3x64xf32>
    tpu.vector_store %arg26[%c6_326, %c256_327], %208 {strides = array<i32>} : memref<9x576xf32, #tpu.memory_space<vmem>>, vector<3x64xf32>,
    %c7_328 = arith.constant 7 : index
    %c0_329 = arith.constant 0 : index
    %210 = vector.load %arg25[%c7_328, %c0_329] : memref<25x64xf32, #tpu.memory_space<vmem>>, vector<3x64xf32>
    %c0_330 = arith.constant 0 : index
    %c320_331 = arith.constant 320 : index
    %211 = vector.load %arg26[%c0_330, %c320_331] : memref<9x576xf32, #tpu.memory_space<vmem>>, vector<3x64xf32>
    tpu.vector_store %arg26[%c0_330, %c320_331], %210 {strides = array<i32>} : memref<9x576xf32, #tpu.memory_space<vmem>>, vector<3x64xf32>,
    %c12_332 = arith.constant 12 : index
    %c0_333 = arith.constant 0 : index
    %212 = vector.load %arg25[%c12_332, %c0_333] : memref<25x64xf32, #tpu.memory_space<vmem>>, vector<3x64xf32>
    %c3_334 = arith.constant 3 : index
    %c320_335 = arith.constant 320 : index
    %213 = vector.load %arg26[%c3_334, %c320_335] : memref<9x576xf32, #tpu.memory_space<vmem>>, vector<3x64xf32>
    tpu.vector_store %arg26[%c3_334, %c320_335], %212 {strides = array<i32>} : memref<9x576xf32, #tpu.memory_space<vmem>>, vector<3x64xf32>,
    %c17 = arith.constant 17 : index
    %c0_336 = arith.constant 0 : index
    %214 = vector.load %arg25[%c17, %c0_336] : memref<25x64xf32, #tpu.memory_space<vmem>>, vector<3x64xf32>
    %c6_337 = arith.constant 6 : index
    %c320_338 = arith.constant 320 : index
    %215 = vector.load %arg26[%c6_337, %c320_338] : memref<9x576xf32, #tpu.memory_space<vmem>>, vector<3x64xf32>
    tpu.vector_store %arg26[%c6_337, %c320_338], %214 {strides = array<i32>} : memref<9x576xf32, #tpu.memory_space<vmem>>, vector<3x64xf32>,
    %c10_339 = arith.constant 10 : index
    %c0_340 = arith.constant 0 : index
    %216 = vector.load %arg25[%c10_339, %c0_340] : memref<25x64xf32, #tpu.memory_space<vmem>>, vector<3x64xf32>
    %c0_341 = arith.constant 0 : index
    %c384_342 = arith.constant 384 : index
    %217 = vector.load %arg26[%c0_341, %c384_342] : memref<9x576xf32, #tpu.memory_space<vmem>>, vector<3x64xf32>
    tpu.vector_store %arg26[%c0_341, %c384_342], %216 {strides = array<i32>} : memref<9x576xf32, #tpu.memory_space<vmem>>, vector<3x64xf32>,
    %c15_343 = arith.constant 15 : index
    %c0_344 = arith.constant 0 : index
    %218 = vector.load %arg25[%c15_343, %c0_344] : memref<25x64xf32, #tpu.memory_space<vmem>>, vector<3x64xf32>
    %c3_345 = arith.constant 3 : index
    %c384_346 = arith.constant 384 : index
    %219 = vector.load %arg26[%c3_345, %c384_346] : memref<9x576xf32, #tpu.memory_space<vmem>>, vector<3x64xf32>
    tpu.vector_store %arg26[%c3_345, %c384_346], %218 {strides = array<i32>} : memref<9x576xf32, #tpu.memory_space<vmem>>, vector<3x64xf32>,
    %c20_347 = arith.constant 20 : index
    %c0_348 = arith.constant 0 : index
    %220 = vector.load %arg25[%c20_347, %c0_348] : memref<25x64xf32, #tpu.memory_space<vmem>>, vector<3x64xf32>
    %c6_349 = arith.constant 6 : index
    %c384_350 = arith.constant 384 : index
    %221 = vector.load %arg26[%c6_349, %c384_350] : memref<9x576xf32, #tpu.memory_space<vmem>>, vector<3x64xf32>
    tpu.vector_store %arg26[%c6_349, %c384_350], %220 {strides = array<i32>} : memref<9x576xf32, #tpu.memory_space<vmem>>, vector<3x64xf32>,
    %c11_351 = arith.constant 11 : index
    %c0_352 = arith.constant 0 : index
    %222 = vector.load %arg25[%c11_351, %c0_352] : memref<25x64xf32, #tpu.memory_space<vmem>>, vector<3x64xf32>
    %c0_353 = arith.constant 0 : index
    %c448_354 = arith.constant 448 : index
    %223 = vector.load %arg26[%c0_353, %c448_354] : memref<9x576xf32, #tpu.memory_space<vmem>>, vector<3x64xf32>
    tpu.vector_store %arg26[%c0_353, %c448_354], %222 {strides = array<i32>} : memref<9x576xf32, #tpu.memory_space<vmem>>, vector<3x64xf32>,
    %c16_355 = arith.constant 16 : index
    %c0_356 = arith.constant 0 : index
    %224 = vector.load %arg25[%c16_355, %c0_356] : memref<25x64xf32, #tpu.memory_space<vmem>>, vector<3x64xf32>
    %c3_357 = arith.constant 3 : index
    %c448_358 = arith.constant 448 : index
    %225 = vector.load %arg26[%c3_357, %c448_358] : memref<9x576xf32, #tpu.memory_space<vmem>>, vector<3x64xf32>
    tpu.vector_store %arg26[%c3_357, %c448_358], %224 {strides = array<i32>} : memref<9x576xf32, #tpu.memory_space<vmem>>, vector<3x64xf32>,
    %c21_359 = arith.constant 21 : index
    %c0_360 = arith.constant 0 : index
    %226 = vector.load %arg25[%c21_359, %c0_360] : memref<25x64xf32, #tpu.memory_space<vmem>>, vector<3x64xf32>
    %c6_361 = arith.constant 6 : index
    %c448_362 = arith.constant 448 : index
    %227 = vector.load %arg26[%c6_361, %c448_362] : memref<9x576xf32, #tpu.memory_space<vmem>>, vector<3x64xf32>
    tpu.vector_store %arg26[%c6_361, %c448_362], %226 {strides = array<i32>} : memref<9x576xf32, #tpu.memory_space<vmem>>, vector<3x64xf32>,
    %c12_363 = arith.constant 12 : index
    %c0_364 = arith.constant 0 : index
    %228 = vector.load %arg25[%c12_363, %c0_364] : memref<25x64xf32, #tpu.memory_space<vmem>>, vector<3x64xf32>
    %c0_365 = arith.constant 0 : index
    %c512 = arith.constant 512 : index
    %229 = vector.load %arg26[%c0_365, %c512] : memref<9x576xf32, #tpu.memory_space<vmem>>, vector<3x64xf32>
    tpu.vector_store %arg26[%c0_365, %c512], %228 {strides = array<i32>} : memref<9x576xf32, #tpu.memory_space<vmem>>, vector<3x64xf32>,
    %c17_366 = arith.constant 17 : index
    %c0_367 = arith.constant 0 : index
    %230 = vector.load %arg25[%c17_366, %c0_367] : memref<25x64xf32, #tpu.memory_space<vmem>>, vector<3x64xf32>
    %c3_368 = arith.constant 3 : index
    %c512_369 = arith.constant 512 : index
    %231 = vector.load %arg26[%c3_368, %c512_369] : memref<9x576xf32, #tpu.memory_space<vmem>>, vector<3x64xf32>
    tpu.vector_store %arg26[%c3_368, %c512_369], %230 {strides = array<i32>} : memref<9x576xf32, #tpu.memory_space<vmem>>, vector<3x64xf32>,
    %c22 = arith.constant 22 : index
    %c0_370 = arith.constant 0 : index
    %232 = vector.load %arg25[%c22, %c0_370] : memref<25x64xf32, #tpu.memory_space<vmem>>, vector<3x64xf32>
    %c6_371 = arith.constant 6 : index
    %c512_372 = arith.constant 512 : index
    %233 = vector.load %arg26[%c6_371, %c512_372] : memref<9x576xf32, #tpu.memory_space<vmem>>, vector<3x64xf32>
    tpu.vector_store %arg26[%c6_371, %c512_372], %232 {strides = array<i32>} : memref<9x576xf32, #tpu.memory_space<vmem>>, vector<3x64xf32>,
    %c0_373 = arith.constant 0 : index
    %c0_374 = arith.constant 0 : index
    %234 = vector.load %arg26[%c0_373, %c0_374] : memref<9x576xf32, #tpu.memory_space<vmem>>, vector<9x576xf32>
    %235 = arith.truncf %234 : vector<9x576xf32> to vector<9x576xbf16>
    %c0_375 = arith.constant 0 : index
    %c0_376 = arith.constant 0 : index
    %236 = vector.load %arg7[%c0_375, %c0_376] : memref<576x64xbf16, #tpu.memory_space<vmem>>, vector<576x64xbf16>
    %cst_377 = arith.constant dense<0.000000e+00> : vector<9x64xf32>
    %237 = tpu.matmul %235, %236, %cst_377 {dimension_numbers = #tpu.dot_dimension_numbers<[1], [0], [0], [1], [0, 0, 1, 1], [], []>} : vector<9x576xbf16>, vector<576x64xbf16>, vector<9x64xf32> -> vector<9x64xf32>
    %c0_378 = arith.constant 0 : index
    %c0_379 = arith.constant 0 : index
    %238 = vector.load %arg8[%c0_378, %c0_379] : memref<1x64xf32, #tpu.memory_space<vmem>>, vector<1x64xf32>
    %239 = vector.broadcast %238 : vector<1x64xf32> to vector<9x64xf32>
    %240 = arith.addf %237, %239 : vector<9x64xf32>
    %cst_380 = arith.constant 0.000000e+00 : f32
    %241 = vector.broadcast %cst_380 : f32 to vector<9x64xf32>
    %242 = arith.maximumf %240, %241 : vector<9x64xf32>
    %243 = vector.extract_strided_slice %242 {offsets = [0, 0], sizes = [1, 64], strides = [1, 1]} : vector<9x64xf32> to vector<1x64xf32>
    %c0_381 = arith.constant 0 : index
    %c0_382 = arith.constant 0 : index
    %244 = vector.load %arg27[%c0_381, %c0_382] : memref<1x576xf32, #tpu.memory_space<vmem>>, vector<1x64xf32>
    tpu.vector_store %arg27[%c0_381, %c0_382], %243 {strides = array<i32>} : memref<1x576xf32, #tpu.memory_space<vmem>>, vector<1x64xf32>,
    %245 = vector.extract_strided_slice %242 {offsets = [1, 0], sizes = [1, 64], strides = [1, 1]} : vector<9x64xf32> to vector<1x64xf32>
    %c0_383 = arith.constant 0 : index
    %c64_384 = arith.constant 64 : index
    %246 = vector.load %arg27[%c0_383, %c64_384] : memref<1x576xf32, #tpu.memory_space<vmem>>, vector<1x64xf32>
    tpu.vector_store %arg27[%c0_383, %c64_384], %245 {strides = array<i32>} : memref<1x576xf32, #tpu.memory_space<vmem>>, vector<1x64xf32>,
    %247 = vector.extract_strided_slice %242 {offsets = [2, 0], sizes = [1, 64], strides = [1, 1]} : vector<9x64xf32> to vector<1x64xf32>
    %c0_385 = arith.constant 0 : index
    %c128_386 = arith.constant 128 : index
    %248 = vector.load %arg27[%c0_385, %c128_386] : memref<1x576xf32, #tpu.memory_space<vmem>>, vector<1x64xf32>
    tpu.vector_store %arg27[%c0_385, %c128_386], %247 {strides = array<i32>} : memref<1x576xf32, #tpu.memory_space<vmem>>, vector<1x64xf32>,
    %249 = vector.extract_strided_slice %242 {offsets = [3, 0], sizes = [1, 64], strides = [1, 1]} : vector<9x64xf32> to vector<1x64xf32>
    %c0_387 = arith.constant 0 : index
    %c192_388 = arith.constant 192 : index
    %250 = vector.load %arg27[%c0_387, %c192_388] : memref<1x576xf32, #tpu.memory_space<vmem>>, vector<1x64xf32>
    tpu.vector_store %arg27[%c0_387, %c192_388], %249 {strides = array<i32>} : memref<1x576xf32, #tpu.memory_space<vmem>>, vector<1x64xf32>,
    %251 = vector.extract_strided_slice %242 {offsets = [4, 0], sizes = [1, 64], strides = [1, 1]} : vector<9x64xf32> to vector<1x64xf32>
    %c0_389 = arith.constant 0 : index
    %c256_390 = arith.constant 256 : index
    %252 = vector.load %arg27[%c0_389, %c256_390] : memref<1x576xf32, #tpu.memory_space<vmem>>, vector<1x64xf32>
    tpu.vector_store %arg27[%c0_389, %c256_390], %251 {strides = array<i32>} : memref<1x576xf32, #tpu.memory_space<vmem>>, vector<1x64xf32>,
    %253 = vector.extract_strided_slice %242 {offsets = [5, 0], sizes = [1, 64], strides = [1, 1]} : vector<9x64xf32> to vector<1x64xf32>
    %c0_391 = arith.constant 0 : index
    %c320_392 = arith.constant 320 : index
    %254 = vector.load %arg27[%c0_391, %c320_392] : memref<1x576xf32, #tpu.memory_space<vmem>>, vector<1x64xf32>
    tpu.vector_store %arg27[%c0_391, %c320_392], %253 {strides = array<i32>} : memref<1x576xf32, #tpu.memory_space<vmem>>, vector<1x64xf32>,
    %255 = vector.extract_strided_slice %242 {offsets = [6, 0], sizes = [1, 64], strides = [1, 1]} : vector<9x64xf32> to vector<1x64xf32>
    %c0_393 = arith.constant 0 : index
    %c384_394 = arith.constant 384 : index
    %256 = vector.load %arg27[%c0_393, %c384_394] : memref<1x576xf32, #tpu.memory_space<vmem>>, vector<1x64xf32>
    tpu.vector_store %arg27[%c0_393, %c384_394], %255 {strides = array<i32>} : memref<1x576xf32, #tpu.memory_space<vmem>>, vector<1x64xf32>,
    %257 = vector.extract_strided_slice %242 {offsets = [7, 0], sizes = [1, 64], strides = [1, 1]} : vector<9x64xf32> to vector<1x64xf32>
    %c0_395 = arith.constant 0 : index
    %c448_396 = arith.constant 448 : index
    %258 = vector.load %arg27[%c0_395, %c448_396] : memref<1x576xf32, #tpu.memory_space<vmem>>, vector<1x64xf32>
    tpu.vector_store %arg27[%c0_395, %c448_396], %257 {strides = array<i32>} : memref<1x576xf32, #tpu.memory_space<vmem>>, vector<1x64xf32>,
    %259 = vector.extract_strided_slice %242 {offsets = [8, 0], sizes = [1, 64], strides = [1, 1]} : vector<9x64xf32> to vector<1x64xf32>
    %c0_397 = arith.constant 0 : index
    %c512_398 = arith.constant 512 : index
    %260 = vector.load %arg27[%c0_397, %c512_398] : memref<1x576xf32, #tpu.memory_space<vmem>>, vector<1x64xf32>
    tpu.vector_store %arg27[%c0_397, %c512_398], %259 {strides = array<i32>} : memref<1x576xf32, #tpu.memory_space<vmem>>, vector<1x64xf32>,
    %c0_399 = arith.constant 0 : index
    %c0_400 = arith.constant 0 : index
    %c0_401 = arith.constant 0 : index
    %261 = vector.load %arg2[%c0_399, %c0_400, %c0_401] : memref<1x1x24xbf16, #tpu.memory_space<vmem>>, vector<1x1x24xbf16>
    %262 = vector.shape_cast %261 : vector<1x1x24xbf16> to vector<1x24xbf16>
    %c0_402 = arith.constant 0 : index
    %c0_403 = arith.constant 0 : index
    %263 = vector.load %arg9[%c0_402, %c0_403] : memref<24x256xbf16, #tpu.memory_space<vmem>>, vector<24x256xbf16>
    %cst_404 = arith.constant dense<0.000000e+00> : vector<1x256xf32>
    %264 = tpu.matmul %262, %263, %cst_404 {dimension_numbers = #tpu.dot_dimension_numbers<[1], [0], [0], [1], [0, 0, 1, 1], [], []>} : vector<1x24xbf16>, vector<24x256xbf16>, vector<1x256xf32> -> vector<1x256xf32>
    %c0_405 = arith.constant 0 : index
    %c0_406 = arith.constant 0 : index
    %265 = vector.load %arg10[%c0_405, %c0_406] : memref<1x256xf32, #tpu.memory_space<vmem>>, vector<1x256xf32>
    %266 = arith.addf %264, %265 : vector<1x256xf32>
    %cst_407 = arith.constant 0.000000e+00 : f32
    %267 = vector.broadcast %cst_407 : f32 to vector<1x256xf32>
    %268 = arith.maximumf %266, %267 : vector<1x256xf32>
    %269 = arith.truncf %268 : vector<1x256xf32> to vector<1x256xbf16>
    %c0_408 = arith.constant 0 : index
    %c0_409 = arith.constant 0 : index
    %270 = vector.load %arg11[%c0_408, %c0_409] : memref<256x128xbf16, #tpu.memory_space<vmem>>, vector<256x128xbf16>
    %cst_410 = arith.constant dense<0.000000e+00> : vector<1x128xf32>
    %271 = tpu.matmul %269, %270, %cst_410 {dimension_numbers = #tpu.dot_dimension_numbers<[1], [0], [0], [1], [0, 0, 1, 1], [], []>} : vector<1x256xbf16>, vector<256x128xbf16>, vector<1x128xf32> -> vector<1x128xf32>
    %c0_411 = arith.constant 0 : index
    %c0_412 = arith.constant 0 : index
    %272 = vector.load %arg12[%c0_411, %c0_412] : memref<1x128xf32, #tpu.memory_space<vmem>>, vector<1x128xf32>
    %273 = arith.addf %271, %272 : vector<1x128xf32>
    %cst_413 = arith.constant 0.000000e+00 : f32
    %274 = vector.broadcast %cst_413 : f32 to vector<1x128xf32>
    %275 = arith.maximumf %273, %274 : vector<1x128xf32>
    %276 = arith.truncf %275 : vector<1x128xf32> to vector<1x128xbf16>
    %c0_414 = arith.constant 0 : index
    %c0_415 = arith.constant 0 : index
    %277 = vector.load %arg13[%c0_414, %c0_415] : memref<128x64xbf16, #tpu.memory_space<vmem>>, vector<128x64xbf16>
    %cst_416 = arith.constant dense<0.000000e+00> : vector<1x64xf32>
    %278 = tpu.matmul %276, %277, %cst_416 {dimension_numbers = #tpu.dot_dimension_numbers<[1], [0], [0], [1], [0, 0, 1, 1], [], []>} : vector<1x128xbf16>, vector<128x64xbf16>, vector<1x64xf32> -> vector<1x64xf32>
    %c0_417 = arith.constant 0 : index
    %c0_418 = arith.constant 0 : index
    %279 = vector.load %arg14[%c0_417, %c0_418] : memref<1x64xf32, #tpu.memory_space<vmem>>, vector<1x64xf32>
    %280 = arith.addf %278, %279 : vector<1x64xf32>
    %cst_419 = arith.constant 0.000000e+00 : f32
    %281 = vector.broadcast %cst_419 : f32 to vector<1x64xf32>
    %282 = arith.maximumf %280, %281 : vector<1x64xf32>
    %c0_420 = arith.constant 0 : index
    %c0_421 = arith.constant 0 : index
    %283 = vector.load %arg27[%c0_420, %c0_421] : memref<1x576xf32, #tpu.memory_space<vmem>>, vector<1x576xf32>
    %284 = arith.truncf %283 : vector<1x576xf32> to vector<1x576xbf16>
    %c0_422 = arith.constant 0 : index
    %c0_423 = arith.constant 0 : index
    %285 = vector.load %arg15[%c0_422, %c0_423] : memref<576x512xbf16, #tpu.memory_space<vmem>>, vector<576x512xbf16>
    %cst_424 = arith.constant dense<0.000000e+00> : vector<1x512xf32>
    %286 = tpu.matmul %284, %285, %cst_424 {dimension_numbers = #tpu.dot_dimension_numbers<[1], [0], [0], [1], [0, 0, 1, 1], [], []>} : vector<1x576xbf16>, vector<576x512xbf16>, vector<1x512xf32> -> vector<1x512xf32>
    %287 = arith.truncf %282 : vector<1x64xf32> to vector<1x64xbf16>
    %c0_425 = arith.constant 0 : index
    %c0_426 = arith.constant 0 : index
    %288 = vector.load %arg16[%c0_425, %c0_426] : memref<64x512xbf16, #tpu.memory_space<vmem>>, vector<64x512xbf16>
    %cst_427 = arith.constant dense<0.000000e+00> : vector<1x512xf32>
    %289 = tpu.matmul %287, %288, %cst_427 {dimension_numbers = #tpu.dot_dimension_numbers<[1], [0], [0], [1], [0, 0, 1, 1], [], []>} : vector<1x64xbf16>, vector<64x512xbf16>, vector<1x512xf32> -> vector<1x512xf32>
    %290 = arith.addf %286, %289 : vector<1x512xf32>
    %c0_428 = arith.constant 0 : index
    %c0_429 = arith.constant 0 : index
    %291 = vector.load %arg17[%c0_428, %c0_429] : memref<1x512xf32, #tpu.memory_space<vmem>>, vector<1x512xf32>
    %292 = arith.addf %290, %291 : vector<1x512xf32>
    %cst_430 = arith.constant 0.000000e+00 : f32
    %293 = vector.broadcast %cst_430 : f32 to vector<1x512xf32>
    %294 = arith.maximumf %292, %293 : vector<1x512xf32>
    %295 = arith.truncf %294 : vector<1x512xf32> to vector<1x512xbf16>
    %c0_431 = arith.constant 0 : index
    %c0_432 = arith.constant 0 : index
    %296 = vector.load %arg18[%c0_431, %c0_432] : memref<512x8xbf16, #tpu.memory_space<vmem>>, vector<512x8xbf16>
    %cst_433 = arith.constant dense<0.000000e+00> : vector<1x8xf32>
    %297 = tpu.matmul %295, %296, %cst_433 {dimension_numbers = #tpu.dot_dimension_numbers<[1], [0], [0], [1], [0, 0, 1, 1], [], []>} : vector<1x512xbf16>, vector<512x8xbf16>, vector<1x8xf32> -> vector<1x8xf32>
    %c0_434 = arith.constant 0 : index
    %c0_435 = arith.constant 0 : index
    %298 = vector.load %arg19[%c0_434, %c0_435] : memref<1x8xf32, #tpu.memory_space<vmem>>, vector<1x8xf32>
    %299 = arith.addf %297, %298 : vector<1x8xf32>
    %cst_436 = arith.constant dense<0.000000e+00> : vector<1xf32>
    %300 = vector.multi_reduction <add>, %299, %cst_436 [1] : vector<1x8xf32> to vector<1xf32>
    %301 = vector.shape_cast %300 : vector<1xf32> to vector<1x1xf32>
    %cst_437 = arith.constant 8.000000e+00 : f32
    %302 = vector.broadcast %cst_437 : f32 to vector<1x1xf32>
    %303 = arith.divf %301, %302 : vector<1x1xf32>
    %304 = vector.broadcast %303 : vector<1x1xf32> to vector<1x8xf32>
    %305 = arith.subf %299, %304 : vector<1x8xf32>
    %306 = arith.mulf %305, %305 : vector<1x8xf32>
    %cst_438 = arith.constant dense<0.000000e+00> : vector<1xf32>
    %307 = vector.multi_reduction <add>, %306, %cst_438 [1] : vector<1x8xf32> to vector<1xf32>
    %308 = vector.shape_cast %307 : vector<1xf32> to vector<1x1xf32>
    %cst_439 = arith.constant 8.000000e+00 : f32
    %309 = vector.broadcast %cst_439 : f32 to vector<1x1xf32>
    %310 = arith.divf %308, %309 : vector<1x1xf32>
    %311 = vector.broadcast %303 : vector<1x1xf32> to vector<1x8xf32>
    %312 = arith.subf %299, %311 : vector<1x8xf32>
    %cst_440 = arith.constant 9.99999974E-6 : f32
    %313 = vector.broadcast %cst_440 : f32 to vector<1x1xf32>
    %314 = arith.addf %310, %313 : vector<1x1xf32>
    %315 = math.rsqrt %314 : vector<1x1xf32>
    %316 = vector.broadcast %315 : vector<1x1xf32> to vector<1x8xf32>
    %317 = arith.mulf %312, %316 : vector<1x8xf32>
    %c0_441 = arith.constant 0 : index
    %c0_442 = arith.constant 0 : index
    %318 = vector.load %arg20[%c0_441, %c0_442] : memref<1x8xf32, #tpu.memory_space<vmem>>, vector<1x8xf32>
    %319 = arith.mulf %317, %318 : vector<1x8xf32>
    %c0_443 = arith.constant 0 : index
    %c0_444 = arith.constant 0 : index
    %320 = vector.load %arg21[%c0_443, %c0_444] : memref<1x8xf32, #tpu.memory_space<vmem>>, vector<1x8xf32>
    %321 = arith.addf %319, %320 : vector<1x8xf32>
    %c0_445 = arith.constant 0 : index
    %c0_446 = arith.constant 0 : index
    %c0_447 = arith.constant 0 : index
    %322 = vector.load %arg22[%c0_445, %c0_446, %c0_447] : memref<1x1x8xf32, #tpu.memory_space<vmem>>, vector<1x1x8xf32>
    %323 = vector.shape_cast %322 : vector<1x1x8xf32> to vector<1x8xf32>
    %324 = vector.shape_cast %321 : vector<1x8xf32> to vector<1x1x8xf32>
    tpu.vector_store %arg22[%c0_445, %c0_446, %c0_447], %324 {strides = array<i32>} : memref<1x1x8xf32, #tpu.memory_space<vmem>>, vector<1x1x8xf32>,
    return
  }
  func.func @transform_0(%arg0: i32) -> (i32, i32, i32) {
    %c0_i32 = arith.constant 0 : i32
    %c0_i32_0 = arith.constant 0 : i32
    %c0_i32_1 = arith.constant 0 : i32
    return %arg0, %c0_i32, %c0_i32_0 : i32, i32, i32
  }
  func.func @transform_1(%arg0: i32) -> (i32, i32, i32) {
    %c0_i32 = arith.constant 0 : i32
    %c0_i32_0 = arith.constant 0 : i32
    %c0_i32_1 = arith.constant 0 : i32
    return %arg0, %c0_i32, %c0_i32_0 : i32, i32, i32
  }
  func.func @transform_2(%arg0: i32) -> (i32, i32) {
    %c0_i32 = arith.constant 0 : i32
    %c0_i32_0 = arith.constant 0 : i32
    %c0_i32_1 = arith.constant 0 : i32
    return %c0_i32, %c0_i32_0 : i32, i32
  }
  func.func @transform_3(%arg0: i32) -> (i32, i32) {
    %c0_i32 = arith.constant 0 : i32
    %c0_i32_0 = arith.constant 0 : i32
    %c0_i32_1 = arith.constant 0 : i32
    return %c0_i32, %c0_i32_0 : i32, i32
  }
  func.func @transform_4(%arg0: i32) -> (i32, i32) {
    %c0_i32 = arith.constant 0 : i32
    %c0_i32_0 = arith.constant 0 : i32
    %c0_i32_1 = arith.constant 0 : i32
    return %c0_i32, %c0_i32_0 : i32, i32
  }
  func.func @transform_5(%arg0: i32) -> (i32, i32) {
    %c0_i32 = arith.constant 0 : i32
    %c0_i32_0 = arith.constant 0 : i32
    %c0_i32_1 = arith.constant 0 : i32
    return %c0_i32, %c0_i32_0 : i32, i32
  }
  func.func @transform_6(%arg0: i32) -> (i32, i32) {
    %c0_i32 = arith.constant 0 : i32
    %c0_i32_0 = arith.constant 0 : i32
    %c0_i32_1 = arith.constant 0 : i32
    return %c0_i32, %c0_i32_0 : i32, i32
  }
  func.func @transform_7(%arg0: i32) -> (i32, i32) {
    %c0_i32 = arith.constant 0 : i32
    %c0_i32_0 = arith.constant 0 : i32
    %c0_i32_1 = arith.constant 0 : i32
    return %c0_i32, %c0_i32_0 : i32, i32
  }
  func.func @transform_8(%arg0: i32) -> (i32, i32) {
    %c0_i32 = arith.constant 0 : i32
    %c0_i32_0 = arith.constant 0 : i32
    %c0_i32_1 = arith.constant 0 : i32
    return %c0_i32, %c0_i32_0 : i32, i32
  }
  func.func @transform_9(%arg0: i32) -> (i32, i32) {
    %c0_i32 = arith.constant 0 : i32
    %c0_i32_0 = arith.constant 0 : i32
    %c0_i32_1 = arith.constant 0 : i32
    return %c0_i32, %c0_i32_0 : i32, i32
  }
  func.func @transform_10(%arg0: i32) -> (i32, i32) {
    %c0_i32 = arith.constant 0 : i32
    %c0_i32_0 = arith.constant 0 : i32
    %c0_i32_1 = arith.constant 0 : i32
    return %c0_i32, %c0_i32_0 : i32, i32
  }
  func.func @transform_11(%arg0: i32) -> (i32, i32) {
    %c0_i32 = arith.constant 0 : i32
    %c0_i32_0 = arith.constant 0 : i32
    %c0_i32_1 = arith.constant 0 : i32
    return %c0_i32, %c0_i32_0 : i32, i32
  }
  func.func @transform_12(%arg0: i32) -> (i32, i32) {
    %c0_i32 = arith.constant 0 : i32
    %c0_i32_0 = arith.constant 0 : i32
    %c0_i32_1 = arith.constant 0 : i32
    return %c0_i32, %c0_i32_0 : i32, i32
  }
  func.func @transform_13(%arg0: i32) -> (i32, i32) {
    %c0_i32 = arith.constant 0 : i32
    %c0_i32_0 = arith.constant 0 : i32
    %c0_i32_1 = arith.constant 0 : i32
    return %c0_i32, %c0_i32_0 : i32, i32
  }
  func.func @transform_14(%arg0: i32) -> (i32, i32) {
    %c0_i32 = arith.constant 0 : i32
    %c0_i32_0 = arith.constant 0 : i32
    %c0_i32_1 = arith.constant 0 : i32
    return %c0_i32, %c0_i32_0 : i32, i32
  }
  func.func @transform_15(%arg0: i32) -> (i32, i32) {
    %c0_i32 = arith.constant 0 : i32
    %c0_i32_0 = arith.constant 0 : i32
    %c0_i32_1 = arith.constant 0 : i32
    return %c0_i32, %c0_i32_0 : i32, i32
  }
  func.func @transform_16(%arg0: i32) -> (i32, i32) {
    %c0_i32 = arith.constant 0 : i32
    %c0_i32_0 = arith.constant 0 : i32
    %c0_i32_1 = arith.constant 0 : i32
    return %c0_i32, %c0_i32_0 : i32, i32
  }
  func.func @transform_17(%arg0: i32) -> (i32, i32) {
    %c0_i32 = arith.constant 0 : i32
    %c0_i32_0 = arith.constant 0 : i32
    %c0_i32_1 = arith.constant 0 : i32
    return %c0_i32, %c0_i32_0 : i32, i32
  }
  func.func @transform_18(%arg0: i32) -> (i32, i32) {
    %c0_i32 = arith.constant 0 : i32
    %c0_i32_0 = arith.constant 0 : i32
    %c0_i32_1 = arith.constant 0 : i32
    return %c0_i32, %c0_i32_0 : i32, i32
  }
  func.func @transform_19(%arg0: i32) -> (i32, i32) {
    %c0_i32 = arith.constant 0 : i32
    %c0_i32_0 = arith.constant 0 : i32
    %c0_i32_1 = arith.constant 0 : i32
    return %c0_i32, %c0_i32_0 : i32, i32
  }
  func.func @transform_20(%arg0: i32) -> (i32, i32) {
    %c0_i32 = arith.constant 0 : i32
    %c0_i32_0 = arith.constant 0 : i32
    %c0_i32_1 = arith.constant 0 : i32
    return %c0_i32, %c0_i32_0 : i32, i32
  }
  func.func @transform_21(%arg0: i32) -> (i32, i32, i32) {
    %c0_i32 = arith.constant 0 : i32
    %c0_i32_0 = arith.constant 0 : i32
    %c0_i32_1 = arith.constant 0 : i32
    return %arg0, %c0_i32, %c0_i32_0 : i32, i32, i32
  }
}

</mosaic_0001>

<bundles_post_ra>
// kernel: botnet_forward.1
= control target key start
LH: loop header
LB: loop body
LE: loop exit
PB: predicated region body
PF: predicated region fallthrough
CT: control target
= control target key end

     0   :  { %s8535_s0 = inlined_call_operand.vmem [shape: bf16[2,169,192], index: 0, kind: input, shape index: {}]   ;;  %s8536_s1 = inlined_call_operand.vmem [shape: bf16[2,1,24], index: 1, kind: input, shape index: {}]   ;;  %s8537_s2 = inlined_call_operand.vmem [shape: bf16[192,32], index: 2, kind: input, shape index: {}]   ;;  %s8538_s3 = inlined_call_operand.vmem [shape: f32[1,32], index: 3, kind: input, shape index: {}]   ;;  %s8539_s4 = inlined_call_operand.vmem [shape: bf16[512,64], index: 4, kind: input, shape index: {}]   ;;  %s8540_s5 = inlined_call_operand.vmem [shape: f32[1,64], index: 5, kind: input, shape index: {}]   ;;  %s8541_s6 = inlined_call_operand.vmem [shape: bf16[576,64], index: 6, kind: input, shape index: {}]   ;;  %s8542_s7 = inlined_call_operand.vmem [shape: f32[1,64], index: 7, kind: input, shape index: {}]   ;;  %s8543_s8 = inlined_call_operand.vmem [shape: bf16[24,256], index: 8, kind: input, shape index: {}]   ;;  %s8544_s9 = inlined_call_operand.vmem [shape: f32[1,256], index: 9, kind: input, shape index: {}]   ;;  %s8545_s10 = inlined_call_operand.vmem [shape: bf16[256,128], index: 10, kind: input, shape index: {}]   ;;  %s8546_s11 = inlined_call_operand.vmem [shape: f32[1,128], index: 11, kind: input, shape index: {}]   ;;  %s8547_s12 = inlined_call_operand.vmem [shape: bf16[128,64], index: 12, kind: input, shape index: {}]   ;;  %s8548_s13 = inlined_call_operand.vmem [shape: f32[1,64], index: 13, kind: input, shape index: {}]   ;;  %s8549_s14 = inlined_call_operand.vmem [shape: bf16[576,512], index: 14, kind: input, shape index: {}]   ;;  %s8550_s15 = inlined_call_operand.vmem [shape: bf16[64,512], index: 15, kind: input, shape index: {}]   ;;  %s8551_s16 = inlined_call_operand.vmem [shape: f32[1,512], index: 16, kind: input, shape index: {}]   ;;  %s8552_s17 = inlined_call_operand.vmem [shape: bf16[512,8], index: 17, kind: input, shape index: {}]   ;;  %s8553_s18 = inlined_call_operand.vmem [shape: f32[1,8], index: 18, kind: input, shape index: {}]   ;;  %s8554_s19 = inlined_call_operand.vmem [shape: f32[1,8], index: 19, kind: input, shape index: {}]   ;;  %s8555_s20 = inlined_call_operand.vmem [shape: f32[1,8], index: 20, kind: input, shape index: {}]   ;;  %s8556_s21 = inlined_call_operand.hbm [shape: f32[2,1,8], index: 21, kind: output, shape index: {}]  }
   0x1   :  { %8569 = sst [smem:[#allocation16_spill]] %s8535_s0 }
   0x2   :  { %8570 = sst [smem:[#allocation17_spill]] %s8536_s1 }
   0x3   :  { %8571 = sst [smem:[#allocation18_spill]] %s8537_s2 }
   0x4   :  { %8572 = sst [smem:[#allocation19_spill]] %s8538_s3 }
   0x5   :  { %8573 = sst [smem:[#allocation20_spill]] %s8539_s4 }
   0x6   :  { %8574 = sst [smem:[#allocation21_spill]] %s8540_s5 }
   0x7   :  { %8575 = sst [smem:[#allocation22_spill]] %s8541_s6 }
   0x8   :  { %8576 = sst [smem:[#allocation23_spill]] %s8555_s20 }
   0x9   :  { %26 = vsyncpa [#allocation8], 0 }
   0xa   :  { %28 = vsyncpa [#allocation8 + $0x1], 0  ;;  %s6532_s2 = smov 0   ;;  %s6534_s25 = smov 0  }
   0xb   :  { %s6536_s26 = smov 0   ;;  %s6538_s27 = smov 0  }
   0xc LB: > { %8577 = sst [smem:[#allocation10_spill]] %s6404_s2  ;;  %s6553_s3 = sadd.s32 4294967295, %s6416_s27   ;;  %s6416_s27 = sphi %s6538_s27, %s8613_s27   ;;  %s6412_s26 = sphi %s6536_s26, %s8615_s26   ;;  %s6408_s25 = sphi %s6534_s25, %s8617_s25   ;;  %s6404_s2 = sphi %s6532_s2, %s8616_s2  }
   0xd   : > { %8578 = sst [smem:[#allocation11_spill]] %s6412_s26  ;;  %s4674_s28 = sadd.s32 4294967294, %s6416_s27  }
   0xe   : > { %8579 = sst [smem:[#allocation12_spill]] %s6416_s27  ;;  %s6557_s29 = sadd.s32 1, %s6416_s27  }
   0xf   : > { %8580 = sst [smem:[#allocation13_spill]] %s6557_s29  ;;  %s492_s0 = sadd.s32 1, %s6412_s26 }
  0x10   : > { %s489_s4 = ssub.s32 %s6416_s27, %s6557_s29  ;;  %p502_p0 = scmp.ne.s32.totalorder %s6412_s26, %s6408_s25 }
  0x11   : > { %p490_p1 = scmp.eq.s32.totalorder %s489_s4, 0  ;;  %p503_p2 = scmp.eq.s32.totalorder %s6553_s3, 1 }
  0x12   : > { %p508_p3 = scmp.ne.s32.totalorder %s6408_s25, %s6404_s2  ;;  %p509_p4 = scmp.eq.s32.totalorder %s4674_s28, 1 }
  0x13   : > { %s6568_s30 = scalar_select %p490_p1, %s6412_s26, %s492_s0  }
  0x14   : > { %p6570_p5 = por %p503_p2, %p502_p0  ;;  %p6574_p6 = por %p509_p4, %p508_p3 }
  0x15   : > { %8581 = sst [smem:[#allocation14_spill]] %s6568_s30  ;;  %p4677_p7 = scmp.ge.s32.totalorder %s6416_s27, 1 }
  0x16   : > { %s8583_s22 = scalar_select %p6574_p6, 1, 0 }
  0x17   : > { %p598_p8 = scmp.lt.s32.totalorder %s6416_s27, 3 }
  0x18   : > { %8584 = sst [smem:[#allocation15_spill]] %s8583_s22 }
  0x19   : > { %p599_p9 = pnand %p4677_p7, %p598_p8 }
  0x1a   : > { %s8585_s24 = sld [smem:[#allocation18_spill]] (!%p599_p9)  ;;  %p660_p10 = scmp.lt.s32.totalorder (!%p599_p9), %s6553_s3, 1 }
  0x1b   : > { %602 = sbr.rel (%p599_p9) target bundleno = 1915 (0x77b), region = 104  ;;  %s8586_s27 = sld [smem:[#allocation16_spill]] (!%p599_p9) }
  0x1c   : > { %s6419_s28 = smov (!%p599_p9), 32   ;;  %s6420_s0 = smov (!%p599_p9), 96  }
  0x1d   : > { %s8588_s4 = sld [smem:[#allocation20_spill]] (!%p599_p9)  ;;  %s8598_s1 = smov (!%p599_p9), 64  }
  0x1e   : > { %s8589_s22 = sld [smem:[#allocation21_spill]] (!%p599_p9) }
  0x1f   : > { %s8592_s6 = sld [smem:[#allocation22_spill]] (!%p599_p9) }
  0x20   : > { %v6012_v0 = vld [vmem:[%s8585_s24 + $0x38] sm:$0xff]  ;;  %v6011_v2 = vld [vmem:[%s8585_s24 + $0x30] sm:$0xff]  ;;  %s6591_s26 = scalar_select %p660_p10, %s6553_s3, 1  ;;  %v6010_v4 = vld [vmem:[%s8585_s24 + $0x28] sm:$0xff]  ;;  %vm8565_vm0 = vcmask 523264   ;;  %vm1074_vm1 = vcmask 261120  }
  0x21   : > { %v6016_v1 = vld [vmem:[%s8585_s24 + $0x58] sm:$0xff]  ;;  %924 = vmatpush.bf16.msra.mxu0 %v6012_v0  ;;  %v6015_v3 = vld [vmem:[%s8585_s24 + $0x50] sm:$0xff]  ;;  %v6014_v5 = vld [vmem:[%s8585_s24 + $0x48] sm:$0xff]  ;;  %vm1099_vm2 = vcmask 258048   ;;  %vm1105_vm3 = vcmask 261125   ;;  %vm1107_vm4 = vcmask 254976  }
  0x22   : > { %992 = vmatpush.bf16.msra.mxu1 %v6016_v1  ;;  %s6303_s23 = smul.u32 176, %s6591_s26  ;;  %v6009_v6 = vld [vmem:[%s8585_s24 + $0x20] sm:$0xff]  ;;  %v6008_v10 = vld [vmem:[%s8585_s24 + $0x18] sm:$0xff]  ;;  %v6007_v12 = vld [vmem:[%s8585_s24 + $0x10] sm:$0xff]  ;;  %vm1113_vm5 = vcmask 260098   ;;  %vm1119_vm6 = vcmask 261127  }
  0x23   : > { %v6013_v7 = vld [vmem:[%s8585_s24 + $0x40] sm:$0xff]  ;;  %v6006_v13 = vld [vmem:[%s8585_s24 + $0x8] sm:$0xff]  ;;  %vm1121_vm7 = vcmask 257024   ;;  %vm1127_vm8 = vcmask 261124   ;;  %vm1096_vm9 = vcmask 253952   ;;  %vm1135_vm10 = vcmask 520448  }
  0x24   : > { %s6606_s20 = scalar_lea.vmem %s8586_s27, %s6303_s23  ;;  %v6005_v14 = vld [vmem:[%s8585_s24] sm:$0xff]  ;;  %s8587_s27 = sld [smem:[#allocation19_spill]]  ;;  %vm1153_vm11 = vcmask 522498   ;;  %vm1143_vm12 = vcmask 523525   ;;  %vm1145_vm13 = vcmask 517376   ;;  %vm1161_vm14 = vcmask 523527  }
  0x25   : > { %925 = vmatpush.bf16.msra.mxu0 %v6011_v2  ;;  %v5983_v8 = vld [vmem:[%s6606_s20 + $0x4] sm:$0xf]  ;;  %v4683_v9 = vld [vmem:[%s6606_s20 + $0x8] sm:$0xf0]  ;;  %v4681_v15 = vld [vmem:[%s6606_s20] sm:$0xf] }
  0x26   : > { %993 = vmatpush.bf16.msra.mxu1 %v6015_v3  ;;  %v4686_v11 = vor.u32 %v5983_v8, %v4683_v9  ;;  %v5984_v16 = vld [vmem:[%s6606_s20 + $0x4] sm:$0xf0]  ;;  %v5985_v17 = vld [vmem:[%s6606_s20 + $0x14] sm:$0xf]  ;;  %v4691_v18 = vld [vmem:[%s6606_s20 + $0x18] sm:$0xf0] }
  0x27   : > { %v4682_v19 = vor.u32 %v5984_v16, %v4681_v15  ;;  %v4694_v20 = vor.u32 %v5985_v17, %v4691_v18  ;;  %v4689_v21 = vld [vmem:[%s6606_s20 + $0x10] sm:$0xf]  ;;  %v5986_v22 = vld [vmem:[%s6606_s20 + $0x14] sm:$0xf0]  ;;  %v5987_v23 = vld [vmem:[%s6606_s20 + $0x24] sm:$0xf] }
  0x28   : > { %v4699_v24 = vld [vmem:[%s6606_s20 + $0x28] sm:$0xf0]  ;;  %v4690_v25 = vor.u32 %v5986_v22, %v4689_v21  ;;  %v4697_v27 = vld [vmem:[%s6606_s20 + $0x20] sm:$0xf]  ;;  %v5988_v28 = vld [vmem:[%s6606_s20 + $0x24] sm:$0xf0] }
  0x29   : > { %926 = vmatpush.bf16.msra.mxu0 %v6010_v4  ;;  %v4702_v26 = vor.u32 %v5987_v23, %v4699_v24  ;;  %v5989_v29 = vld [vmem:[%s6606_s20 + $0x34] sm:$0xf]  ;;  %v4707_v30 = vld [vmem:[%s6606_s20 + $0x38] sm:$0xf0]  ;;  %v4698_v31 = vor.u32 %v5988_v28, %v4697_v27  ;;  %v4705_v33 = vld [vmem:[%s6606_s20 + $0x30] sm:$0xf] }
  0x2a   : > { %994 = vmatpush.bf16.msra.mxu1 %v6014_v5  ;;  %v4710_v32 = vor.u32 %v5989_v29, %v4707_v30  ;;  %v5990_v34 = vld [vmem:[%s6606_s20 + $0x34] sm:$0xf0]  ;;  %v5991_v35 = vld [vmem:[%s6606_s20 + $0x44] sm:$0xf]  ;;  %v4715_v36 = vld [vmem:[%s6606_s20 + $0x48] sm:$0xf0] }
  0x2b   : > { %v4706_v37 = vor.u32 %v5990_v34, %v4705_v33  ;;  %v4718_v38 = vor.u32 %v5991_v35, %v4715_v36  ;;  %v4713_v39 = vld [vmem:[%s6606_s20 + $0x40] sm:$0xf]  ;;  %v5992_v40 = vld [vmem:[%s6606_s20 + $0x44] sm:$0xf0]  ;;  %v5993_v41 = vld [vmem:[%s6606_s20 + $0x54] sm:$0xf] }
  0x2c   : > { %v4723_v42 = vld [vmem:[%s6606_s20 + $0x58] sm:$0xf0]  ;;  %v4714_v43 = vor.u32 %v5992_v40, %v4713_v39  ;;  %v4721_v45 = vld [vmem:[%s6606_s20 + $0x50] sm:$0xf]  ;;  %v5994_v46 = vld [vmem:[%s6606_s20 + $0x54] sm:$0xf0] }
  0x2d   : > { %927 = vmatpush.bf16.msra.mxu0 %v6009_v6  ;;  %v4726_v44 = vor.u32 %v5993_v41, %v4723_v42  ;;  %v5995_v47 = vld [vmem:[%s6606_s20 + $0x64] sm:$0xf]  ;;  %v4731_v48 = vld [vmem:[%s6606_s20 + $0x68] sm:$0xf0]  ;;  %v4722_v49 = vor.u32 %v5994_v46, %v4721_v45  ;;  %v4729_v51 = vld [vmem:[%s6606_s20 + $0x60] sm:$0xf] }
  0x2e   : > { %995 = vmatpush.bf16.msra.mxu1 %v6013_v7  ;;  %v4734_v50 = vor.u32 %v5995_v47, %v4731_v48  ;;  %v5996_v52 = vld [vmem:[%s6606_s20 + $0x64] sm:$0xf0]  ;;  %v5997_v53 = vld [vmem:[%s6606_s20 + $0x74] sm:$0xf]  ;;  %v4739_v54 = vld [vmem:[%s6606_s20 + $0x78] sm:$0xf0] }
  0x2f   : > { %v4730_v55 = vor.u32 %v5996_v52, %v4729_v51  ;;  %v4742_v56 = vor.u32 %v5997_v53, %v4739_v54  ;;  %v4737_v57 = vld [vmem:[%s6606_s20 + $0x70] sm:$0xf]  ;;  %v5998_v58 = vld [vmem:[%s6606_s20 + $0x74] sm:$0xf0]  ;;  %v5999_v59 = vld [vmem:[%s6606_s20 + $0x84] sm:$0xf] }
  0x30   : > { %v4747_v60 = vld [vmem:[%s6606_s20 + $0x88] sm:$0xf0]  ;;  %v4738_v61 = vor.u32 %v5998_v58, %v4737_v57  ;;  %v4745_v1 = vld [vmem:[%s6606_s20 + $0x80] sm:$0xf]  ;;  %v6000_v2 = vld [vmem:[%s6606_s20 + $0x84] sm:$0xf0] }
  0x31   : > { %928 = vmatpush.bf16.msra.mxu0 %v6008_v10  ;;  %4815 = vmatmul.msk.bf16.vlgmr.msra.gmra.mxu1 %vm8565_vm0, %v4686_v11  ;;  %v4750_v62 = vor.u32 %v5999_v59, %v4747_v60  ;;  %v6674_v3 = vld [vmem:[%s8587_s27] ss:$0 sm:$0xff]  ;;  %v6001_v4 = vld [vmem:[%s6606_s20 + $0x94] sm:$0xf]  ;;  %v4755_v5 = vld [vmem:[%s6606_s20 + $0x98] sm:$0xf0]  ;;  %v4746_v6 = vor.u32 %v6000_v2, %v4745_v1 }
  0x32   : > { %v4758_v8 = vor.u32 %v6001_v4, %v4755_v5  ;;  %v4753_v17 = vld [vmem:[%s6606_s20 + $0x90] sm:$0xf]  ;;  %v6002_v18 = vld [vmem:[%s6606_s20 + $0x94] sm:$0xf0]  ;;  %v4763_v21 = vld [vmem:[%s6606_s20 + $0xa8] sm:$0x10] }
  0x33   : > { %s8566_s23 = smov 64   ;;  %v4754_v24 = vor.u32 %v6002_v18, %v4753_v17  ;;  %vm1163_vm15 = vcmask 519424  }
  0x35   : > { %929 = vmatpush.bf16.msra.mxu0 %v6007_v12 }
  0x39   : > { %930 = vmatpush.bf16.msra.mxu0 %v6006_v13 }
  0x3d   : > { %931 = vmatpush.bf16.msra.mxu0 %v6005_v14 }
  0x40   : > { %932 = vmatmul.bf16.vlgmr.msra.gmra.mxu0 %v4682_v19 }
  0x41   : > { %4816 = vmatmul.msk.bf16.gmra.mxu1 %vm8565_vm0, %v4694_v20  ;;  %v6003_v20 = vld [vmem:[%s6606_s20 + $0xa4] sm:$0xf] }
  0x50   : > { %937 = vmatmul.bf16.gmra.mxu0 %v4690_v25 }
  0x51   : > { %4817 = vmatmul.msk.bf16.gmra.mxu1 %vm8565_vm0, %v4702_v26  ;;  %v4766_v26 = vor.u32 %v6003_v20, %v4763_v21 }
  0x60   : > { %942 = vmatmul.bf16.gmra.mxu0 %v4698_v31 }
  0x61   : > { %4818 = vmatmul.msk.bf16.gmra.mxu1 %vm8565_vm0, %v4710_v32 }
  0x70   : > { %947 = vmatmul.bf16.gmra.mxu0 %v4706_v37  ;;  %v4761_v37 = vld [vmem:[%s6606_s20 + $0xa0] sm:$0xf] }
  0x71   : > { %4819 = vmatmul.msk.bf16.gmra.mxu1 %vm8565_vm0, %v4718_v38  ;;  %v6004_v38 = vld [vmem:[%s6606_s20 + $0xa4] sm:$0x10]  ;;  %s8595_s20 = sld [smem:[#allocation17_spill]] }
  0x77   : > { %s667_s30 = scalar_lea.vmem %s8595_s20, %s6591_s26  ;;  %s4606_s26 = scalar_lea.hbm %s8556_s21, %s6553_s3 }
  0x78   : > { %s4610_s2 = sshll.u32 %s4606_s26, 4  ;;  %s6374_s20 = scalar_lea.hbm %s8556_s21, 2  ;;  %s4611_s2 = int_to_ptr.hbm [resolvable:$true] %s4610_s2 }
  0x80   : > { %952 = vmatmul.bf16.gmra.mxu0 %v4714_v43 }
  0x81   : > { %4820 = vmatmul.msk.bf16.gmra.mxu1 %vm8565_vm0, %v4726_v44  ;;  %v4762_v44 = vor.u32 %v6004_v38, %v4761_v37 }
  0x90   : > { %957 = vmatmul.bf16.gmra.mxu0 %v4722_v49 }
  0x91   : > { %4821 = vmatmul.msk.bf16.gmra.mxu1 %vm8565_vm0, %v4734_v50 }
  0xa0   : > { %962 = vmatmul.bf16.gmra.mxu0 %v4730_v55 }
  0xa1   : > { %4822 = vmatmul.msk.bf16.gmra.mxu1 %vm8565_vm0, %v4742_v56 }
  0xae   : > { %v997_v63 = vpop.f32.mrf.mxu1 }
  0xb0   : > { %967 = vmatmul.bf16.gmra.mxu0 %v4738_v61 }
  0xb1   : > { %4823 = vmatmul.msk.bf16.gmra.mxu1 %vm8565_vm0, %v4750_v62 }
  0xb6   : > { %v999_v0 = vpop.f32.mrf.mxu1 }
  0xbd   : > { %v933_v7 = vpop.f32.mrf.mxu0 }
  0xbe   : > { %v934_v9 = vadd.f32 %v6674_v3, %v933_v7  ;;  %v1002_v10 = vpop.f32.mrf.mxu1 }
  0xc0   : > { %v998_v11 = vadd.f32 %v997_v63, %v934_v9  ;;  %972 = vmatmul.bf16.gmra.mxu0 %v4746_v6 }
  0xc1   : > { %4824 = vmatmul.msk.bf16.gmra.mxu1 %vm8565_vm0, %v4758_v8 }
  0xc2   : > { %v1052_v12 = vmax.f32 %v998_v11, 0.0 }
  0xc4   : > { %1075 = vst.msk [vmem:[#allocation2] sm:$0xff] %vm1074_vm1, %v1052_v12 }
  0xc5   : > { %v935_v13 = vpop.f32.mrf.mxu0 }
  0xc6   : > { %v936_v14 = vadd.f32 %v6674_v3, %v935_v13  ;;  %v1004_v15 = vpop.f32.mrf.mxu1 }
  0xc8   : > { %v1000_v16 = vadd.f32 %v999_v0, %v936_v14 }
  0xca   : > { %v1053_v19 = vmax.f32 %v1000_v16, 0.0 }
  0xcb   : > { %v1175_v22 = vld [vmem:[#allocation2 + $0x1] sm:$0x1f] }
  0xcc   : > { %v1098_v23 = vld [vmem:[#allocation2] sm:$0x1f]  ;;  %1076 = vst.msk [vmem:[#allocation2 + $0x8] sm:$0xff] %vm1074_vm1, %v1053_v19  ;;  %1177 = vrot.lane.b32.xlu2 %v1175_v22, %s8566_s23 }
  0xcd   : > { %v938_v25 = vpop.f32.mrf.mxu0  ;;  %1100 = vst.msk [vmem:[#allocation3] sm:$0x1f] %vm1099_vm2, %v1098_v23 }
  0xce   : > { %v939_v27 = vadd.f32 %v6674_v3, %v938_v25  ;;  %v1007_v28 = vpop.f32.mrf.mxu1 }
  0xd0   : > { %v1003_v29 = vadd.f32 %v1002_v10, %v939_v27  ;;  %977 = vmatmul.bf16.gmra.mxu0 %v4754_v24 }
  0xd1   : > { %4825 = vmatmul.msk.bf16.gmra.mxu1 %vm8565_vm0, %v4766_v26  ;;  %vm1263_vm0 = vcmask 1041152  }
  0xd2   : > { %v1054_v30 = vmax.f32 %v1003_v29, 0.0 }
  0xd3   : > { %v1290_v31 = vld [vmem:[#allocation2 + $0x7] sm:$0x1f] }
  0xd4   : > { %v1364_v32 = vld [vmem:[#allocation2 + $0x8] sm:$0x1f]  ;;  %1077 = vst.msk [vmem:[#allocation2 + $0x10] sm:$0xff] %vm1074_vm1, %v1054_v30  ;;  %1292 = vrot.lane.b32.xlu0 %v1290_v31, %s6419_s28 }
  0xd5   : > { %1366 = vrot.lane.b32.xlu2 %v1364_v32, %s6420_s0  ;;  %v940_v33 = vpop.f32.mrf.mxu0 }
  0xd6   : > { %v941_v34 = vadd.f32 %v6674_v3, %v940_v33  ;;  %v1009_v35 = vpop.f32.mrf.mxu1 }
  0xd8   : > { %v1005_v36 = vadd.f32 %v1004_v15, %v941_v34 }
  0xda   : > { %v1055_v39 = vmax.f32 %v1005_v36, 0.0 }
  0xdb   : > { %v1463_v40 = vld [vmem:[#allocation2 + $0xe] sm:$0x1f] }
  0xdc   : > { %v1182_v41 = vld [vmem:[#allocation2 + $0xe] sm:$0x1f]  ;;  %1078 = vst.msk [vmem:[#allocation2 + $0x18] sm:$0xff] %vm1074_vm1, %v1055_v39  ;;  %1465 = vrot.lane.b32.xlu1 %v1463_v40, %s8566_s23 }
  0xdd   : > { %v1401_v42 = vld [vmem:[#allocation2 + $0xd] sm:$0x1f]  ;;  %v1184_v43 = vrot.slane %v1182_v41, 3  ;;  %v943_v46 = vpop.f32.mrf.mxu0 }
  0xde   : > { %v1101_v45 = vld [vmem:[#allocation2 + $0xd] sm:$0x1f]  ;;  %1402 = vst.msk [vmem:[#allocation3 + $0x10] sm:$0x1f] %vm1099_vm2, %v1401_v42  ;;  %v944_v48 = vadd.f32 %v6674_v3, %v943_v46  ;;  %v1012_v49 = vpop.f32.mrf.mxu1 }
  0xdf   : > { %v1103_v47 = vrot.slane %v1101_v45, 3  ;;  %1185 = vrot.lane.b32.xlu2 %v1184_v43, %s8566_s23 }
  0xe0   : > { %v1008_v50 = vadd.f32 %v1007_v28, %v944_v48  ;;  %982 = vmatmul.bf16.gmra.mxu0 %v4762_v44 }
  0xe1   : > { %1106 = vst.msk [vmem:[#allocation3] sm:$0xe0] %vm1105_vm3, %v1103_v47 }
  0xe2   : > { %1108 = vst.msk [vmem:[#allocation3 + $0x20] sm:$0x3] %vm1107_vm4, %v1103_v47  ;;  %v1056_v51 = vmax.f32 %v1008_v50, 0.0 }
  0xe3   : > { %v1562_v52 = vld [vmem:[#allocation2 + $0x14] sm:$0x1f]  ;;  %v1469_v54 = vld [vmem:[#allocation2 + $0x1b] sm:$0x1f] }
  0xe4   : > { %v1296_v53 = vld [vmem:[#allocation2 + $0x14] sm:$0x1f]  ;;  %1079 = vst.msk [vmem:[#allocation2 + $0x20] sm:$0xff] %vm1074_vm1, %v1056_v51  ;;  %1564 = vrot.lane.b32.xlu0 %v1562_v52, %s6419_s28  ;;  %v1471_v56 = vrot.slane %v1469_v54, 3  ;;  %v1109_v60 = vld [vmem:[#allocation2 + $0x1a] sm:$0x1f] }
  0xe5   : > { %v1298_v55 = vrot.slane %v1296_v53, 3  ;;  %v945_v57 = vpop.f32.mrf.mxu0  ;;  %v1403_v61 = vld [vmem:[#allocation2 + $0x1a] sm:$0x1f]  ;;  %v1111_v63 = vrot.slane %v1109_v60, 6  ;;  %v1370_v12 = vld [vmem:[#allocation2 + $0x15] sm:$0x1f] }
  0xe6   : > { %v946_v58 = vadd.f32 %v6674_v3, %v945_v57  ;;  %v1014_v59 = vpop.f32.mrf.mxu1  ;;  %v1192_v62 = vld [vmem:[#allocation2 + $0x1b] sm:$0x1f]  ;;  %v1405_v0 = vrot.slane %v1403_v61, 3  ;;  %v1372_v16 = vrot.slane %v1370_v12, 3 }
  0xe7   : > { %1299 = vrot.lane.b32.xlu1 %v1298_v55, %s6419_s28  ;;  %1472 = vrot.lane.b32.xlu2 %v1471_v56, %s8566_s23  ;;  %1114 = vst.msk [vmem:[#allocation3 + $0x20] sm:$0x7c] %vm1113_vm5, %v1111_v63  ;;  %v1194_v4 = vrot.slane %v1192_v62, 6 }
  0xe8   : > { %v1010_v1 = vadd.f32 %v1009_v35, %v946_v58  ;;  %1407 = vst.msk [vmem:[#allocation3 + $0x10] sm:$0xe0] %vm1105_vm3, %v1405_v0 }
  0xe9   : > { %1408 = vst.msk [vmem:[#allocation3 + $0x30] sm:$0x3] %vm1107_vm4, %v1405_v0 }
  0xea   : > { %v1057_v2 = vmax.f32 %v1010_v1, 0.0 }
  0xeb   : > { %v1378_v5 = vld [vmem:[#allocation2 + $0x22] sm:$0x1f] }
  0xec   : > { %v1304_v6 = vld [vmem:[#allocation2 + $0x21] sm:$0x1f]  ;;  %1080 = vst.msk [vmem:[#allocation2 + $0x28] sm:$0xff] %vm1074_vm1, %v1057_v2  ;;  %1195 = vrot.lane.b32.xlu0 %v1194_v4, %s8566_s23  ;;  %v1380_v7 = vrot.slane %v1378_v5, 6 }
  0xed   : > { %v1306_v8 = vrot.slane %v1304_v6, 6  ;;  %v948_v9 = vpop.f32.mrf.mxu0  ;;  %v1568_v14 = vld [vmem:[#allocation2 + $0x21] sm:$0x1f] }
  0xee   : > { %v949_v10 = vadd.f32 %v6674_v3, %v948_v9  ;;  %v1017_v11 = vpop.f32.mrf.mxu1  ;;  %v1570_v18 = vrot.slane %v1568_v14, 3 }
  0xef   : > { %1381 = vrot.lane.b32.xlu1 %v1380_v7, %s6420_s0  ;;  %1307 = vrot.lane.b32.xlu2 %v1306_v8, %s6419_s28 }
  0xf0   : > { %v1013_v13 = vadd.f32 %v1012_v49, %v949_v10 }
  0xf2   : > { %v1058_v15 = vmax.f32 %v1013_v13, 0.0 }
  0xf3   : > { %v1409_v17 = vld [vmem:[#allocation2 + $0x27] sm:$0x1f] }
  0xf4   : > { %1081 = vst.msk [vmem:[#allocation2 + $0x30] sm:$0xff] %vm1074_vm1, %v1058_v15  ;;  %1373 = vrot.lane.b32.xlu0 %v1372_v16, %s6420_s0  ;;  %v1411_v19 = vrot.slane %v1409_v17, 6  ;;  %v1115_v20 = vld [vmem:[#allocation2 + $0x27] sm:$0x1f] }
  0xf5   : > { %v950_v21 = vpop.f32.mrf.mxu0  ;;  %v1117_v22 = vrot.slane %v1115_v20, 1  ;;  %v1477_v25 = vld [vmem:[#allocation2 + $0x28] sm:$0x1f] }
  0xf6   : > { %v951_v23 = vadd.f32 %v6674_v3, %v950_v21  ;;  %v1019_v24 = vpop.f32.mrf.mxu1  ;;  %1413 = vst.msk [vmem:[#allocation3 + $0x30] sm:$0x7c] %vm1113_vm5, %v1411_v19  ;;  %v1200_v27 = vld [vmem:[#allocation2 + $0x28] sm:$0x1f]  ;;  %v1479_v29 = vrot.slane %v1477_v25, 6 }
  0xf7   : > { %1571 = vrot.lane.b32.xlu1 %v1570_v18, %s6419_s28  ;;  %1120 = vst.msk [vmem:[#allocation3 + $0x20] sm:$0x80] %vm1119_vm6, %v1117_v22  ;;  %v1202_v31 = vrot.slane %v1200_v27, 1 }
  0xf8   : > { %v1015_v26 = vadd.f32 %v1014_v59, %v951_v23  ;;  %1122 = vst.msk [vmem:[#allocation3 + $0x40] sm:$0xf] %vm1121_vm7, %v1117_v22 }
  0xfa   : > { %v1059_v28 = vmax.f32 %v1015_v26, 0.0 }
  0xfb   : > { %v1385_v30 = vld [vmem:[#allocation2 + $0x2f] sm:$0x1f] }
  0xfc   : > { %1082 = vst.msk [vmem:[#allocation2 + $0x38] sm:$0xff] %vm1074_vm1, %v1059_v28  ;;  %1480 = vrot.lane.b32.xlu0 %v1479_v29, %s8566_s23  ;;  %v1387_v32 = vrot.slane %v1385_v30, 1  ;;  %v1311_v36 = vld [vmem:[#allocation2 + $0x2e] sm:$0x1f] }
  0xfd   : > { %v953_v33 = vpop.f32.mrf.mxu0  ;;  %v1576_v38 = vld [vmem:[#allocation2 + $0x2e] sm:$0x1f]  ;;  %v1313_v40 = vrot.slane %v1311_v36, 1 }
  0xfe   : > { %v954_v34 = vadd.f32 %v6674_v3, %v953_v33  ;;  %1388 = vrot.lane.b32.xlu2 %v1387_v32, %s6420_s0  ;;  %v1022_v35 = vpop.f32.mrf.mxu1  ;;  %v1578_v43 = vrot.slane %v1576_v38, 6 }
  0xff   : > { %1203 = vrot.lane.b32.xlu1 %v1202_v31, %s8566_s23 }
 0x100   : > { %v1018_v37 = vadd.f32 %v1017_v11, %v954_v34 }
 0x102   : > { %v1060_v39 = vmax.f32 %v1018_v37, 0.0 }
 0x103   : > { %v1210_v41 = vld [vmem:[#allocation2 + $0x35] sm:$0x1f]  ;;  %v1319_v51 = vld [vmem:[#allocation2 + $0x3b] sm:$0x1f] }
 0x104   : > { %1083 = vst.msk [vmem:[#allocation2 + $0x40] sm:$0xff] %vm1074_vm1, %v1060_v39  ;;  %1314 = vrot.lane.b32.xlu0 %v1313_v40, %s6419_s28  ;;  %v1212_v42 = vrot.slane %v1210_v41, 4  ;;  %v1123_v45 = vld [vmem:[#allocation2 + $0x34] sm:$0x1f]  ;;  %v1321_v55 = vrot.slane %v1319_v51, 4 }
 0x105   : > { %v955_v44 = vpop.f32.mrf.mxu0  ;;  %v1414_v46 = vld [vmem:[#allocation2 + $0x34] sm:$0x1f]  ;;  %v1125_v49 = vrot.slane %v1123_v45, 4  ;;  %v1583_v63 = vld [vmem:[#allocation2 + $0x3b] sm:$0x1f] }
 0x106   : > { %v956_v47 = vadd.f32 %v6674_v3, %v955_v44  ;;  %1579 = vrot.lane.b32.xlu2 %v1578_v43, %s6419_s28  ;;  %v1024_v48 = vpop.f32.mrf.mxu1  ;;  %v1416_v50 = vrot.slane %v1414_v46, 1  ;;  %v1484_v53 = vld [vmem:[#allocation2 + $0x35] sm:$0x1f]  ;;  %v1585_v4 = vrot.slane %v1583_v63, 1 }
 0x107   : > { %1213 = vrot.lane.b32.xlu1 %v1212_v42, %s8566_s23  ;;  %1128 = vst.msk [vmem:[#allocation3 + $0x40] sm:$0xf0] %vm1127_vm8, %v1125_v49  ;;  %v1486_v57 = vrot.slane %v1484_v53, 1 }
 0x108   : > { %v1020_v52 = vadd.f32 %v1019_v24, %v956_v47  ;;  %1129 = vst.msk [vmem:[#allocation3 + $0x60] sm:$0x1] %vm1096_vm9, %v1125_v49 }
 0x109   : > { %1418 = vst.msk [vmem:[#allocation3 + $0x30] sm:$0x80] %vm1119_vm6, %v1416_v50 }
 0x10a   : > { %v1061_v54 = vmax.f32 %v1020_v52, 0.0  ;;  %1419 = vst.msk [vmem:[#allocation3 + $0x50] sm:$0xf] %vm1121_vm7, %v1416_v50 }
 0x10b   : > { %v1393_v56 = vld [vmem:[#allocation2 + $0x3c] sm:$0x1f]  ;;  %v1420_v59 = vld [vmem:[#allocation2 + $0x41] sm:$0x1f] }
 0x10c   : > { %1084 = vst.msk [vmem:[#allocation2 + $0x48] sm:$0xff] %vm1074_vm1, %v1061_v54  ;;  %1322 = vrot.lane.b32.xlu0 %v1321_v55, %s6419_s28  ;;  %v1395_v58 = vrot.slane %v1393_v56, 4  ;;  %v1422_v61 = vrot.slane %v1420_v59, 4 }
 0x10d   : > { %v958_v60 = vpop.f32.mrf.mxu0 }
 0x10e   : > { %v959_v62 = vadd.f32 %v6674_v3, %v958_v60  ;;  %1396 = vrot.lane.b32.xlu2 %v1395_v58, %s6420_s0  ;;  %v1027_v0 = vpop.f32.mrf.mxu1  ;;  %1424 = vst.msk [vmem:[#allocation3 + $0x50] sm:$0xf0] %vm1127_vm8, %v1422_v61 }
 0x10f   : > { %1487 = vrot.lane.b32.xlu1 %v1486_v57, %s8566_s23  ;;  %1425 = vst.msk [vmem:[#allocation3 + $0x70] sm:$0x1] %vm1096_vm9, %v1422_v61 }
 0x110   : > { %v1023_v1 = vadd.f32 %v1022_v35, %v959_v62 }
 0x112   : > { %v1062_v2 = vmax.f32 %v1023_v1, 0.0 }
 0x114   : > { %1085 = vst.msk [vmem:[#allocation2 + $0x50] sm:$0xff] %vm1074_vm1, %v1062_v2  ;;  %1586 = vrot.lane.b32.xlu0 %v1585_v4, %s6419_s28 }
 0x115   : > { %v960_v5 = vpop.f32.mrf.mxu0 }
 0x116   : > { %v961_v6 = vadd.f32 %v6674_v3, %v960_v5  ;;  %v1029_v8 = vpop.f32.mrf.mxu1 }
 0x118   : > { %v1025_v7 = vadd.f32 %v1024_v48, %v961_v6 }
 0x11a   : > { %v1063_v9 = vmax.f32 %v1025_v7, 0.0 }
 0x11c   : > { %1086 = vst.msk [vmem:[#allocation2 + $0x58] sm:$0xff] %vm1074_vm1, %v1063_v9 }
 0x11d   : > { %v963_v10 = vpop.f32.mrf.mxu0 }
 0x11e   : > { %v964_v11 = vadd.f32 %v6674_v3, %v963_v10  ;;  %v1032_v16 = vpop.f32.mrf.mxu1 }
 0x120   : > { %v1028_v12 = vadd.f32 %v1027_v0, %v964_v11 }
 0x122   : > { %v1064_v13 = vmax.f32 %v1028_v12, 0.0 }
 0x123   : > { %v1130_v14 = vld [vmem:[#allocation2 + $0x55] sm:$0x1f]  ;;  %v1265_v17 = vld [vmem:[#allocation2 + $0x5b] sm:$0x1f] }
 0x124   : > { %v1220_v15 = vld [vmem:[#allocation2 + $0x56] sm:$0x1f]  ;;  %1087 = vst.msk [vmem:[#allocation2 + $0x60] sm:$0xff] %vm1074_vm1, %v1064_v13  ;;  %1132 = vrot.lane.b32.xlu0 %v1130_v14, %s6419_s28 }
 0x125   : > { %1222 = vrot.lane.b32.xlu2 %v1220_v15, %s6420_s0  ;;  %v965_v18 = vpop.f32.mrf.mxu0  ;;  %1266 = vst.msk [vmem:[#allocation3 + $0x8] sm:$0x1f] %vm1099_vm2, %v1265_v17 }
 0x126   : > { %v966_v19 = vadd.f32 %v6674_v3, %v965_v18  ;;  %v6755_v20 = vpop.permute.xlu2 %1177  ;;  %v1034_v27 = vpop.f32.mrf.mxu1 }
 0x128   : > { %v1030_v21 = vadd.f32 %v1029_v8, %v966_v19 }
 0x12a   : > { %v1065_v22 = vmax.f32 %v1030_v21, 0.0 }
 0x12b   : > { %v1327_v23 = vld [vmem:[#allocation2 + $0x5c] sm:$0x1f]  ;;  %v1426_v24 = vld [vmem:[#allocation2 + $0x62] sm:$0x1f] }
 0x12c   : > { %v1500_v25 = vld [vmem:[#allocation2 + $0x63] sm:$0x1f]  ;;  %1088 = vst.msk [vmem:[#allocation2 + $0x68] sm:$0xff] %vm1074_vm1, %v1065_v22  ;;  %1329 = vrot.lane.b32.xlu1 %v1327_v23, %s8566_s23  ;;  %1428 = vrot.lane.b32.xlu0 %v1426_v24, %s6419_s28 }
 0x12d   : > { %1502 = vrot.lane.b32.xlu2 %v1500_v25, %s6420_s0  ;;  %v968_v26 = vpop.f32.mrf.mxu0  ;;  %v1137_v29 = vld [vmem:[#allocation2 + $0x62] sm:$0x1f] }
 0x12e   : > { %v969_v28 = vadd.f32 %v6674_v3, %v968_v26  ;;  %v1139_v33 = vrot.slane %v1137_v29, 3  ;;  %v1037_v40 = vpop.f32.mrf.mxu1  ;;  %v1227_v43 = vld [vmem:[#allocation2 + $0x63] sm:$0x1f] }
 0x12f   : > { %v6762_v31 = vpop.permute.xlu2 %1366  ;;  %v1229_v47 = vrot.slane %v1227_v43, 3 }
 0x130   : > { %v1033_v30 = vadd.f32 %v1032_v16, %v969_v28 }
 0x132   : > { %v1066_v32 = vmax.f32 %v1033_v30, 0.0 }
 0x133   : > { %v1599_v34 = vld [vmem:[#allocation2 + $0x69] sm:$0x1f] }
 0x134   : > { %v1333_v35 = vld [vmem:[#allocation2 + $0x69] sm:$0x1f]  ;;  %1089 = vst.msk [vmem:[#allocation2 + $0x70] sm:$0xff] %vm1074_vm1, %v1066_v32  ;;  %1601 = vrot.lane.b32.xlu1 %v1599_v34, %s8566_s23  ;;  %1140 = vrot.lane.b32.xlu0 %v1139_v33, %s6419_s28 }
 0x135   : > { %v1537_v36 = vld [vmem:[#allocation2 + $0x68] sm:$0x1f]  ;;  %v1335_v37 = vrot.slane %v1333_v35, 3  ;;  %v970_v39 = vpop.f32.mrf.mxu0 }
 0x136   : > { %v1267_v38 = vld [vmem:[#allocation2 + $0x68] sm:$0x1f]  ;;  %1538 = vst.msk [vmem:[#allocation3 + $0x18] sm:$0x1f] %vm1099_vm2, %v1537_v36  ;;  %v971_v42 = vadd.f32 %v6674_v3, %v970_v39  ;;  %v1039_v53 = vpop.f32.mrf.mxu1  ;;  %vm1173_vm2 = vcmask 516352  }
 0x137   : > { %v1269_v41 = vrot.slane %v1267_v38, 3  ;;  %1336 = vrot.lane.b32.xlu2 %v1335_v37, %s8566_s23 }
 0x138   : > { %v1035_v44 = vadd.f32 %v1034_v27, %v971_v42 }
 0x139   : > { %1271 = vst.msk [vmem:[#allocation3 + $0x8] sm:$0xe0] %vm1105_vm3, %v1269_v41  ;;  %v6771_v45 = vpop.permute.xlu2 %1185 }
 0x13a   : > { %1272 = vst.msk [vmem:[#allocation3 + $0x28] sm:$0x3] %vm1107_vm4, %v1269_v41  ;;  %v1067_v46 = vmax.f32 %v1035_v44, 0.0 }
 0x13b   : > { %v1147_v48 = vld [vmem:[#allocation2 + $0x6f] sm:$0x1f] }
 0x13c   : > { %1090 = vst.msk [vmem:[#allocation2 + $0x78] sm:$0xff] %vm1074_vm1, %v1067_v46  ;;  %1230 = vrot.lane.b32.xlu0 %v1229_v47, %s6420_s0  ;;  %v1149_v49 = vrot.slane %v1147_v48, 6  ;;  %v1506_v52 = vld [vmem:[#allocation2 + $0x70] sm:$0x1f] }
 0x13d   : > { %v973_v50 = vpop.f32.mrf.mxu0  ;;  %v1237_v56 = vld [vmem:[#allocation2 + $0x70] sm:$0x1f]  ;;  %v1508_v58 = vrot.slane %v1506_v52, 3 }
 0x13e   : > { %v974_v51 = vadd.f32 %v6674_v3, %v973_v50  ;;  %1150 = vrot.lane.b32.xlu1 %v1149_v49, %s6419_s28  ;;  %v1239_v61 = vrot.slane %v1237_v56, 6  ;;  %v1432_v9 = vld [vmem:[#allocation2 + $0x6f] sm:$0x1f]  ;;  %v1042_v10 = vpop.f32.mrf.mxu1 }
 0x13f   : > { %v1434_v14 = vrot.slane %v1432_v9, 3 }
 0x140   : > { %v1038_v54 = vadd.f32 %v1037_v40, %v974_v51 }
 0x141   : > { %v6778_v55 = vpop.permute.xlu2 %1472 }
 0x142   : > { %v1068_v57 = vmax.f32 %v1038_v54, 0.0 }
 0x143   : > { %v1605_v59 = vld [vmem:[#allocation2 + $0x76] sm:$0x1f] }
 0x144   : > { %v1273_v60 = vld [vmem:[#allocation2 + $0x75] sm:$0x1f]  ;;  %1091 = vst.msk [vmem:[#allocation2 + $0x80] sm:$0xff] %vm1074_vm1, %v1068_v57  ;;  %1509 = vrot.lane.b32.xlu0 %v1508_v58, %s6420_s0  ;;  %v1607_v62 = vrot.slane %v1605_v59, 3 }
 0x145   : > { %v1275_v63 = vrot.slane %v1273_v60, 6  ;;  %v1539_v0 = vld [vmem:[#allocation2 + $0x75] sm:$0x1f]  ;;  %v975_v1 = vpop.f32.mrf.mxu0 }
 0x146   : > { %v1541_v2 = vrot.slane %v1539_v0, 3  ;;  %v976_v4 = vadd.f32 %v6674_v3, %v975_v1  ;;  %1240 = vrot.lane.b32.xlu1 %v1239_v61, %s6420_s0  ;;  %v1293_v5 = vpop.permute.xlu0 %1292  ;;  %1608 = vrot.lane.b32.xlu2 %v1607_v62, %s8566_s23  ;;  %v1341_v6 = vld [vmem:[#allocation2 + $0x76] sm:$0x1f]  ;;  %v1044_v29 = vpop.f32.mrf.mxu1 }
 0x147   : > { %1277 = vst.msk [vmem:[#allocation3 + $0x28] sm:$0x7c] %vm1113_vm5, %v1275_v63  ;;  %v1343_v12 = vrot.slane %v1341_v6, 6  ;;  %v1636_v1 = vld [vmem:[#allocation2 + $0x15] sm:$0x1f] }
 0x148   : > { %1295 = vst.msk [vmem:[#allocation3 + $0x8] sm:$0x1f] %vm1135_vm10, %v1293_v5  ;;  %v1040_v7 = vadd.f32 %v1039_v53, %v976_v4  ;;  %v1642_v5 = vld [vmem:[#allocation2 + $0x22] sm:$0x1f] }
 0x149   : > { %v1308_v8 = vpop.permute.xlu2 %1307  ;;  %1543 = vst.msk [vmem:[#allocation3 + $0x18] sm:$0xe0] %vm1105_vm3, %v1541_v2  ;;  %vm1188_vm3 = vcmask 785925  }
 0x14a   : > { %1310 = vst.msk [vmem:[#allocation3 + $0x28] sm:$0x7c] %vm1153_vm11, %v1308_v8  ;;  %v1069_v11 = vmax.f32 %v1040_v7, 0.0 }
 0x14b   : > { %1544 = vst.msk [vmem:[#allocation3 + $0x38] sm:$0x3] %vm1107_vm4, %v1541_v2  ;;  %v1245_v13 = vld [vmem:[#allocation2 + $0x7d] sm:$0x1f]  ;;  %v1545_v17 = vld [vmem:[#allocation2 + $0x82] sm:$0x1f] }
 0x14c   : > { %1092 = vst.msk [vmem:[#allocation2 + $0x88] sm:$0xff] %vm1074_vm1, %v1069_v11  ;;  %1344 = vrot.lane.b32.xlu0 %v1343_v12, %s8566_s23  ;;  %v1247_v15 = vrot.slane %v1245_v13, 1  ;;  %v1547_v19 = vrot.slane %v1545_v17, 6  ;;  %v1278_v21 = vld [vmem:[#allocation2 + $0x82] sm:$0x1f]  ;;  %vm1190_vm4 = vcmask 779776  }
 0x14d   : > { %v978_v16 = vpop.f32.mrf.mxu0  ;;  %v1280_v22 = vrot.slane %v1278_v21, 1  ;;  %v1155_v25 = vld [vmem:[#allocation2 + $0x7c] sm:$0x1f]  ;;  %v1348_v40 = vld [vmem:[#allocation2 + $0x83] sm:$0x1f] }
 0x14e   : > { %v979_v18 = vadd.f32 %v6674_v3, %v978_v16  ;;  %1435 = vrot.lane.b32.xlu1 %v1434_v14, %s6419_s28  ;;  %1248 = vrot.lane.b32.xlu2 %v1247_v15, %s6420_s0  ;;  %v6795_v23 = vpop.permute.xlu1 %1465  ;;  %1549 = vst.msk [vmem:[#allocation3 + $0x38] sm:$0x7c] %vm1113_vm5, %v1547_v19  ;;  %v1440_v27 = vld [vmem:[#allocation2 + $0x7c] sm:$0x1f]  ;;  %v1157_v30 = vrot.slane %v1155_v25, 1  ;;  %v1350_v46 = vrot.slane %v1348_v40, 1  ;;  %v1047_v52 = vpop.f32.mrf.mxu1 }
 0x14f   : > { %1282 = vst.msk [vmem:[#allocation3 + $0x28] sm:$0x80] %vm1119_vm6, %v1280_v22  ;;  %v1442_v34 = vrot.slane %v1440_v27, 6  ;;  %v1613_v41 = vld [vmem:[#allocation2 + $0x83] sm:$0x1f]  ;;  %vm1233_vm5 = vcmask 1048325  }
 0x150   : > { %v1043_v24 = vadd.f32 %v1042_v10, %v979_v18  ;;  %1283 = vst.msk [vmem:[#allocation3 + $0x48] sm:$0xf] %vm1121_vm7, %v1280_v22  ;;  %v1615_v47 = vrot.slane %v1613_v41, 6  ;;  %v1644_v10 = vrot.slane %v1642_v5, 3  ;;  %v1650_v15 = vld [vmem:[#allocation2 + $0x2f] sm:$0x1f] }
 0x151   : > { %v1657_v17 = vld [vmem:[#allocation2 + $0x3c] sm:$0x1f]  ;;  %v1652_v18 = vrot.slane %v1650_v15, 6  ;;  %v6048_v15 = vld [vmem:[%s8588_s4 + $0xf8] sm:$0xff] }
 0x152   : > { %v1070_v26 = vmax.f32 %v1043_v24, 0.0  ;;  %v1659_v21 = vrot.slane %v1657_v17, 1  ;;  %v6047_v17 = vld [vmem:[%s8588_s4 + $0xf0] sm:$0xff] }
 0x153   : > { %v1165_v28 = vld [vmem:[#allocation2 + $0x89] sm:$0x1f] }
 0x154   : > { %1093 = vst.msk [vmem:[#allocation2 + $0x90] sm:$0xff] %vm1074_vm1, %v1070_v26  ;;  %v1167_v32 = vrot.slane %v1165_v28, 4  ;;  %v1255_v43 = vld [vmem:[#allocation2 + $0x8a] sm:$0x1f] }
 0x155   : > { %v980_v33 = vpop.f32.mrf.mxu0  ;;  %v1257_v51 = vrot.slane %v1255_v43, 4  ;;  %v1447_v60 = vld [vmem:[#allocation2 + $0x89] sm:$0x1f] }
 0x156   : > { %v981_v35 = vadd.f32 %v6674_v3, %v980_v33  ;;  %1158 = vrot.lane.b32.xlu1 %v1157_v30, %s6419_s28  ;;  %1168 = vrot.lane.b32.xlu0 %v1167_v32, %s6419_s28  ;;  %v1565_v36 = vpop.permute.xlu0 %1564  ;;  %v1449_v63 = vrot.slane %v1447_v60, 1  ;;  %v1521_v8 = vld [vmem:[#allocation2 + $0x8a] sm:$0x1f]  ;;  %v1049_v14 = vpop.f32.mrf.mxu1  ;;  %v6030_v60 = vld [vmem:[%s8588_s4 + $0x68] sm:$0xff] }
 0x157   : > { %1567 = vst.msk [vmem:[#allocation3 + $0x18] sm:$0x1f] %vm1135_vm10, %v1565_v36  ;;  %1443 = vrot.lane.b32.xlu2 %v1442_v34, %s6419_s28  ;;  %v1523_v12 = vrot.slane %v1521_v8, 1  ;;  %v1591_v26 = vld [vmem:[#allocation2 + $0x48] sm:$0x1f]  ;;  %v6040_v8 = vld [vmem:[%s8588_s4 + $0xb8] sm:$0xff] }
 0x158   : > { %v1045_v37 = vadd.f32 %v1044_v29, %v981_v35  ;;  %v6806_v39 = vpop.permute.xlu2 %1388  ;;  %v1593_v29 = vrot.slane %v1591_v26, 4  ;;  %v1492_v34 = vld [vmem:[#allocation2 + $0x42] sm:$0x1f]  ;;  %v1665_v36 = vld [vmem:[#allocation2 + $0x49] sm:$0x1f] }
 0x159   : > { %v1300_v38 = vpop.permute.xlu1 %1299  ;;  %v6039_v14 = vld [vmem:[%s8588_s4 + $0xb0] sm:$0xff] }
 0x15a   : > { %1302 = vst.msk [vmem:[#allocation3 + $0x8] sm:$0xe0] %vm1143_vm12, %v1300_v38  ;;  %v1071_v42 = vmax.f32 %v1045_v37, 0.0  ;;  %v1494_v37 = vrot.slane %v1492_v34, 4  ;;  %v6035_v26 = vld [vmem:[%s8588_s4 + $0x90] sm:$0xff] }
 0x15b   : > { %1303 = vst.msk [vmem:[#allocation3 + $0x28] sm:$0x3] %vm1145_vm13, %v1300_v38  ;;  %v1284_v44 = vld [vmem:[#allocation2 + $0x8f] sm:$0x1f]  ;;  %v1667_v38 = vrot.slane %v1665_v36, 4  ;;  %v6033_v36 = vld [vmem:[%s8588_s4 + $0x80] sm:$0xff] }
 0x15c   : > { %1094 = vst.msk [vmem:[#allocation2 + $0x98] sm:$0xff] %vm1074_vm1, %v1071_v42  ;;  %v1286_v48 = vrot.slane %v1284_v44, 4  ;;  %v1550_v49 = vld [vmem:[#allocation2 + $0x8f] sm:$0x1f] }
 0x15d   : > { %v983_v50 = vpop.f32.mrf.mxu0  ;;  %v1552_v53 = vrot.slane %v1550_v49, 1  ;;  %v1356_v2 = vld [vmem:[#allocation2 + $0x90] sm:$0x1f] }
 0x15e   : > { %v984_v54 = vadd.f32 %v6674_v3, %v983_v50  ;;  %1351 = vrot.lane.b32.xlu1 %v1350_v46, %s8566_s23  ;;  %1616 = vrot.lane.b32.xlu0 %v1615_v47, %s8566_s23  ;;  %v6814_v56 = vpop.permute.xlu0 %1195  ;;  %1288 = vst.msk [vmem:[#allocation3 + $0x48] sm:$0xf0] %vm1127_vm8, %v1286_v48  ;;  %v1514_v3 = vld [vmem:[#allocation2 + $0x7d] sm:$0x1f]  ;;  %v1358_v7 = vrot.slane %v1356_v2, 4  ;;  %v6024_v47 = vld [vmem:[%s8588_s4 + $0x38] sm:$0xff] }
 0x15f   : > { %1258 = vrot.lane.b32.xlu2 %v1257_v51, %s6420_s0  ;;  %1289 = vst.msk [vmem:[#allocation3 + $0x68] sm:$0x1] %vm1096_vm9, %v1286_v48  ;;  %v1516_v62 = vrot.slane %v1514_v3, 6  ;;  %v1620_v25 = vld [vmem:[#allocation2 + $0x90] sm:$0x1f]  ;;  %1957 = vmatpush.bf16.msra.mxu2 %v6024_v47  ;;  %v6023_v50 = vld [vmem:[%s8588_s4 + $0x30] sm:$0xff] }
 0x160   : > { %v1048_v57 = vadd.f32 %v1047_v52, %v984_v54  ;;  %v1580_v59 = vpop.permute.xlu2 %1579  ;;  %1554 = vst.msk [vmem:[#allocation3 + $0x38] sm:$0x80] %vm1119_vm6, %v1552_v53  ;;  %v1622_v28 = vrot.slane %v1620_v25, 1  ;;  %vm1235_vm6 = vcmask 1042176   ;;  %v6032_v51 = vld [vmem:[%s8588_s4 + $0x78] sm:$0xff]  ;;  %v6022_v52 = vld [vmem:[%s8588_s4 + $0x28] sm:$0xff] }
 0x161   : > { %v6819_v58 = vpop.permute.xlu1 %1381  ;;  %1582 = vst.msk [vmem:[#allocation3 + $0x38] sm:$0x7c] %vm1153_vm11, %v1580_v59  ;;  %1976 = vmatpush.bf16.msra.mxu3 %v6032_v51  ;;  %v6031_v3 = vld [vmem:[%s8588_s4 + $0x70] sm:$0xff]  ;;  %v6028_v2 = vld [vmem:[%s8588_s4 + $0x58] sm:$0xff]  ;;  %v6045_v25 = vld [vmem:[%s8588_s4 + $0xe0] sm:$0xff] }
 0x162   : > { %v1072_v61 = vmax.f32 %v1048_v57, 0.0  ;;  %1555 = vst.msk [vmem:[#allocation3 + $0x58] sm:$0xf] %vm1121_vm7, %v1552_v53  ;;  %vm1180_vm7 = vcmask 782848  }
 0x163   : > { %v1455_v16 = vld [vmem:[#allocation2 + $0x96] sm:$0x1f]  ;;  %1958 = vmatpush.bf16.msra.mxu2 %v6023_v50 }
 0x164   : > { %1095 = vst.msk [vmem:[#allocation2 + $0xa0] sm:$0xff] %vm1074_vm1, %v1072_v61  ;;  %v1457_v19 = vrot.slane %v1455_v16, 4  ;;  %v1529_v27 = vld [vmem:[#allocation2 + $0x97] sm:$0x1f]  ;;  %vm1171_vm1 = vcmask 523524  }
 0x165   : > { %v985_v6 = vpop.f32.mrf.mxu0  ;;  %v1531_v30 = vrot.slane %v1529_v27, 4  ;;  %1977 = vmatpush.bf16.msra.mxu3 %v6031_v3  ;;  %v6020_v61 = vld [vmem:[%s8588_s4 + $0x18] sm:$0xff] }
 0x166   : > { %1517 = vrot.lane.b32.xlu1 %v1516_v62, %s6420_s0  ;;  %1450 = vrot.lane.b32.xlu0 %v1449_v63, %s6419_s28  ;;  %v6827_v0 = vpop.permute.xlu0 %1373 }
 0x167   : > { %1638 = vrot.lane.b32.xlu2 %v1636_v1, %s6420_s0  ;;  %1959 = vmatpush.bf16.msra.mxu2 %v6022_v52 }
 0x168   : > { %v6839_v22 = vpop.permute.xlu2 %1396 }
 0x169   : > { %v1572_v4 = vpop.permute.xlu1 %1571  ;;  %1978 = vmatpush.bf16.msra.mxu3 %v6030_v60 }
 0x16a   : > { %1574 = vst.msk [vmem:[#allocation3 + $0x18] sm:$0xe0] %vm1143_vm12, %v1572_v4 }
 0x16b   : > { %1575 = vst.msk [vmem:[#allocation3 + $0x38] sm:$0x3] %vm1145_vm13, %v1572_v4  ;;  %v1556_v9 = vld [vmem:[#allocation2 + $0x9c] sm:$0x1f] }
 0x16c   : > { %v1558_v11 = vrot.slane %v1556_v9, 4  ;;  %v1628_v42 = vld [vmem:[#allocation2 + $0x9d] sm:$0x1f] }
 0x16d   : > { %v1630_v44 = vrot.slane %v1628_v42, 4  ;;  %v6018_v4 = vld [vmem:[%s8588_s4 + $0x8] sm:$0xff] }
 0x16e   : > { %1359 = vrot.lane.b32.xlu1 %v1358_v7, %s8566_s23  ;;  %1645 = vrot.lane.b32.xlu0 %v1644_v10, %s6420_s0  ;;  %v6834_v13 = vpop.permute.xlu0 %1480  ;;  %1560 = vst.msk [vmem:[#allocation3 + $0x58] sm:$0xf0] %vm1127_vm8, %v1558_v11  ;;  %vm1225_vm8 = vcmask 1045248   ;;  %v6017_v7 = vld [vmem:[%s8588_s4] sm:$0xff]  ;;  %v6026_v10 = vld [vmem:[%s8588_s4 + $0x48] sm:$0xff] }
 0x16f   : > { %1524 = vrot.lane.b32.xlu2 %v1523_v12, %s6420_s0  ;;  %1561 = vst.msk [vmem:[#allocation3 + $0x78] sm:$0x1] %vm1096_vm9, %v1558_v11  ;;  %vm1198_vm9 = vcmask 784898  }
 0x171   : > { %v6851_v35 = vpop.permute.xlu1 %1203 }
 0x176   : > { %1653 = vrot.lane.b32.xlu1 %v1652_v18, %s6420_s0  ;;  %1458 = vrot.lane.b32.xlu0 %v1457_v19, %s6419_s28  ;;  %v1315_v24 = vpop.permute.xlu0 %1314  ;;  %v6037_v18 = vld [vmem:[%s8588_s4 + $0xa0] sm:$0xff] }
 0x177   : > { %1317 = vst.msk [vmem:[#allocation3 + $0x28] sm:$0x80] %vm1161_vm14, %v1315_v24  ;;  %1660 = vrot.lane.b32.xlu2 %v1659_v21, %s6420_s0 }
 0x178   : > { %1318 = vst.msk [vmem:[#allocation3 + $0x48] sm:$0xf] %vm1163_vm15, %v1315_v24  ;;  %v6036_v24 = vld [vmem:[%s8588_s4 + $0x98] sm:$0xff] }
 0x179   : > { %v6857_v43 = vpop.permute.xlu1 %1213 }
 0x17e   : > { %1623 = vrot.lane.b32.xlu1 %v1622_v28, %s8566_s23  ;;  %1594 = vrot.lane.b32.xlu0 %v1593_v29, %s6419_s28  ;;  %v1323_v32 = vpop.permute.xlu0 %1322  ;;  %v6044_v29 = vld [vmem:[%s8588_s4 + $0xd8] sm:$0xff] }
 0x17f   : > { %v1223_v33 = vpop.permute.xlu2 %1222  ;;  %1325 = vst.msk [vmem:[#allocation3 + $0x48] sm:$0xf0] %vm1171_vm1, %v1323_v32  ;;  %1532 = vrot.lane.b32.xlu2 %v1531_v30, %s6420_s0  ;;  %v6034_v30 = vld [vmem:[%s8588_s4 + $0x88] sm:$0xff] }
 0x180   : > { %1326 = vst.msk [vmem:[#allocation3 + $0x68] sm:$0x1] %vm1173_vm2, %v1323_v32 }
 0x181   : > { %v6869_v48 = vpop.permute.xlu1 %1487 }
 0x186   : > { %1495 = vrot.lane.b32.xlu1 %v1494_v37, %s8566_s23  ;;  %v1587_v40 = vpop.permute.xlu0 %1586 }
 0x187   : > { %1589 = vst.msk [vmem:[#allocation3 + $0x38] sm:$0x80] %vm1161_vm14, %v1587_v40  ;;  %1668 = vrot.lane.b32.xlu2 %v1667_v38, %s6420_s0  ;;  %v1503_v41 = vpop.permute.xlu2 %1502 }
 0x188   : > { %1590 = vst.msk [vmem:[#allocation3 + $0x58] sm:$0xf] %vm1163_vm15, %v1587_v40  ;;  %v6042_v40 = vld [vmem:[%s8588_s4 + $0xc8] sm:$0xff] }
 0x18e   : > { %1631 = vrot.lane.b32.xlu1 %v1630_v44, %s8566_s23 }
 0x191   : > { %v1337_v46 = vpop.permute.xlu2 %1336 }
 0x192   : > { %1339 = vst.msk [vmem:[#allocation3 + $0x8] sm:$0xe0] %vm1188_vm3, %v1337_v46 }
 0x193   : > { %1340 = vst.msk [vmem:[#allocation3 + $0x28] sm:$0x3] %vm1190_vm4, %v1337_v46 }
 0x194   : > { %1376 = vst.msk [vmem:[#allocation3 + $0x8] sm:$0xe0] %vm1233_vm5, %v6827_v0 }
 0x195   : > { %1377 = vst.msk [vmem:[#allocation3 + $0x28] sm:$0x3] %vm1235_vm6, %v6827_v0  ;;  %v6029_v0 = vld [vmem:[%s8588_s4 + $0x60] sm:$0xff] }
 0x196   : > { %v1133_v49 = vpop.permute.xlu0 %1132  ;;  %1979 = vmatpush.bf16.msra.mxu3 %v6029_v0 }
 0x197   : > { %1136 = vst.msk [vmem:[#allocation3] sm:$0x1f] %vm1135_vm10, %v1133_v49 }
 0x198   : > { %1181 = vst.msk [vmem:[#allocation3] sm:$0x1f] %vm1180_vm7, %v6755_v20 }
 0x199   : > { %1226 = vst.msk [vmem:[#allocation3] sm:$0x1f] %vm1225_vm8, %v1223_v33 }
 0x19a   : > { %1980 = vmatpush.bf16.msra.mxu3 %v6028_v2 }
 0x19e   : > { %v1330_v53 = vpop.permute.xlu1 %1329  ;;  %v1429_v54 = vpop.permute.xlu0 %1428 }
 0x19f   : > { %1332 = vst.msk [vmem:[#allocation3 + $0x8] sm:$0x1f] %vm1180_vm7, %v1330_v53 }
 0x1a0   : > { %1369 = vst.msk [vmem:[#allocation3 + $0x8] sm:$0x1f] %vm1225_vm8, %v6762_v31  ;;  %v1609_v20 = vpop.permute.xlu2 %1608  ;;  %v6021_v31 = vld [vmem:[%s8588_s4 + $0x20] sm:$0xff] }
 0x1a1   : > { %1431 = vst.msk [vmem:[#allocation3 + $0x10] sm:$0x1f] %vm1135_vm10, %v1429_v54  ;;  %1960 = vmatpush.bf16.msra.mxu2 %v6021_v31  ;;  %vm1243_vm10 = vcmask 1047298  }
 0x1a2   : > { %1468 = vst.msk [vmem:[#allocation3 + $0x10] sm:$0x1f] %vm1180_vm7, %v6795_v23 }
 0x1a3   : > { %1505 = vst.msk [vmem:[#allocation3 + $0x10] sm:$0x1f] %vm1225_vm8, %v1503_v41 }
 0x1a4   : > { %1611 = vst.msk [vmem:[#allocation3 + $0x18] sm:$0xe0] %vm1188_vm3, %v1609_v20 }
 0x1a5   : > { %1612 = vst.msk [vmem:[#allocation3 + $0x38] sm:$0x3] %vm1190_vm4, %v1609_v20  ;;  %1961 = vmatpush.bf16.msra.mxu2 %v6020_v61 }
 0x1a6   : > { %v1602_v57 = vpop.permute.xlu1 %1601  ;;  %v1141_v59 = vpop.permute.xlu0 %1140 }
 0x1a7   : > { %1604 = vst.msk [vmem:[#allocation3 + $0x18] sm:$0x1f] %vm1180_vm7, %v1602_v57  ;;  %vm1218_vm7 = vcmask 778752   ;;  %v1674_v42 = vld [vmem:[#allocation3 + $0x8] sm:$0xff] }
 0x1a8   : > { %1144 = vst.msk [vmem:[#allocation3] sm:$0xe0] %vm1143_vm12, %v1141_v59  ;;  %v6901_v23 = vpop.permute.xlu2 %1248 }
 0x1a9   : > { %1146 = vst.msk [vmem:[#allocation3 + $0x20] sm:$0x3] %vm1145_vm13, %v1141_v59 }
 0x1aa   : > { %1189 = vst.msk [vmem:[#allocation3] sm:$0xe0] %vm1188_vm3, %v6771_v45 }
 0x1ab   : > { %1191 = vst.msk [vmem:[#allocation3 + $0x20] sm:$0x3] %vm1190_vm4, %v6771_v45  ;;  %v6019_v45 = vld [vmem:[%s8588_s4 + $0x10] sm:$0xff] }
 0x1ac   : > { %1962 = vmatpush.bf16.msra.mxu2 %v6019_v45 }
 0x1ae   : > { %v1231_v62 = vpop.permute.xlu0 %1230 }
 0x1af   : > { %1234 = vst.msk [vmem:[#allocation3] sm:$0xe0] %vm1233_vm5, %v1231_v62 }
 0x1b0   : > { %1236 = vst.msk [vmem:[#allocation3 + $0x20] sm:$0x3] %vm1235_vm6, %v1231_v62  ;;  %v1151_v63 = vpop.permute.xlu1 %1150  ;;  %1963 = vmatpush.bf16.msra.mxu2 %v6018_v4 }
 0x1b1   : > { %1154 = vst.msk [vmem:[#allocation3 + $0x20] sm:$0x7c] %vm1153_vm11, %v1151_v63  ;;  %v1444_v1 = vpop.permute.xlu2 %1443 }
 0x1b2   : > { %1446 = vst.msk [vmem:[#allocation3 + $0x30] sm:$0x7c] %vm1153_vm11, %v1444_v1  ;;  %vm1206_vm11 = vcmask 785927  }
 0x1b3   : > { %1199 = vst.msk [vmem:[#allocation3 + $0x20] sm:$0x7c] %vm1198_vm9, %v6814_v56  ;;  %v6027_v56 = vld [vmem:[%s8588_s4 + $0x50] sm:$0xff] }
 0x1b4   : > { %1483 = vst.msk [vmem:[#allocation3 + $0x30] sm:$0x7c] %vm1198_vm9, %v6834_v13  ;;  %1981 = vmatpush.bf16.msra.mxu3 %v6027_v56  ;;  %1964 = vmatpush.bf16.msra.mxu2 %v6017_v7  ;;  %v6025_v13 = vld [vmem:[%s8588_s4 + $0x40] sm:$0xff] }
 0x1b6   : > { %v1510_v5 = vpop.permute.xlu0 %1509  ;;  %v1673_v32 = vld [vmem:[#allocation3] sm:$0xff] }
 0x1b8   : > { %v1241_v6 = vpop.permute.xlu1 %1240  ;;  %1995 = vmatpush.bf16.msrb.mxu2 %v6040_v8  ;;  %1982 = vmatpush.bf16.msra.mxu3 %v6026_v10 }
 0x1b9   : > { %1244 = vst.msk [vmem:[#allocation3 + $0x20] sm:$0x7c] %vm1243_vm10, %v1241_v6  ;;  %v6944_v9 = vpop.permute.xlu2 %1258 }
 0x1bc   : > { %1983 = vmatpush.bf16.msra.mxu3 %v6025_v13  ;;  %1996 = vmatpush.bf16.msrb.mxu2 %v6039_v14 }
 0x1be   : > { %v1345_v11 = vpop.permute.xlu0 %1344 }
 0x1bf   : > { %1347 = vst.msk [vmem:[#allocation3 + $0x28] sm:$0x7c] %vm1198_vm9, %v1345_v11 }
 0x1c0   : > { %1384 = vst.msk [vmem:[#allocation3 + $0x28] sm:$0x7c] %vm1243_vm10, %v6819_v58  ;;  %v1436_v12 = vpop.permute.xlu1 %1435  ;;  %v6038_v58 = vld [vmem:[%s8588_s4 + $0xa8] sm:$0xff]  ;;  %2014 = vmatpush.bf16.msrb.mxu3 %v6048_v15 }
 0x1c1   : > { %1438 = vst.msk [vmem:[#allocation3 + $0x10] sm:$0xe0] %vm1143_vm12, %v1436_v12  ;;  %v1639_v16 = vpop.permute.xlu2 %1638  ;;  %1997 = vmatpush.bf16.msrb.mxu2 %v6038_v58  ;;  %vm1208_vm12 = vcmask 781824   ;;  %v6348_v58 = vld [vmem:[%s8589_s22] ss:$0 sm:$0xff] }
 0x1c2   : > { %1439 = vst.msk [vmem:[#allocation3 + $0x30] sm:$0x3] %vm1145_vm13, %v1436_v12  ;;  %vm1251_vm13 = vcmask 1048327  }
 0x1c3   : > { %1475 = vst.msk [vmem:[#allocation3 + $0x10] sm:$0xe0] %vm1188_vm3, %v6778_v55  ;;  %vm1253_vm3 = vcmask 1044224  }
 0x1c4   : > { %1476 = vst.msk [vmem:[#allocation3 + $0x30] sm:$0x3] %vm1190_vm4, %v6778_v55  ;;  %2015 = vmatpush.bf16.msrb.mxu3 %v6047_v17  ;;  %v6046_v55 = vld [vmem:[%s8588_s4 + $0xe8] sm:$0xff]  ;;  %vm1216_vm4 = vcmask 785924  }
 0x1c5   : > { %1512 = vst.msk [vmem:[#allocation3 + $0x10] sm:$0xe0] %vm1233_vm5, %v1510_v5  ;;  %1998 = vmatpush.bf16.msrb.mxu2 %v6037_v18 }
 0x1c6   : > { %1513 = vst.msk [vmem:[#allocation3 + $0x30] sm:$0x3] %vm1235_vm6, %v1510_v5 }
 0x1c7   : > { %1641 = vst.msk [vmem:[#allocation3 + $0x18] sm:$0x1f] %vm1225_vm8, %v1639_v16  ;;  %vm1261_vm8 = vcmask 1048324  }
 0x1c8   : > { %v1159_v19 = vpop.permute.xlu1 %1158  ;;  %v1169_v21 = vpop.permute.xlu0 %1168  ;;  %2016 = vmatpush.bf16.msrb.mxu3 %v6046_v55 }
 0x1c9   : > { %1162 = vst.msk [vmem:[#allocation3 + $0x20] sm:$0x80] %vm1161_vm14, %v1159_v19  ;;  %1999 = vmatpush.bf16.msrb.mxu2 %v6036_v24  ;;  %v1525_v41 = vpop.permute.xlu2 %1524 }
 0x1ca   : > { %1164 = vst.msk [vmem:[#allocation3 + $0x40] sm:$0xf] %vm1163_vm15, %v1159_v19 }
 0x1cb   : > { %1207 = vst.msk [vmem:[#allocation3 + $0x20] sm:$0x80] %vm1206_vm11, %v6851_v35 }
 0x1cc   : > { %1209 = vst.msk [vmem:[#allocation3 + $0x40] sm:$0xf] %vm1208_vm12, %v6851_v35  ;;  %2017 = vmatpush.bf16.msrb.mxu3 %v6045_v25  ;;  %v6043_v35 = vld [vmem:[%s8588_s4 + $0xd0] sm:$0xff]  ;;  %v1675_v31 = vld [vmem:[#allocation3 + $0x10] sm:$0xff] }
 0x1cd   : > { %1252 = vst.msk [vmem:[#allocation3 + $0x20] sm:$0x80] %vm1251_vm13, %v6901_v23  ;;  %2000 = vmatpush.bf16.msrb.mxu2 %v6035_v26 }
 0x1ce   : > { %1254 = vst.msk [vmem:[#allocation3 + $0x40] sm:$0xf] %vm1253_vm3, %v6901_v23 }
 0x1cf   : > { %1172 = vst.msk [vmem:[#allocation3 + $0x40] sm:$0xf0] %vm1171_vm1, %v1169_v21 }
 0x1d0   : > { %1174 = vst.msk [vmem:[#allocation3 + $0x60] sm:$0x1] %vm1173_vm2, %v1169_v21  ;;  %v1352_v27 = vpop.permute.xlu1 %1351  ;;  %v1617_v28 = vpop.permute.xlu0 %1616  ;;  %2018 = vmatpush.bf16.msrb.mxu3 %v6044_v29 }
 0x1d1   : > { %1217 = vst.msk [vmem:[#allocation3 + $0x40] sm:$0xf0] %vm1216_vm4, %v6857_v43  ;;  %2001 = vmatpush.bf16.msrb.mxu2 %v6034_v30  ;;  %v1661_v57 = vpop.permute.xlu2 %1660 }
 0x1d2   : > { %1219 = vst.msk [vmem:[#allocation3 + $0x60] sm:$0x1] %vm1218_vm7, %v6857_v43 }
 0x1d3   : > { %1262 = vst.msk [vmem:[#allocation3 + $0x40] sm:$0xf0] %vm1261_vm8, %v6944_v9 }
 0x1d4   : > { %1264 = vst.msk [vmem:[#allocation3 + $0x60] sm:$0x1] %vm1263_vm0, %v6944_v9  ;;  %v1677_v33 = vld [vmem:[#allocation3 + $0x20] sm:$0xff]  ;;  %2019 = vmatpush.bf16.msrb.mxu3 %v6043_v35 }
 0x1d5   : > { %1354 = vst.msk [vmem:[#allocation3 + $0x28] sm:$0x80] %vm1206_vm11, %v1352_v27  ;;  %v1689_v34 = vpack.c.bf16 %v1677_v33, %v1673_v32  ;;  %2002 = vmatpush.bf16.msrb.mxu2 %v6033_v36 }
 0x1d6   : > { %1355 = vst.msk [vmem:[#allocation3 + $0x48] sm:$0xf] %vm1208_vm12, %v1352_v27 }
 0x1d7   : > { %1391 = vst.msk [vmem:[#allocation3 + $0x28] sm:$0x80] %vm1251_vm13, %v6806_v39  ;;  %1965 = vmatmul.bf16.vlgmr.msra.gmra.mxu2 %v1689_v34 }
 0x1d8   : > { %1392 = vst.msk [vmem:[#allocation3 + $0x48] sm:$0xf] %vm1253_vm3, %v6806_v39  ;;  %v1518_v37 = vpop.permute.xlu1 %1517  ;;  %v1451_v38 = vpop.permute.xlu0 %1450  ;;  %2020 = vmatpush.bf16.msrb.mxu3 %v6042_v40  ;;  %v6041_v39 = vld [vmem:[%s8588_s4 + $0xc0] sm:$0xff]  ;;  %s658_s4 = sand.u32 1, %s6408_s25  }
 0x1d9   : > { %1619 = vst.msk [vmem:[#allocation3 + $0x38] sm:$0x7c] %vm1198_vm9, %v1617_v28  ;;  %v1533_v60 = vpop.permute.xlu2 %1532  ;;  %vm2079_vm9 = vcmask 1048070   ;;  %s659_s29 = scalar_lea.vmem [#allocation7], %s658_s4  ;;  %s4598_s3 = scalar_lea.sflag [#allocation8], %s658_s4 }
 0x1da   : > { %1520 = vst.msk [vmem:[#allocation3 + $0x30] sm:$0x7c] %vm1243_vm10, %v1518_v37  ;;  %v1681_v49 = vld [vmem:[#allocation3 + $0x40] sm:$0xff]  ;;  %s4608_s22 = sshll.u32 %s659_s29, 4  ;;  %s4609_s22 = int_to_ptr.vmem [resolvable:$true] %s4608_s22 }
 0x1db   : > { %1453 = vst.msk [vmem:[#allocation3 + $0x30] sm:$0x80] %vm1161_vm14, %v1451_v38  ;;  %v1685_v50 = vld [vmem:[#allocation3 + $0x60] sm:$0x1]  ;;  %vm2043_vm14 = vcmask 518144  }
 0x1dc   : > { %1454 = vst.msk [vmem:[#allocation3 + $0x50] sm:$0xf] %vm1163_vm15, %v1451_v38  ;;  %2021 = vmatpush.bf16.msrb.mxu3 %v6041_v39 }
 0x1dd   : > { %1490 = vst.msk [vmem:[#allocation3 + $0x30] sm:$0x80] %vm1206_vm11, %v6869_v48 }
 0x1de   : > { %1491 = vst.msk [vmem:[#allocation3 + $0x50] sm:$0xf] %vm1208_vm12, %v6869_v48  ;;  %v1678_v43 = vld [vmem:[#allocation3 + $0x28] sm:$0xff]  ;;  %v1693_v48 = vpack.c.bf16 %v1685_v50, %v1681_v49 }
 0x1df   : > { %1527 = vst.msk [vmem:[#allocation3 + $0x30] sm:$0x80] %vm1251_vm13, %v1525_v41  ;;  %v1690_v44 = vpack.c.bf16 %v1678_v43, %v1674_v42  ;;  %v6056_v42 = vld [vmem:[%s8592_s6 + $0x38] sm:$0xff] }
 0x1e0   : > { %1528 = vst.msk [vmem:[#allocation3 + $0x50] sm:$0xf] %vm1253_vm3, %v1525_v41  ;;  %v1360_v46 = vpop.permute.xlu1 %1359  ;;  %v1646_v47 = vpop.permute.xlu0 %1645  ;;  %2508 = vmatpush.bf16.msra.mxu2 %v6056_v42  ;;  %v6072_v42 = vld [vmem:[%s8592_s6 + $0xb8] sm:$0xff] }
 0x1e1   : > { %1984 = vmatmul.bf16.vlgmr.msra.gmra.mxu3 %v1690_v44  ;;  %1362 = vst.msk [vmem:[#allocation3 + $0x48] sm:$0xf0] %vm1216_vm4, %v1360_v46  ;;  %v1669_v45 = vpop.permute.xlu2 %1668  ;;  %v6064_v44 = vld [vmem:[%s8592_s6 + $0x78] sm:$0xff] }
 0x1e2   : > { %1363 = vst.msk [vmem:[#allocation3 + $0x68] sm:$0x1] %vm1218_vm7, %v1360_v46  ;;  %2522 = vmatpush.bf16.msra.mxu3 %v6064_v44  ;;  %v6071_v44 = vld [vmem:[%s8592_s6 + $0xb0] sm:$0xff] }
 0x1e3   : > { %1399 = vst.msk [vmem:[#allocation3 + $0x48] sm:$0xf0] %vm1261_vm8, %v6839_v22 }
 0x1e4   : > { %1400 = vst.msk [vmem:[#allocation3 + $0x68] sm:$0x1] %vm1263_vm0, %v6839_v22 }
 0x1e5   : > { %1648 = vst.msk [vmem:[#allocation3 + $0x18] sm:$0xe0] %vm1233_vm5, %v1646_v47  ;;  %vm2055_vm5 = vcmask 523270  }
 0x1e6   : > { %1649 = vst.msk [vmem:[#allocation3 + $0x38] sm:$0x3] %vm1235_vm6, %v1646_v47  ;;  %v1679_v3 = vld [vmem:[#allocation3 + $0x30] sm:$0xff]  ;;  %v6055_v47 = vld [vmem:[%s8592_s6 + $0x30] sm:$0xff]  ;;  %vm2040_vm6 = vcmask 516096  }
 0x1e7   : > { %1970 = vmatmul.bf16.gmra.mxu2 %v1693_v48  ;;  %v1691_v23 = vpack.c.bf16 %v1679_v3, %v1675_v31 }
 0x1e8   : > { %v1654_v51 = vpop.permute.xlu1 %1653  ;;  %v1459_v52 = vpop.permute.xlu0 %1458  ;;  %2509 = vmatpush.bf16.msra.mxu2 %v6055_v47  ;;  %v6070_v47 = vld [vmem:[%s8592_s6 + $0xa8] sm:$0xff] }
 0x1e9   : > { %1656 = vst.msk [vmem:[#allocation3 + $0x38] sm:$0x7c] %vm1243_vm10, %v1654_v51  ;;  %vm2081_vm10 = vcmask 1040896  }
 0x1ea   : > { %1461 = vst.msk [vmem:[#allocation3 + $0x50] sm:$0xf0] %vm1171_vm1, %v1459_v52  ;;  %v1682_v53 = vld [vmem:[#allocation3 + $0x48] sm:$0xff] }
 0x1eb   : > { %1462 = vst.msk [vmem:[#allocation3 + $0x70] sm:$0x1] %vm1173_vm2, %v1459_v52  ;;  %v1686_v54 = vld [vmem:[#allocation3 + $0x68] sm:$0x1] }
 0x1ec   : > { %v1694_v20 = vpack.c.bf16 %v1686_v54, %v1682_v53  ;;  %v1676_v63 = vld [vmem:[#allocation3 + $0x18] sm:$0xff] }
 0x1f0   : > { %v1624_v59 = vpop.permute.xlu1 %1623  ;;  %v1595_v22 = vpop.permute.xlu0 %1594 }
 0x1f1   : > { %1989 = vmatmul.bf16.gmra.mxu3 %v1694_v20  ;;  %1626 = vst.msk [vmem:[#allocation3 + $0x38] sm:$0x80] %vm1206_vm11, %v1624_v59  ;;  %vm2063_vm11 = vcmask 1042944  }
 0x1f2   : > { %1627 = vst.msk [vmem:[#allocation3 + $0x58] sm:$0xf] %vm1208_vm12, %v1624_v59  ;;  %v6054_v59 = vld [vmem:[%s8592_s6 + $0x28] sm:$0xff]  ;;  %vm2071_vm12 = vcmask 1046019  }
 0x1f3   : > { %1663 = vst.msk [vmem:[#allocation3 + $0x38] sm:$0x80] %vm1251_vm13, %v1661_v57  ;;  %2510 = vmatpush.bf16.msra.mxu2 %v6054_v59  ;;  %v6066_v59 = vld [vmem:[%s8592_s6 + $0x88] sm:$0xff]  ;;  %vm2662_vm13 = vcmask 1043456  }
 0x1f4   : > { %1664 = vst.msk [vmem:[#allocation3 + $0x58] sm:$0xf] %vm1253_vm3, %v1661_v57 }
 0x1f5   : > { %1597 = vst.msk [vmem:[#allocation3 + $0x58] sm:$0xf0] %vm1171_vm1, %v1595_v22  ;;  %vm2049_vm1 = vcmask 521219  }
 0x1f6   : > { %1598 = vst.msk [vmem:[#allocation3 + $0x78] sm:$0x1] %vm1173_vm2, %v1595_v22 }
 0x1f7   : > { %2003 = vmatmul.bf16.vlgmr.msrb.gmra.mxu2 %v1691_v23 }
 0x1f8   : > { %v1496_v61 = vpop.permute.xlu1 %1495 }
 0x1f9   : > { %1498 = vst.msk [vmem:[#allocation3 + $0x50] sm:$0xf0] %vm1216_vm4, %v1496_v61 }
 0x1fa   : > { %1499 = vst.msk [vmem:[#allocation3 + $0x70] sm:$0x1] %vm1218_vm7, %v1496_v61  ;;  %v1680_v62 = vld [vmem:[#allocation3 + $0x38] sm:$0xff] }
 0x1fb   : > { %1535 = vst.msk [vmem:[#allocation3 + $0x50] sm:$0xf0] %vm1261_vm8, %v1533_v60  ;;  %v1692_v0 = vpack.c.bf16 %v1680_v62, %v1676_v63 }
 0x1fc   : > { %1536 = vst.msk [vmem:[#allocation3 + $0x70] sm:$0x1] %vm1263_vm0, %v1533_v60 }
 0x200   : > { %v1632_v1 = vpop.permute.xlu1 %1631 }
 0x201   : > { %2022 = vmatmul.bf16.vlgmr.msrb.gmra.mxu3 %v1692_v0  ;;  %1634 = vst.msk [vmem:[#allocation3 + $0x58] sm:$0xf0] %vm1216_vm4, %v1632_v1  ;;  %vm2658_vm4 = vcmask 195584  }
 0x202   : > { %1635 = vst.msk [vmem:[#allocation3 + $0x78] sm:$0x1] %vm1218_vm7, %v1632_v1  ;;  %v1683_v2 = vld [vmem:[#allocation3 + $0x50] sm:$0xff] }
 0x203   : > { %1671 = vst.msk [vmem:[#allocation3 + $0x58] sm:$0xf0] %vm1261_vm8, %v1669_v45  ;;  %v1687_v4 = vld [vmem:[#allocation3 + $0x70] sm:$0x1] }
 0x204   : > { %1672 = vst.msk [vmem:[#allocation3 + $0x78] sm:$0x1] %vm1263_vm0, %v1669_v45  ;;  %v1695_v5 = vpack.c.bf16 %v1687_v4, %v1683_v2  ;;  %vm8590_vm0 = vcmask 523264  }
 0x205   : > { %vm8591_vm15 = vmmov %vm8590_vm0 }
 0x206   : > { %vm8593_vm2 = vmmov %vm8590_vm0 }
 0x207   : > { %2008 = vmatmul.bf16.gmra.mxu2 %v1695_v5  ;;  %vm8594_vm3 = vmmov %vm8590_vm0 }
 0x20a   : > { %v1684_v6 = vld [vmem:[#allocation3 + $0x58] sm:$0xff] }
 0x20b   : > { %v1688_v56 = vld [vmem:[#allocation3 + $0x78] sm:$0x1] }
 0x20c   : > { %v1696_v7 = vpack.c.bf16 %v1688_v56, %v1684_v6 }
 0x211   : > { %2027 = vmatmul.bf16.gmra.mxu3 %v1696_v7 }
 0x25a   : > { %v1966_v8 = vpop.f32.mrf.mxu2 }
 0x25b   : > { %v1967_v17 = vadd.f32 %v6348_v58, %v1966_v8 }
 0x262   : > { %v1968_v9 = vpop.f32.mrf.mxu2 }
 0x263   : > { %v1969_v25 = vadd.f32 %v6348_v58, %v1968_v9 }
 0x264   : > { %v1985_v10 = vpop.f32.mrf.mxu3 }
 0x265   : > { %v1986_v18 = vadd.f32 %v1985_v10, %v1967_v17 }
 0x26a   : > { %v1971_v11 = vpop.f32.mrf.mxu2 }
 0x26b   : > { %v1972_v33 = vadd.f32 %v6348_v58, %v1971_v11 }
 0x26c   : > { %v1987_v12 = vpop.f32.mrf.mxu3 }
 0x26d   : > { %v1988_v27 = vadd.f32 %v1987_v12, %v1969_v25 }
 0x272   : > { %v1973_v13 = vpop.f32.mrf.mxu2 }
 0x273   : > { %v1974_v49 = vadd.f32 %v6348_v58, %v1973_v13 }
 0x274   : > { %v1990_v14 = vpop.f32.mrf.mxu3 }
 0x275   : > { %v1991_v37 = vadd.f32 %v1990_v14, %v1972_v33  ;;  %v6063_v33 = vld [vmem:[%s8592_s6 + $0x70] sm:$0xff] }
 0x276   : > { %2523 = vmatpush.bf16.msra.mxu3 %v6063_v33  ;;  %v5103_v33 = vld [vmem:[%s8543_s8 + $0x8] sm:$0xf0] }
 0x27a   : > { %v2004_v15 = vpop.f32.mrf.mxu2 }
 0x27b   : > { %v2005_v19 = vadd.f32 %v2004_v15, %v1986_v18 }
 0x27c   : > { %v1992_v16 = vpop.f32.mrf.mxu3 }
 0x27d   : > { %v1993_v54 = vadd.f32 %v1992_v16, %v1974_v49  ;;  %v6080_v49 = vld [vmem:[%s8592_s6 + $0xf8] sm:$0xff] }
 0x282   : > { %v2006_v55 = vpop.f32.mrf.mxu2 }
 0x283   : > { %v2007_v28 = vadd.f32 %v2006_v55, %v1988_v27 }
 0x284   : > { %v2023_v21 = vpop.f32.mrf.mxu3 }
 0x285   : > { %v2024_v24 = vadd.f32 %v2023_v21, %v2005_v19 }
 0x287   : > { %v2033_v26 = vmax.f32 %v2024_v24, 0.0 }
 0x289   : > { %2037 = vst.msk [vmem:[#allocation4] sm:$0xff] %vm8590_vm0, %v2033_v26 }
 0x28a   : > { %v2009_v32 = vpop.f32.mrf.mxu2 }
 0x28b   : > { %v2010_v41 = vadd.f32 %v2009_v32, %v1991_v37  ;;  %v6053_v32 = vld [vmem:[%s8592_s6 + $0x20] sm:$0xff] }
 0x28c   : > { %v2025_v29 = vpop.f32.mrf.mxu3  ;;  %2511 = vmatpush.bf16.msra.mxu2 %v6053_v32  ;;  %v6061_v37 = vld [vmem:[%s8592_s6 + $0x60] sm:$0xff] }
 0x28d   : > { %v2026_v30 = vadd.f32 %v2025_v29, %v2007_v28  ;;  %v6085_v32 = vld [vmem:[%s8543_s8 + $0x4] sm:$0xf] }
 0x28f   : > { %v2034_v34 = vmax.f32 %v2026_v30, 0.0 }
 0x290   : > { %v2058_v35 = vld [vmem:[#allocation4 + $0x1] sm:$0x7]  ;;  %v2045_v40 = vld [vmem:[#allocation4 + $0x5] sm:$0x7] }
 0x291   : > { %v2042_v36 = vld [vmem:[#allocation4] sm:$0x7]  ;;  %2038 = vst.msk [vmem:[#allocation4 + $0x8] sm:$0xff] %vm8591_vm15, %v2034_v34  ;;  %2060 = vrot.lane.b32.xlu0 %v2058_v35, %s8566_s23  ;;  %v2047_v39 = vrot.slane %v2045_v40, 5  ;;  %v2096_v51 = vld [vmem:[#allocation4 + $0x5] sm:$0x7]  ;;  %vm8601_vm15 = vmmov %vm8593_vm2 }
 0x292   : > { %v2083_v38 = vld [vmem:[#allocation4 + $0x2] sm:$0x7]  ;;  %2044 = vst.msk [vmem:[#allocation5] sm:$0x7] %vm2043_vm14, %v2042_v36  ;;  %v2011_v48 = vpop.f32.mrf.mxu2  ;;  %v6062_v35 = vld [vmem:[%s8592_s6 + $0x68] sm:$0xff]  ;;  %v6051_v36 = vld [vmem:[%s8592_s6 + $0x10] sm:$0xff] }
 0x293   : > { %2084 = vst.msk [vmem:[#allocation5 + $0x8] sm:$0x7] %vm2043_vm14, %v2083_v38  ;;  %v2012_v22 = vadd.f32 %v2011_v48, %v1993_v54  ;;  %v6052_v34 = vld [vmem:[%s8592_s6 + $0x18] sm:$0xff]  ;;  %2524 = vmatpush.bf16.msra.mxu3 %v6062_v35  ;;  %v6050_v38 = vld [vmem:[%s8592_s6 + $0x8] sm:$0xff]  ;;  %v6079_v48 = vld [vmem:[%s8592_s6 + $0xf0] sm:$0xff]  ;;  %v5106_v35 = vor.u32 %v6085_v32, %v5103_v33 }
 0x294   : > { %v2028_v43 = vpop.f32.mrf.mxu3  ;;  %2050 = vst.msk [vmem:[#allocation5] sm:$0x38] %vm2049_vm1, %v2047_v39  ;;  %2512 = vmatpush.bf16.msra.mxu2 %v6052_v34  ;;  %v6060_v40 = vld [vmem:[%s8592_s6 + $0x58] sm:$0xff]  ;;  %v6049_v39 = vld [vmem:[%s8592_s6] sm:$0xff]  ;;  %v6067_v54 = vld [vmem:[%s8592_s6 + $0x90] sm:$0xff] }
 0x295   : > { %v2029_v46 = vadd.f32 %v2028_v43, %v2010_v41  ;;  %v6059_v41 = vld [vmem:[%s8592_s6 + $0x50] sm:$0xff]  ;;  %v6058_v43 = vld [vmem:[%s8592_s6 + $0x48] sm:$0xff] }
 0x296   : > { %v6101_v34 = vld [vmem:[%s8545_s10 + $0x70] sm:$0xff] }
 0x297   : > { %v2035_v50 = vmax.f32 %v2029_v46, 0.0  ;;  %2525 = vmatpush.bf16.msra.mxu3 %v6061_v37  ;;  %v6057_v46 = vld [vmem:[%s8592_s6 + $0x40] sm:$0xff] }
 0x298   : > { %v2073_v52 = vld [vmem:[#allocation4 + $0xb] sm:$0x7]  ;;  %v2065_v53 = vld [vmem:[#allocation4 + $0x6] sm:$0x7]  ;;  %2513 = vmatpush.bf16.msra.mxu2 %v6051_v36  ;;  %v6100_v36 = vld [vmem:[%s8545_s10 + $0x68] sm:$0xff] }
 0x299   : > { %2039 = vst.msk [vmem:[#allocation4 + $0x10] sm:$0xff] %vm8593_vm2, %v2035_v50  ;;  %2098 = vrot.lane.b32.xlu0 %v2096_v51, %s8566_s23  ;;  %v2075_v20 = vrot.slane %v2073_v52, 2  ;;  %v2067_v57 = vrot.slane %v2065_v53, 5  ;;  %v2051_v3 = vld [vmem:[#allocation4 + $0xa] sm:$0x7]  ;;  %v6068_v52 = vld [vmem:[%s8592_s6 + $0x98] sm:$0xff] }
 0x29a   : > { %v2090_v31 = vld [vmem:[#allocation4 + $0xc] sm:$0x7]  ;;  %v2053_v60 = vrot.slane %v2051_v3, 2  ;;  %v2130_v45 = vld [vmem:[#allocation4 + $0x7] sm:$0x7]  ;;  %v6078_v53 = vld [vmem:[%s8592_s6 + $0xe8] sm:$0xff] }
 0x29b   : > { %2076 = vrot.lane.b32.xlu2 %v2075_v20, %s8566_s23  ;;  %2068 = vrot.lane.b32.xlu1 %v2067_v57, %s8566_s23  ;;  %v2185_v61 = vld [vmem:[#allocation4 + $0xc] sm:$0x7]  ;;  %v2092_v0 = vrot.slane %v2090_v31, 2  ;;  %v2117_v6 = vld [vmem:[#allocation4 + $0x6] sm:$0x7] }
 0x29c   : > { %v2030_v23 = vpop.f32.mrf.mxu3  ;;  %2186 = vst.msk [vmem:[#allocation5 + $0x20] sm:$0x7] %vm2043_vm14, %v2185_v61  ;;  %v2102_v63 = vld [vmem:[#allocation4 + $0xa] sm:$0x7]  ;;  %v2085_v7 = vld [vmem:[#allocation4 + $0x7] sm:$0x7]  ;;  %2514 = vmatpush.bf16.msra.mxu2 %v6050_v38  ;;  %2526 = vmatpush.bf16.msra.mxu3 %v6060_v40 }
 0x29d   : > { %v2031_v62 = vadd.f32 %v2030_v23, %v2012_v22  ;;  %2056 = vst.msk [vmem:[#allocation5] sm:$0xc0] %vm2055_vm5, %v2053_v60  ;;  %v2104_v5 = vrot.slane %v2102_v63, 5  ;;  %v2136_v12 = vld [vmem:[#allocation4 + $0xc] sm:$0x7]  ;;  %v2087_v15 = vrot.slane %v2085_v7, 5 }
 0x29e   : > { %2057 = vst.msk [vmem:[#allocation5 + $0x28] sm:$0x1] %vm2040_vm6, %v2053_v60  ;;  %v2164_v58 = vld [vmem:[#allocation4 + $0xb] sm:$0x7]  ;;  %v2138_v21 = vrot.slane %v2136_v12, 5  ;;  %v6076_v22 = vld [vmem:[%s8592_s6 + $0xd8] sm:$0xff] }
 0x29f   : > { %v2036_v1 = vmax.f32 %v2031_v62, 0.0  ;;  %2094 = vst.msk [vmem:[#allocation5 + $0x8] sm:$0xc0] %vm2055_vm5, %v2092_v0  ;;  %v2119_v16 = vld [vmem:[#allocation4 + $0xb] sm:$0x7]  ;;  %v6075_v23 = vld [vmem:[%s8592_s6 + $0xd0] sm:$0xff] }
 0x2a0   : > { %v2109_v2 = vld [vmem:[#allocation4 + $0xf] sm:$0x7]  ;;  %2095 = vst.msk [vmem:[#allocation5 + $0x30] sm:$0x1] %vm2040_vm6, %v2092_v0  ;;  %v2158_v9 = vld [vmem:[#allocation4 + $0x14] sm:$0x7]  ;;  %2515 = vmatpush.bf16.msra.mxu2 %v6049_v39  ;;  %2527 = vmatpush.bf16.msra.mxu3 %v6059_v41 }
 0x2a1   : > { %2041 = vst.msk [vmem:[#allocation4 + $0x18] sm:$0x1] %vm2040_vm6, %v2036_v1  ;;  %2132 = vrot.lane.b32.xlu0 %v2130_v45, %s8566_s23  ;;  %v2111_v4 = vrot.slane %v2109_v2, 2  ;;  %v2124_v56 = vld [vmem:[#allocation4 + $0x10] sm:$0x7]  ;;  %v2160_v10 = vrot.slane %v2158_v9, 2 }
 0x2a2   : > { %v2126_v8 = vrot.slane %v2124_v56, 2  ;;  %v2187_v11 = vld [vmem:[#allocation4 + $0x11] sm:$0x7]  ;;  %2118 = vst.msk [vmem:[#allocation5 + $0x10] sm:$0x7] %vm2043_vm14, %v2117_v6  ;;  %v2121_v25 = vrot.slane %v2119_v16, 5 }
 0x2a3   : > { %2112 = vrot.lane.b32.xlu2 %v2111_v4, %s8566_s23  ;;  %2105 = vrot.lane.b32.xlu1 %v2104_v5, %s8566_s23  ;;  %v2189_v13 = vrot.slane %v2187_v11, 5  ;;  %v2143_v14 = vld [vmem:[#allocation4 + $0x11] sm:$0x7]  ;;  %2162 = vst.msk [vmem:[#allocation5 + $0x18] sm:$0xc0] %vm2055_vm5, %v2160_v10  ;;  %v6069_v50 = vld [vmem:[%s8592_s6 + $0xa0] sm:$0xff] }
 0x2a4   : > { %2128 = vst.msk [vmem:[#allocation5 + $0x10] sm:$0xc0] %vm2055_vm5, %v2126_v8  ;;  %v2153_v18 = vld [vmem:[#allocation4 + $0xf] sm:$0x7]  ;;  %v2145_v19 = vrot.slane %v2143_v14, 2  ;;  %2536 = vmatpush.bf16.msrb.mxu2 %v6072_v42  ;;  %2528 = vmatpush.bf16.msra.mxu3 %v6058_v43  ;;  %v6084_v6 = vld [vmem:[%s8592_s6 + $0x118] sm:$0xff] }
 0x2a5   : > { %2129 = vst.msk [vmem:[#allocation5 + $0x38] sm:$0x1] %vm2040_vm6, %v2126_v8  ;;  %v2151_v24 = vld [vmem:[#allocation4 + $0xa] sm:$0x7]  ;;  %v2155_v26 = vrot.slane %v2153_v18, 5  ;;  %v6074_v61 = vld [vmem:[%s8592_s6 + $0xc8] sm:$0xff] }
 0x2a6   : > { %2163 = vst.msk [vmem:[#allocation5 + $0x40] sm:$0x1] %vm2040_vm6, %v2160_v10  ;;  %v2177_v27 = vld [vmem:[#allocation4 + $0x15] sm:$0x7]  ;;  %v2170_v28 = vld [vmem:[#allocation4 + $0x10] sm:$0x7] }
 0x2a7   : > { %2191 = vst.msk [vmem:[#allocation5 + $0x20] sm:$0x38] %vm2049_vm1, %v2189_v13  ;;  %v2179_v29 = vrot.slane %v2177_v27, 2  ;;  %v2172_v30 = vrot.slane %v2170_v28, 5  ;;  %v6077_v20 = vld [vmem:[%s8592_s6 + $0xe0] sm:$0xff]  ;;  %v2636_v7 = vld [vmem:[%s8543_s8 + $0x10] sm:$0xff] }
 0x2a8   : > { %v2192_v17 = vld [vmem:[#allocation4 + $0x16] sm:$0x7]  ;;  %2089 = vst.msk [vmem:[#allocation5 + $0x8] sm:$0x38] %vm2049_vm1, %v2087_v15  ;;  %2537 = vmatpush.bf16.msrb.mxu2 %v6071_v44  ;;  %2529 = vmatpush.bf16.msra.mxu3 %v6057_v46  ;;  %v6065_v31 = vld [vmem:[%s8592_s6 + $0x80] sm:$0xff]  ;;  %v6102_v8 = vld [vmem:[%s8545_s10 + $0x78] sm:$0xff]  ;;  %v2645_v11 = vunpack.c.l.b16 %v2636_v7 }
 0x2a9   : > { %2166 = vrot.lane.b32.xlu0 %v2164_v58, %s8566_s23  ;;  %v2194_v55 = vrot.slane %v2192_v17, 2  ;;  %2152 = vst.msk [vmem:[#allocation5 + $0x18] sm:$0x7] %vm2043_vm14, %v2151_v24  ;;  %v6073_v63 = vld [vmem:[%s8592_s6 + $0xc0] sm:$0xff]  ;;  %v6083_v10 = vld [vmem:[%s8592_s6 + $0x110] sm:$0xff]  ;;  %2841 = vmatpush.bf16.msrb.mxu1 %v6102_v8  ;;  %v6082_v18 = vld [vmem:[%s8592_s6 + $0x108] sm:$0xff] }
 0x2aa   : > { %2123 = vst.msk [vmem:[#allocation5 + $0x10] sm:$0x38] %vm2049_vm1, %v2121_v25  ;;  %v2649_v15 = vpack.c.b16 %v2645_v11, %v2645_v11  ;;  %v5101_v16 = vld [vmem:[%s8543_s8] sm:$0xf]  ;;  %v6086_v17 = vld [vmem:[%s8543_s8 + $0x4] sm:$0xf0] }
 0x2ab   : > { %2146 = vrot.lane.b32.xlu2 %v2145_v19, %s8566_s23  ;;  %2139 = vrot.lane.b32.xlu1 %v2138_v21, %s8566_s23  ;;  %2196 = vst.msk [vmem:[#allocation5 + $0x20] sm:$0xc0] %vm2055_vm5, %v2194_v55  ;;  %v2646_v21 = vunpack.c.h.b16 %v2636_v7  ;;  %v6081_v24 = vld [vmem:[%s8592_s6 + $0x100] sm:$0xff]  ;;  %v6098_v41 = vld [vmem:[%s8545_s10 + $0x58] sm:$0xff] }
 0x2ac   : > { %2197 = vst.msk [vmem:[#allocation5 + $0x48] sm:$0x1] %vm2040_vm6, %v2194_v55  ;;  %2538 = vmatpush.bf16.msrb.mxu2 %v6070_v47  ;;  %2550 = vmatpush.bf16.msrb.mxu3 %v6080_v49  ;;  %v2664_v19 = vsel %vm2662_vm13, %v2649_v15, 0  ;;  %v5102_v55 = vor.u32 %v6086_v17, %v5101_v16  ;;  %v6099_v39 = vld [vmem:[%s8545_s10 + $0x60] sm:$0xff]  ;;  %v6097_v47 = vld [vmem:[%s8545_s10 + $0x50] sm:$0xff]  ;;  %v6094_v49 = vld [vmem:[%s8545_s10 + $0x38] sm:$0xff] }
 0x2ad   : > { %2157 = vst.msk [vmem:[#allocation5 + $0x18] sm:$0x38] %vm2049_vm1, %v2155_v26  ;;  %v2650_v25 = vpack.c.b16 %v2646_v21, %v2646_v21  ;;  %2842 = vmatpush.bf16.msrb.mxu1 %v6101_v34  ;;  %v2633_v46 = vld [vmem:[%s667_s30] sm:$0x1]  ;;  %v6110_v34 = vld [vmem:[%s8547_s12 + $0x38] sm:$0xff]  ;;  %vm8602_vm1 = vmmov %vm8593_vm2 }
 0x2ae   : > { %vm8603_vm2 = vmmov %vm8602_vm1 }
 0x2af   : > { %vm8604_vm5 = vmmov %vm8602_vm1 }
 0x2b0   : > { %2539 = vmatpush.bf16.msrb.mxu2 %v6069_v50  ;;  %2551 = vmatpush.bf16.msrb.mxu3 %v6079_v48  ;;  %v6093_v50 = vld [vmem:[%s8545_s10 + $0x30] sm:$0xff]  ;;  %v6092_v48 = vld [vmem:[%s8545_s10 + $0x28] sm:$0xff]  ;;  %vm8605_vm6 = vmmov %vm8602_vm1 }
 0x2b1   : > { %2843 = vmatpush.bf16.msrb.mxu1 %v6100_v36 }
 0x2b2   : > { %v2202_v42 = vld [vmem:[#allocation5 + $0x20] sm:$0xff] }
 0x2b3   : > { %2180 = vrot.lane.b32.xlu2 %v2179_v29, %s8566_s23  ;;  %2173 = vrot.lane.b32.xlu1 %v2172_v30, %s8566_s23  ;;  %v2667_v30 = vsel %vm2662_vm13, %v2650_v25, 0  ;;  %v2207_v43 = vld [vmem:[#allocation5 + $0x48] sm:$0x1]  ;;  %s8609_s23 = sld [smem:[#allocation23_spill]] }
 0x2b4   : > { %2540 = vmatpush.bf16.msrb.mxu2 %v6068_v52  ;;  %2552 = vmatpush.bf16.msrb.mxu3 %v6078_v53  ;;  %v2212_v44 = vpack.c.bf16 %v2207_v43, %v2202_v42  ;;  %v6090_v53 = vld [vmem:[%s8545_s10 + $0x18] sm:$0xff]  ;;  %v6105_v43 = vld [vmem:[%s8547_s12 + $0x10] sm:$0xff] }
 0x2b5   : > { %2844 = vmatpush.bf16.msrb.mxu1 %v6099_v39  ;;  %v6108_v39 = vld [vmem:[%s8547_s12 + $0x28] sm:$0xff]  ;;  %v6106_v42 = vld [vmem:[%s8547_s12 + $0x18] sm:$0xff] }
 0x2b8   : > { %2541 = vmatpush.bf16.msrb.mxu2 %v6067_v54  ;;  %2553 = vmatpush.bf16.msrb.mxu3 %v6077_v20  ;;  %v6096_v54 = vld [vmem:[%s8545_s10 + $0x48] sm:$0xff] }
 0x2b9   : > { %2845 = vmatpush.bf16.msrb.mxu1 %v6098_v41  ;;  %v6107_v41 = vld [vmem:[%s8547_s12 + $0x20] sm:$0xff] }
 0x2bc   : > { %2542 = vmatpush.bf16.msrb.mxu2 %v6066_v59  ;;  %2554 = vmatpush.bf16.msrb.mxu3 %v6076_v22  ;;  %v6088_v22 = vld [vmem:[%s8545_s10 + $0x8] sm:$0xff] }
 0x2bd   : > { %2846 = vmatpush.bf16.msrb.mxu1 %v6097_v47  ;;  %v5257_v47 = vld [vmem:[%s8550_s15 + $0x70] sm:$0xf0] }
 0x2c0   : > { %2543 = vmatpush.bf16.msrb.mxu2 %v6065_v31  ;;  %2555 = vmatpush.bf16.msrb.mxu3 %v6075_v23  ;;  %v6087_v31 = vld [vmem:[%s8545_s10] sm:$0xff] }
 0x2c1   : > { %2847 = vmatpush.bf16.msrb.mxu1 %v6096_v54 }
 0x2c4   : > { %2556 = vmatpush.bf16.msrb.mxu3 %v6074_v61  ;;  %v6095_v61 = vld [vmem:[%s8545_s10 + $0x40] sm:$0xff] }
 0x2c5   : > { %2848 = vmatpush.bf16.msrb.mxu1 %v6095_v61  ;;  %v6270_v61 = vld [vmem:[%s8550_s15 + $0x74] sm:$0xf0] }
 0x2c8   : > { %2557 = vmatpush.bf16.msrb.mxu3 %v6073_v63 }
 0x2f5   : > { %v2077_v51 = vpop.permute.xlu2 %2076 }
 0x2f6   : > { %2080 = vst.msk [vmem:[#allocation5] sm:$0xc0] %vm2079_vm9, %v2077_v51 }
 0x2f7   : > { %2082 = vst.msk [vmem:[#allocation5 + $0x28] sm:$0x1] %vm2081_vm10, %v2077_v51  ;;  %v6091_v51 = vld [vmem:[%s8545_s10 + $0x20] sm:$0xff] }
 0x2fd   : > { %v2113_v57 = vpop.permute.xlu2 %2112 }
 0x2fe   : > { %2115 = vst.msk [vmem:[#allocation5 + $0x8] sm:$0xc0] %vm2079_vm9, %v2113_v57  ;;  %v2203_v5 = vld [vmem:[#allocation5 + $0x28] sm:$0x1] }
 0x2ff   : > { %2116 = vst.msk [vmem:[#allocation5 + $0x30] sm:$0x1] %vm2081_vm10, %v2113_v57  ;;  %v6089_v57 = vld [vmem:[%s8545_s10 + $0x10] sm:$0xff] }
 0x303   : > { %v2061_v3 = vpop.permute.xlu0 %2060 }
 0x304   : > { %2064 = vst.msk [vmem:[#allocation5] sm:$0x7] %vm2063_vm11, %v2061_v3 }
 0x305   : > { %v2147_v60 = vpop.permute.xlu2 %2146 }
 0x306   : > { %2149 = vst.msk [vmem:[#allocation5 + $0x10] sm:$0xc0] %vm2079_vm9, %v2147_v60  ;;  %v2204_v14 = vld [vmem:[#allocation5 + $0x30] sm:$0x1] }
 0x307   : > { %2150 = vst.msk [vmem:[#allocation5 + $0x38] sm:$0x1] %vm2081_vm10, %v2147_v60  ;;  %v6349_v60 = vld [vmem:[%s8542_s7] ss:$0 sm:$0xff] }
 0x30b   : > { %v2099_v62 = vpop.permute.xlu0 %2098 }
 0x30c   : > { %2101 = vst.msk [vmem:[#allocation5 + $0x8] sm:$0x7] %vm2063_vm11, %v2099_v62 }
 0x30d   : > { %v2181_v0 = vpop.permute.xlu2 %2180  ;;  %v2069_v1 = vpop.permute.xlu1 %2068 }
 0x30e   : > { %2183 = vst.msk [vmem:[#allocation5 + $0x18] sm:$0xc0] %vm2079_vm9, %v2181_v0  ;;  %v2205_v28 = vld [vmem:[#allocation5 + $0x38] sm:$0x1]  ;;  %vm8606_vm9 = vmmov %vm8602_vm1 }
 0x30f   : > { %2184 = vst.msk [vmem:[#allocation5 + $0x40] sm:$0x1] %vm2081_vm10, %v2181_v0  ;;  %vm8607_vm10 = vmmov %vm8602_vm1 }
 0x310   : > { %2072 = vst.msk [vmem:[#allocation5] sm:$0x38] %vm2071_vm12, %v2069_v1 }
 0x313   : > { %v2133_v45 = vpop.permute.xlu0 %2132 }
 0x314   : > { %2135 = vst.msk [vmem:[#allocation5 + $0x10] sm:$0x7] %vm2063_vm11, %v2133_v45 }
 0x315   : > { %v2106_v2 = vpop.permute.xlu1 %2105 }
 0x316   : > { %2108 = vst.msk [vmem:[#allocation5 + $0x8] sm:$0x38] %vm2071_vm12, %v2106_v2  ;;  %v2206_v38 = vld [vmem:[#allocation5 + $0x40] sm:$0x1] }
 0x317   : > { %v2198_v4 = vld [vmem:[#allocation5] sm:$0xff] }
 0x318   : > { %v2208_v56 = vpack.c.bf16 %v2203_v5, %v2198_v4  ;;  %v2580_v5 = vlaneseq }
 0x31a   : > { %2516 = vmatmul.bf16.vlgmr.msra.gmra.mxu2 %v2208_v56  ;;  %v2637_v56 = vld [vmem:[%s8544_s9] sm:$0x3]  ;;  %vm7310_vm7 = vcmp.lt.s32.totalorder %v2580_v5, 64  ;;  %vm2592_vm8 = vcmp.ge.s32.totalorder %v2580_v5, 64  ;;  %vm2593_vm0 = vcmp.lt.s32.totalorder %v2580_v5, 128 }
 0x31b   : > { %v2167_v9 = vpop.permute.xlu0 %2166  ;;  %2568 = vmatpush.bf16.msra.mxu2 %v6084_v6  ;;  %vm7360_vm14 = vmand %vm2592_vm8, %vm2593_vm0  ;;  %v6269_v5 = vld [vmem:[%s8550_s15 + $0x6c] sm:$0xf0] }
 0x31c   : > { %2169 = vst.msk [vmem:[#allocation5 + $0x18] sm:$0x7] %vm2063_vm11, %v2167_v9  ;;  %vm8608_vm11 = vmmov %vm8602_vm1 }
 0x31d   : > { %v2140_v12 = vpop.permute.xlu1 %2139  ;;  %v2199_v13 = vld [vmem:[#allocation5 + $0x8] sm:$0xff] }
 0x31e   : > { %2142 = vst.msk [vmem:[#allocation5 + $0x10] sm:$0x38] %vm2071_vm12, %v2140_v12  ;;  %v2209_v58 = vpack.c.bf16 %v2204_v14, %v2199_v13  ;;  %v2654_v12 = vperm.slane %v2637_v56, 0 }
 0x31f   : > { %2569 = vmatpush.bf16.msra.mxu2 %v6083_v10 }
 0x320   : > { %2530 = vmatmul.bf16.vlgmr.msra.gmra.mxu3 %v2209_v58 }
 0x321   : > { %2675 = vmatpush.bf16.msra.mxu3 %v2664_v19 }
 0x323   : > { %2570 = vmatpush.bf16.msra.mxu2 %v6082_v18 }
 0x325   : > { %v2174_v26 = vpop.permute.xlu1 %2173  ;;  %v2200_v27 = vld [vmem:[#allocation5 + $0x10] sm:$0xff]  ;;  %2676 = vmatpush.bf16.msra.mxu3 %v5102_v55 }
 0x326   : > { %2176 = vst.msk [vmem:[#allocation5 + $0x18] sm:$0x38] %vm2071_vm12, %v2174_v26  ;;  %v2210_v29 = vpack.c.bf16 %v2205_v28, %v2200_v27  ;;  %vm4562_vm12 = vcmask 57344  }
 0x327   : > { %2571 = vmatpush.bf16.msra.mxu2 %v6081_v24  ;;  %v2655_v24 = vperm.slane %v2637_v56, 1 }
 0x32a   : > { %2544 = vmatmul.bf16.vlgmr.msrb.gmra.mxu2 %v2210_v29 }
 0x32b   : > { %2688 = vmatpush.bf16.msrb.mxu2 %v2667_v30 }
 0x32d   : > { %v2201_v37 = vld [vmem:[#allocation5 + $0x18] sm:$0xff] }
 0x32e   : > { %v2211_v40 = vpack.c.bf16 %v2206_v38, %v2201_v37 }
 0x32f   : > { %2689 = vmatpush.bf16.msrb.mxu2 %v5106_v35 }
 0x330   : > { %2558 = vmatmul.bf16.vlgmr.msrb.gmra.mxu3 %v2211_v40  ;;  %v6109_v40 = vld [vmem:[%s8547_s12 + $0x30] sm:$0xff] }
 0x331   : > { %2828 = vmatpush.bf16.msrb.mxu3 %v6094_v49 }
 0x335   : > { %2829 = vmatpush.bf16.msrb.mxu3 %v6093_v50  ;;  %v6103_v50 = vld [vmem:[%s8547_s12] sm:$0xff] }
 0x339   : > { %2830 = vmatpush.bf16.msrb.mxu3 %v6092_v48  ;;  %v5419_v48 = vld [vmem:[%s8549_s14 + $0x120] sm:$0xf] }
 0x33a   : > { %5098 = vmatmul.msk.bf16.vlgmr.msra.gmra.mxu2 %vm8594_vm3, %v2212_v44  ;;  %v6104_v44 = vld [vmem:[%s8547_s12 + $0x8] sm:$0xff] }
 0x33b   : > { %2921 = vmatpush.bf16.msra.mxu2 %v6110_v34  ;;  %v6256_v34 = vld [vmem:[%s8550_s15 + $0xc] sm:$0xf] }
 0x33d   : > { %2831 = vmatpush.bf16.msrb.mxu3 %v6091_v51 }
 0x33f   : > { %2922 = vmatpush.bf16.msra.mxu2 %v6109_v40  ;;  %v5643_v40 = vld [vmem:[%s8549_s14 + $0x2e0] sm:$0xf] }
 0x340   : > { %5107 = vmatmul.msk.bf16.vlgmr.msra.gmra.mxu3 %vm2658_vm4, %v2633_v46 }
 0x341   : > { %2832 = vmatpush.bf16.msrb.mxu3 %v6090_v53  ;;  %v2731_v53 = vld [vmem:[%s8546_s11] sm:$0x1] }
 0x343   : > { %2923 = vmatpush.bf16.msra.mxu2 %v6108_v39 }
 0x345   : > { %2833 = vmatpush.bf16.msrb.mxu3 %v6089_v57 }
 0x347   : > { %2924 = vmatpush.bf16.msra.mxu2 %v6107_v41 }
 0x349   : > { %2834 = vmatpush.bf16.msrb.mxu3 %v6088_v22  ;;  %v5241_v22 = vld [vmem:[%s8550_s15 + $0x50] sm:$0xf0] }
 0x34a   : > { %5108 = vmatmul.msk.bf16.vlgmr.msrb.gmra.mxu2 %vm2658_vm4, %v2633_v46  ;;  %v6267_v46 = vld [vmem:[%s8550_s15 + $0x64] sm:$0xf] }
 0x34b   : > { %2925 = vmatpush.bf16.msra.mxu2 %v6106_v42  ;;  %v5260_v49 = vor.u32 %v6267_v46, %v5257_v47  ;;  %v6205_v42 = vld [vmem:[%s8549_s14 + $0x2ec] sm:$0xf0]  ;;  %v5207_v46 = vld [vmem:[%s8550_s15] sm:$0xf] }
 0x34c   : > { %v6257_v47 = vld [vmem:[%s8550_s15 + $0xc] sm:$0xf0] }
 0x34d   : > { %2835 = vmatpush.bf16.msrb.mxu3 %v6087_v31  ;;  %3213 = vmatpush.bf16.msrb.mxu0 %v5260_v49  ;;  %v6259_v31 = vld [vmem:[%s8550_s15 + $0x24] sm:$0xf]  ;;  %v5387_v49 = vld [vmem:[%s8549_s14 + $0xe0] sm:$0xf] }
 0x34f   : > { %2926 = vmatpush.bf16.msra.mxu2 %v6105_v43  ;;  %v5771_v43 = vld [vmem:[%s8549_s14 + $0x3e0] sm:$0xf] }
 0x353   : > { %2927 = vmatpush.bf16.msra.mxu2 %v6104_v44  ;;  %v6237_v44 = vld [vmem:[%s8549_s14 + $0x3ec] sm:$0xf0] }
 0x357   : > { %2928 = vmatpush.bf16.msra.mxu2 %v6103_v50 }
 0x39d   : > { %v2517_v52 = vpop.f32.mrf.mxu2 }
 0x39e   : > { %v2518_v0 = vadd.f32 %v6349_v60, %v2517_v52 }
 0x3a3   : > { %v2531_v20 = vpop.f32.mrf.mxu3 }
 0x3a4   : > { %v2532_v1 = vadd.f32 %v2531_v20, %v2518_v0 }
 0x3a5   : > { %v2519_v59 = vpop.f32.mrf.mxu2 }
 0x3a6   : > { %v2520_v7 = vadd.f32 %v6349_v60, %v2519_v59  ;;  %v6263_v59 = vld [vmem:[%s8550_s15 + $0x44] sm:$0xf]  ;;  %v5263_v60 = vld [vmem:[%s8550_s15 + $0x68] sm:$0xf] }
 0x3ab   : > { %v2533_v3 = vpop.f32.mrf.mxu3 }
 0x3ac   : > { %v2534_v9 = vadd.f32 %v2533_v3, %v2520_v7  ;;  %v5244_v3 = vor.u32 %v6263_v59, %v5241_v22  ;;  %v5627_v59 = vld [vmem:[%s8549_s14 + $0x2c0] sm:$0xf]  ;;  %v5208_v22 = vor.u32 %v6257_v47, %v5207_v46  ;;  %v6217_v47 = vld [vmem:[%s8549_s14 + $0x34c] sm:$0xf0] }
 0x3ad   : > { %v2545_v23 = vpop.f32.mrf.mxu2  ;;  %v5691_v46 = vld [vmem:[%s8549_s14 + $0x340] sm:$0xf] }
 0x3ae   : > { %v2546_v45 = vadd.f32 %v2545_v23, %v2532_v1  ;;  %v5225_v23 = vld [vmem:[%s8550_s15 + $0x30] sm:$0xf0]  ;;  %3214 = vmatpush.bf16.msrb.mxu0 %v5244_v3 }
 0x3af   : > { %v5228_v1 = vor.u32 %v6259_v31, %v5225_v23  ;;  %v6201_v31 = vld [vmem:[%s8549_s14 + $0x2cc] sm:$0xf0]  ;;  %v5755_v23 = vld [vmem:[%s8549_s14 + $0x3c0] sm:$0xf] }
 0x3b2   : > { %3215 = vmatpush.bf16.msrb.mxu0 %v5228_v1  ;;  %v6137_v1 = vld [vmem:[%s8549_s14 + $0xcc] sm:$0xf0] }
 0x3b3   : > { %v2559_v62 = vpop.f32.mrf.mxu3 }
 0x3b4   : > { %v2560_v4 = vadd.f32 %v2559_v62, %v2546_v45  ;;  %v6268_v62 = vld [vmem:[%s8550_s15 + $0x6c] sm:$0xf]  ;;  %v5264_v45 = vor.u32 %v6270_v61, %v5263_v60  ;;  %v6233_v60 = vld [vmem:[%s8549_s14 + $0x3cc] sm:$0xf0] }
 0x3b5   : > { %v2547_v63 = vpop.f32.mrf.mxu2 }
 0x3b6   : > { %v2548_v13 = vadd.f32 %v2547_v63, %v2534_v9  ;;  %v5265_v63 = vld [vmem:[%s8550_s15 + $0x78] sm:$0xf0]  ;;  %v6264_v9 = vld [vmem:[%s8550_s15 + $0x4c] sm:$0xf]  ;;  %3226 = vmatpush.bf16.msra.mxu1 %v5264_v45  ;;  %v5628_v45 = vor.u32 %v6201_v31, %v5627_v59  ;;  %v6181_v59 = vld [vmem:[%s8549_s14 + $0x22c] sm:$0xf0] }
 0x3b7   : > { %v5675_v31 = vld [vmem:[%s8549_s14 + $0x320] sm:$0xf] }
 0x3bb   : > { %v2561_v2 = vpop.f32.mrf.mxu3 }
 0x3bc   : > { %v2562_v15 = vadd.f32 %v2561_v2, %v2548_v13  ;;  %v5268_v2 = vor.u32 %v6268_v62, %v5265_v63  ;;  %v5239_v13 = vld [vmem:[%s8550_s15 + $0x40] sm:$0xf]  ;;  %v6165_v63 = vld [vmem:[%s8549_s14 + $0x1ac] sm:$0xf0] }
 0x3bd   : > { %v2573_v6 = vpop.f32.mrf.mxu2  ;;  %v5483_v62 = vld [vmem:[%s8549_s14 + $0x1a0] sm:$0xf] }
 0x3be   : > { %v2574_v8 = vadd.f32 %v2573_v6, %v2560_v4  ;;  %v5255_v4 = vld [vmem:[%s8550_s15 + $0x60] sm:$0xf]  ;;  %v5247_v6 = vld [vmem:[%s8550_s15 + $0x48] sm:$0xf]  ;;  %3239 = vmatpush.bf16.msrb.mxu2 %v5268_v2  ;;  %v5756_v2 = vor.u32 %v6233_v60, %v5755_v23  ;;  %v6213_v23 = vld [vmem:[%s8549_s14 + $0x32c] sm:$0xf0] }
 0x3bf   : > { %v5256_v7 = vor.u32 %v6269_v5, %v5255_v4  ;;  %v5611_v4 = vld [vmem:[%s8549_s14 + $0x2a0] sm:$0xf]  ;;  %v5484_v5 = vor.u32 %v6165_v63, %v5483_v62  ;;  %v6117_v62 = vld [vmem:[%s8549_s14 + $0x2c] sm:$0xf0] }
 0x3c0   : > { %v2578_v10 = vmax.f32 %v2574_v8, 0.0  ;;  %v6266_v8 = vld [vmem:[%s8550_s15 + $0x54] sm:$0xf0]  ;;  %v5291_v60 = vld [vmem:[%s8549_s14 + $0x20] sm:$0xf] }
 0x3c1   : > { %v5248_v11 = vor.u32 %v6266_v8, %v5247_v6  ;;  %3200 = vmatpush.bf16.msra.mxu3 %v5256_v7  ;;  %v6197_v6 = vld [vmem:[%s8549_s14 + $0x2ac] sm:$0xf0]  ;;  %v5403_v63 = vld [vmem:[%s8549_s14 + $0x100] sm:$0xf] }
 0x3c2   : > { %2586 = vst [vmem:[#allocation1] sm:$0xff] %v2578_v10  ;;  %v6229_v7 = vld [vmem:[%s8549_s14 + $0x3ac] sm:$0xf0] }
 0x3c3   : > { %2584 = vst.msk [vmem:[#allocation6] sm:$0x1] %vm7310_vm7, %v2578_v10  ;;  %v2678_v14 = vpop.f32.mrf.mxu3  ;;  %3227 = vmatpush.bf16.msra.mxu1 %v5248_v11  ;;  %v5355_v11 = vld [vmem:[%s8549_s14 + $0xa0] sm:$0xf] }
 0x3c4   : > { %v2679_v58 = vadd.f32 %v2678_v14, %v2654_v12  ;;  %v6265_v14 = vld [vmem:[%s8550_s15 + $0x4c] sm:$0xf0] }
 0x3c5   : > { %v2575_v16 = vpop.f32.mrf.mxu2 }
 0x3c6   : > { %v2576_v17 = vadd.f32 %v2575_v16, %v2562_v15  ;;  %v2695_v18 = vmax.f32 %v2679_v58, 0.0  ;;  %v5231_v15 = vld [vmem:[%s8550_s15 + $0x28] sm:$0xf]  ;;  %v5240_v16 = vor.u32 %v6265_v14, %v5239_v13  ;;  %v5612_v13 = vor.u32 %v6197_v6, %v5611_v4  ;;  %v6177_v4 = vld [vmem:[%s8549_s14 + $0x20c] sm:$0xf0] }
 0x3c8   : > { %v2579_v19 = vmax.f32 %v2576_v17, 0.0  ;;  %v2697_v21 = vpack.c.bf16 %v2695_v18, %v2695_v18  ;;  %v6262_v17 = vld [vmem:[%s8550_s15 + $0x34] sm:$0xf0]  ;;  %v6260_v18 = vld [vmem:[%s8550_s15 + $0x2c] sm:$0xf]  ;;  %3201 = vmatpush.bf16.msra.mxu3 %v5240_v16 }
 0x3c9   : > { %v2588_v55 = vld [vmem:[#allocation1 + $0x1] ss:$9 sm:$0xff] }
 0x3ca   : > { %2632 = vst.msk [vmem:[#allocation6 + $0x4] sm:$0x1] %vm7310_vm7, %v2579_v19  ;;  %2589 = vrot.lane.b32.xlu0 %v2588_v55, %s8598_s1  ;;  %2836 = vmatmul.bf16.vlgmr.msrb.gmra.mxu3 %v2697_v21  ;;  %v5233_v21 = vld [vmem:[%s8550_s15 + $0x38] sm:$0xf0]  ;;  %v5223_v55 = vld [vmem:[%s8550_s15 + $0x20] sm:$0xf] }
 0x3cb   : > { %2596 = vst [vmem:[#allocation1] sm:$0xff] %v2578_v10  ;;  %v2680_v25 = vpop.f32.mrf.mxu3  ;;  %v6193_v16 = vld [vmem:[%s8549_s14 + $0x28c] sm:$0xf0] }
 0x3cd   : > { %v2691_v26 = vpop.f32.mrf.mxu2 }
 0x3ce   : > { %v2692_v27 = vadd.f32 %v2691_v26, %v2655_v24  ;;  %v6261_v24 = vld [vmem:[%s8550_s15 + $0x2c] sm:$0xf0]  ;;  %v6255_v26 = vld [vmem:[%s8550_s15 + $0x4] sm:$0xf] }
 0x3d0   : > { %v2696_v28 = vmax.f32 %v2692_v27, 0.0  ;;  %v5209_v27 = vld [vmem:[%s8550_s15 + $0x10] sm:$0xf0] }
 0x3d2   : > { %v2698_v29 = vpack.c.bf16 %v2696_v28, %v2696_v28  ;;  %v2598_v30 = vld [vmem:[#allocation1 + $0x2] ss:$9 sm:$0xff] }
 0x3d3   : > { %2601 = vst [vmem:[#allocation1] sm:$0xff] %v2578_v10  ;;  %v5215_v28 = vld [vmem:[%s8550_s15 + $0x8] sm:$0xf] }
 0x3d4   : > { %2849 = vmatmul.bf16.vlgmr.msrb.gmra.mxu1 %v2698_v29  ;;  %2600 = vst.msk [vmem:[#allocation6 + $0x1] sm:$0x1] %vm7310_vm7, %v2598_v30  ;;  %v5232_v29 = vor.u32 %v6262_v17, %v5231_v15  ;;  %v5236_v30 = vor.u32 %v6260_v18, %v5233_v21  ;;  %v5595_v15 = vld [vmem:[%s8549_s14 + $0x280] sm:$0xf]  ;;  %v6225_v18 = vld [vmem:[%s8549_s14 + $0x38c] sm:$0xf0] }
 0x3d5   : > { %v2693_v32 = vpop.f32.mrf.mxu2  ;;  %v5723_v17 = vld [vmem:[%s8549_s14 + $0x380] sm:$0xf] }
 0x3d6   : > { %v5212_v32 = vor.u32 %v6255_v26, %v5209_v27  ;;  %3228 = vmatpush.bf16.msra.mxu1 %v5232_v29  ;;  %v5451_v21 = vld [vmem:[%s8549_s14 + $0x160] sm:$0xf]  ;;  %v5596_v26 = vor.u32 %v6193_v16, %v5595_v15  ;;  %v5724_v27 = vor.u32 %v6225_v18, %v5723_v17  ;;  %v5389_v15 = vld [vmem:[%s8549_s14 + $0xf0] sm:$0xf0]  ;;  %v6203_v17 = vld [vmem:[%s8549_s14 + $0x2e4] sm:$0xf] }
 0x3d7   : > { %v5517_v16 = vld [vmem:[%s8549_s14 + $0x1f0] sm:$0xf0] }
 0x3d8   : > { %3216 = vmatpush.bf16.msrb.mxu0 %v5212_v32  ;;  %v5707_v32 = vld [vmem:[%s8549_s14 + $0x360] sm:$0xf]  ;;  %v5645_v18 = vld [vmem:[%s8549_s14 + $0x2f0] sm:$0xf0] }
 0x3da   : > { %v2603_v33 = vld [vmem:[#allocation1 + $0x3] ss:$9 sm:$0xff] }
 0x3db   : > { %2604 = vrot.lane.b32.xlu1 %v2603_v33, %s8598_s1  ;;  %2608 = vst [vmem:[#allocation1] sm:$0xff] %v2578_v10  ;;  %v6258_v33 = vld [vmem:[%s8550_s15 + $0x14] sm:$0xf0] }
 0x3dc   : > { %v5216_v50 = vor.u32 %v6258_v33, %v5215_v28  ;;  %v5579_v28 = vld [vmem:[%s8549_s14 + $0x260] sm:$0xf]  ;;  %v6221_v33 = vld [vmem:[%s8549_s14 + $0x36c] sm:$0xf0] }
 0x3de   : > { %3229 = vmatpush.bf16.msra.mxu1 %v5216_v50 }
 0x3e2   : > { %v2610_v35 = vld [vmem:[#allocation1 + $0x4] ss:$9 sm:$0xff] }
 0x3e3   : > { %2613 = vst [vmem:[#allocation1] sm:$0xff] %v2578_v10 }
 0x3e4   : > { %2612 = vst.msk [vmem:[#allocation6 + $0x2] sm:$0x1] %vm7310_vm7, %v2610_v35  ;;  %v5217_v35 = vld [vmem:[%s8550_s15 + $0x18] sm:$0xf0] }
 0x3ea   : > { %v2615_v36 = vld [vmem:[#allocation1 + $0x5] ss:$9 sm:$0xff] }
 0x3eb   : > { %2616 = vrot.lane.b32.xlu2 %v2615_v36, %s8598_s1  ;;  %2620 = vst [vmem:[#allocation1] sm:$0xff] %v2578_v10  ;;  %v5224_v36 = vor.u32 %v6261_v24, %v5223_v55  ;;  %v6157_v55 = vld [vmem:[%s8549_s14 + $0x16c] sm:$0xf0]  ;;  %v5339_v24 = vld [vmem:[%s8549_s14 + $0x80] sm:$0xf] }
 0x3ec   : > { %v5452_v29 = vor.u32 %v6157_v55, %v5451_v21  ;;  %v5835_v21 = vld [vmem:[%s8549_s14 + $0x460] sm:$0xf]  ;;  %v6253_v55 = vld [vmem:[%s8549_s14 + $0x46c] sm:$0xf0] }
 0x3ed   : > { %3202 = vmatpush.bf16.msra.mxu3 %v5224_v36  ;;  %v6153_v36 = vld [vmem:[%s8549_s14 + $0x14c] sm:$0xf0] }
 0x3f1   : > { %3203 = vmatpush.bf16.msra.mxu3 %v5208_v22 }
 0x3f2   : > { %v2622_v37 = vld [vmem:[#allocation1 + $0x6] ss:$9 sm:$0xff] }
 0x3f3   : > { %2625 = vst [vmem:[#allocation1] sm:$0xff] %v2578_v10  ;;  %v5249_v10 = vld [vmem:[%s8550_s15 + $0x58] sm:$0xf0] }
 0x3f4   : > { %2624 = vst.msk [vmem:[#allocation6 + $0x3] sm:$0x1] %vm7310_vm7, %v2622_v37  ;;  %v5252_v12 = vor.u32 %v6264_v9, %v5249_v10  ;;  %v5515_v37 = vld [vmem:[%s8549_s14 + $0x1e0] sm:$0xf]  ;;  %v6161_v10 = vld [vmem:[%s8549_s14 + $0x18c] sm:$0xf0] }
 0x3f5   : > { %v5467_v9 = vld [vmem:[%s8549_s14 + $0x180] sm:$0xf] }
 0x3f6   : > { %3240 = vmatpush.bf16.msrb.mxu2 %v5252_v12  ;;  %v6133_v12 = vld [vmem:[%s8549_s14 + $0xac] sm:$0xf0] }
 0x3fa   : > { %v2627_v38 = vld [vmem:[#allocation1 + $0x7] ss:$9 sm:$0xff]  ;;  %3241 = vmatpush.bf16.msrb.mxu2 %v5236_v30 }
 0x3fb   : > { %2628 = vrot.lane.b32.xlu0 %v2627_v38, %s8598_s1  ;;  %v6173_v38 = vld [vmem:[%s8549_s14 + $0x1ec] sm:$0xf0]  ;;  %s6368_s1 = sshra.s32 %s4611_s2, 4  ;;  %s6369_s1 = int_to_ptr.hbm [resolvable:$true] %s6368_s1 }
 0x3fc   : > { %v5516_v41 = vor.u32 %v6173_v38, %v5515_v37  ;;  %v6189_v30 = vld [vmem:[%s8549_s14 + $0x26c] sm:$0xf0]  ;;  %v5323_v37 = vld [vmem:[%s8549_s14 + $0x60] sm:$0xf]  ;;  %s6370_s27 = scalar_lea.hbm %s6369_s1, 1  ;;  %p6375_p0 = scmp.lt.s32.totalorder %s6369_s1, %s8556_s21 }
 0x3fd   : > { %v6125_v38 = vld [vmem:[%s8549_s14 + $0x6c] sm:$0xf0]  ;;  %p6371_p11 = scmp.ne.s32.totalorder %s6369_s1, %s6370_s27  ;;  %p6376_p1 = scmp.lt.s32.totalorder %s6374_s20, %s6370_s27 }
 0x3fe   : > { %3984 = vmatpush.bf16.msra.mxu0 %v5516_v41  ;;  %v5563_v41 = vld [vmem:[%s8549_s14 + $0x240] sm:$0xf] }
 0x3ff   : > { %p6372_p12 = pnand %p6371_p11, %p6570_p5  ;;  %p6377_p2 = por %p6376_p1, %p6375_p0 }
 0x401   : > { %p6373_p13 = pneg %p6372_p12 }
 0x403   : > { %p6378_p3 = pnand %p6377_p2, %p6373_p13 }
 0x43c   : > { %v2590_v51 = vpop.permute.xlu0 %2589 }
 0x43d   : > { %2595 = vst.msk [vmem:[#allocation6] sm:$0x1] %vm7360_vm14, %v2590_v51  ;;  %v5220_v51 = vor.u32 %v6256_v34, %v5217_v35  ;;  %v5435_v35 = vld [vmem:[%s8549_s14 + $0x140] sm:$0xf] }
 0x43f   : > { %3242 = vmatpush.bf16.msrb.mxu2 %v5220_v51  ;;  %v5692_v51 = vor.u32 %v6217_v47, %v5691_v46  ;;  %v6163_v46 = vld [vmem:[%s8549_s14 + $0x1a4] sm:$0xf]  ;;  %v5485_v47 = vld [vmem:[%s8549_s14 + $0x1b0] sm:$0xf0] }
 0x445   : > { %v2617_v52 = vpop.permute.xlu2 %2616 }
 0x446   : > { %2619 = vst.msk [vmem:[#allocation6 + $0x2] sm:$0x1] %vm7360_vm14, %v2617_v52  ;;  %v6141_v52 = vld [vmem:[%s8549_s14 + $0xec] sm:$0xf0] }
 0x447   : > { %v5388_v61 = vor.u32 %v6141_v52, %v5387_v49  ;;  %v5324_v49 = vor.u32 %v6125_v38, %v5323_v37  ;;  %v5307_v52 = vld [vmem:[%s8549_s14 + $0x40] sm:$0xf]  ;;  %v6249_v37 = vld [vmem:[%s8549_s14 + $0x44c] sm:$0xf0] }
 0x449   : > { %3971 = vmatpush.bf16.msrb.mxu3 %v5388_v61  ;;  %v5676_v61 = vor.u32 %v6213_v23, %v5675_v31  ;;  %v5469_v31 = vld [vmem:[%s8549_s14 + $0x190] sm:$0xf0]  ;;  %v6191_v23 = vld [vmem:[%s8549_s14 + $0x284] sm:$0xf] }
 0x44d   : > { %v2605_v54 = vpop.permute.xlu1 %2604  ;;  %v2837_v20 = vpop.f32.mrf.mxu3 }
 0x44e   : > { %2607 = vst.msk [vmem:[#allocation6 + $0x1] sm:$0x1] %vm7360_vm14, %v2605_v54  ;;  %v2838_v57 = vadd.f32 %v2837_v20, %v2731_v53  ;;  %v5499_v53 = vld [vmem:[%s8549_s14 + $0x1c0] sm:$0xf]  ;;  %v6169_v54 = vld [vmem:[%s8549_s14 + $0x1cc] sm:$0xf0]  ;;  %v5644_v20 = vor.u32 %v6205_v42, %v5643_v40  ;;  %v5580_v40 = vor.u32 %v6189_v30, %v5579_v28  ;;  %v5836_v30 = vor.u32 %v6253_v55, %v5835_v21 }
 0x44f   : > { %v5500_v3 = vor.u32 %v6169_v54, %v5499_v53  ;;  %v6121_v53 = vld [vmem:[%s8549_s14 + $0x4c] sm:$0xf0]  ;;  %v5373_v28 = vld [vmem:[%s8549_s14 + $0xd0] sm:$0xf0] }
 0x450   : > { %3997 = vmatpush.bf16.msrb.mxu1 %v5644_v20  ;;  %v5308_v54 = vor.u32 %v6121_v53, %v5307_v52  ;;  %v6149_v20 = vld [vmem:[%s8549_s14 + $0x12c] sm:$0xf0] }
 0x451   : > { %v2850_v0 = vpop.f32.mrf.mxu1  ;;  %3985 = vmatpush.bf16.msra.mxu0 %v5500_v3  ;;  %v5420_v22 = vor.u32 %v6149_v20, %v5419_v48  ;;  %v6245_v52 = vld [vmem:[%s8549_s14 + $0x42c] sm:$0xf0]  ;;  %v5488_v48 = vor.u32 %v6163_v46, %v5485_v47  ;;  %v5341_v20 = vld [vmem:[%s8549_s14 + $0x90] sm:$0xf0]  ;;  %v6111_v47 = vld [vmem:[%s8549_s14 + $0x4] sm:$0xf] }
 0x452   : > { %v2851_v56 = vadd.f32 %v2850_v0, %v2838_v57  ;;  %v5772_v57 = vor.u32 %v6237_v44, %v5771_v43  ;;  %v5371_v0 = vld [vmem:[%s8549_s14 + $0xc0] sm:$0xf]  ;;  %v5436_v43 = vor.u32 %v6153_v36, %v5435_v35  ;;  %v6185_v44 = vld [vmem:[%s8549_s14 + $0x24c] sm:$0xf0]  ;;  %v5629_v35 = vld [vmem:[%s8549_s14 + $0x2d0] sm:$0xf0] }
 0x453   : > { %v5372_v8 = vor.u32 %v6137_v1, %v5371_v0  ;;  %v5564_v50 = vor.u32 %v6185_v44, %v5563_v41  ;;  %v6145_v0 = vld [vmem:[%s8549_s14 + $0x10c] sm:$0xf0]  ;;  %v5292_v1 = vor.u32 %v6117_v62, %v5291_v60  ;;  %v5819_v36 = vld [vmem:[%s8549_s14 + $0x440] sm:$0xf]  ;;  %v6131_v41 = vld [vmem:[%s8549_s14 + $0xa4] sm:$0xf] }
 0x454   : > { %v2854_v58 = vmax.f32 %v2851_v56, 0.0  ;;  %v5739_v56 = vld [vmem:[%s8549_s14 + $0x3a0] sm:$0xf]  ;;  %3998 = vmatpush.bf16.msrb.mxu1 %v5628_v45  ;;  %v5404_v45 = vor.u32 %v6145_v0, %v5403_v63  ;;  %v5820_v44 = vor.u32 %v6249_v37, %v5819_v36  ;;  %v5597_v60 = vld [vmem:[%s8549_s14 + $0x290] sm:$0xf0] }
 0x455   : > { %v2839_v19 = vpop.f32.mrf.mxu3  ;;  %v5740_v14 = vor.u32 %v6229_v7, %v5739_v56  ;;  %3986 = vmatpush.bf16.msra.mxu0 %v5484_v5  ;;  %3972 = vmatpush.bf16.msrb.mxu3 %v5372_v8  ;;  %v5659_v5 = vld [vmem:[%s8549_s14 + $0x300] sm:$0xf]  ;;  %v6209_v56 = vld [vmem:[%s8549_s14 + $0x30c] sm:$0xf0] }
 0x456   : > { %v2855_v25 = vpack.c.bf16 %v2854_v58, %v2854_v58  ;;  %v5468_v58 = vor.u32 %v6161_v10, %v5467_v9  ;;  %v5356_v19 = vor.u32 %v6133_v12, %v5355_v11  ;;  %v5660_v7 = vor.u32 %v6209_v56, %v5659_v5  ;;  %v5275_v8 = vld [vmem:[%s8549_s14] sm:$0xf]  ;;  %v6113_v9 = vld [vmem:[%s8549_s14 + $0xc] sm:$0xf0]  ;;  %v6123_v5 = vld [vmem:[%s8549_s14 + $0x64] sm:$0xf] }
 0x457   : > { %v5276_v10 = vor.u32 %v6113_v9, %v5275_v8  ;;  %v2872_v11 = vld [vmem:[%s8548_s13] sm:$0x1]  ;;  %v6241_v62 = vld [vmem:[%s8549_s14 + $0x40c] sm:$0xf0]  ;;  %v5600_v56 = vor.u32 %v6191_v23, %v5597_v60  ;;  %v6155_v8 = vld [vmem:[%s8549_s14 + $0x164] sm:$0xf] }
 0x458   : > { %2929 = vmatmul.bf16.vlgmr.msra.gmra.mxu2 %v2855_v25  ;;  %v6129_v25 = vld [vmem:[%s8549_s14 + $0x8c] sm:$0xf0]  ;;  %3999 = vmatpush.bf16.msrb.mxu1 %v5612_v13  ;;  %v5453_v9 = vld [vmem:[%s8549_s14 + $0x170] sm:$0xf0]  ;;  %v6142_v23 = vld [vmem:[%s8549_s14 + $0xf4] sm:$0xf0] }
 0x459   : > { %v2852_v39 = vpop.f32.mrf.mxu1  ;;  %4010 = vmatpush.bf16.msra.mxu2 %v5772_v57  ;;  %3987 = vmatpush.bf16.msra.mxu0 %v5468_v58  ;;  %v5340_v34 = vor.u32 %v6129_v25, %v5339_v24  ;;  %v5547_v57 = vld [vmem:[%s8549_s14 + $0x220] sm:$0xf]  ;;  %v6171_v58 = vld [vmem:[%s8549_s14 + $0x1e4] sm:$0xf] }
 0x45a   : > { %3973 = vmatpush.bf16.msrb.mxu3 %v5356_v19  ;;  %v5708_v39 = vor.u32 %v6221_v33, %v5707_v32  ;;  %v5548_v3 = vor.u32 %v6181_v59, %v5547_v57  ;;  %v6167_v32 = vld [vmem:[%s8549_s14 + $0x1c4] sm:$0xf]  ;;  %v5501_v33 = vld [vmem:[%s8549_s14 + $0x1d0] sm:$0xf0] }
 0x45c   : > { %4000 = vmatpush.bf16.msrb.mxu1 %v5596_v26  ;;  %v5520_v26 = vor.u32 %v6171_v58, %v5517_v16 }
 0x45d   : > { %4011 = vmatpush.bf16.msra.mxu2 %v5756_v2  ;;  %3988 = vmatpush.bf16.msra.mxu0 %v5452_v29  ;;  %v5531_v2 = vld [vmem:[%s8549_s14 + $0x200] sm:$0xf]  ;;  %v5648_v29 = vor.u32 %v6203_v17, %v5645_v18  ;;  %v5456_v17 = vor.u32 %v6155_v8, %v5453_v9  ;;  %v6119_v18 = vld [vmem:[%s8549_s14 + $0x44] sm:$0xf]  ;;  %v5821_v8 = vld [vmem:[%s8549_s14 + $0x450] sm:$0xf0] }
 0x45e   : > { %3974 = vmatpush.bf16.msrb.mxu3 %v5340_v34  ;;  %v5532_v6 = vor.u32 %v6177_v4, %v5531_v2  ;;  %v6199_v34 = vld [vmem:[%s8549_s14 + $0x2c4] sm:$0xf]  ;;  %v6138_v9 = vld [vmem:[%s8549_s14 + $0xd4] sm:$0xf0] }
 0x460   : > { %4001 = vmatpush.bf16.msrb.mxu1 %v5580_v40 }
 0x461   : > { %4012 = vmatpush.bf16.msra.mxu2 %v5740_v14  ;;  %3989 = vmatpush.bf16.msra.mxu0 %v5436_v43  ;;  %v6139_v14 = vld [vmem:[%s8549_s14 + $0xe4] sm:$0xf]  ;;  %v5632_v43 = vor.u32 %v6199_v34, %v5629_v35  ;;  %v5293_v35 = vld [vmem:[%s8549_s14 + $0x30] sm:$0xf0] }
 0x462   : > { %3975 = vmatpush.bf16.msrb.mxu3 %v5324_v49  ;;  %v5392_v25 = vor.u32 %v6139_v14, %v5389_v15  ;;  %v6195_v49 = vld [vmem:[%s8549_s14 + $0x2a4] sm:$0xf] }
 0x463   : > { %v6115_v34 = vld [vmem:[%s8549_s14 + $0x24] sm:$0xf] }
 0x464   : > { %4002 = vmatpush.bf16.msrb.mxu1 %v5564_v50  ;;  %v5613_v50 = vld [vmem:[%s8549_s14 + $0x2b0] sm:$0xf0] }
 0x465   : > { %4013 = vmatpush.bf16.msra.mxu2 %v5724_v27  ;;  %3990 = vmatpush.bf16.msra.mxu0 %v5420_v22  ;;  %v6135_v27 = vld [vmem:[%s8549_s14 + $0xc4] sm:$0xf]  ;;  %v5616_v59 = vor.u32 %v6195_v49, %v5613_v50  ;;  %v5277_v49 = vld [vmem:[%s8549_s14 + $0x10] sm:$0xf0] }
 0x466   : > { %3976 = vmatpush.bf16.msrb.mxu3 %v5308_v54  ;;  %v5376_v40 = vor.u32 %v6135_v27, %v5373_v28  ;;  %v6127_v54 = vld [vmem:[%s8549_s14 + $0x84] sm:$0xf]  ;;  %v5565_v28 = vld [vmem:[%s8549_s14 + $0x250] sm:$0xf0]  ;;  %v5280_v60 = vor.u32 %v6111_v47, %v5277_v49 }
 0x467   : > { %v6183_v27 = vld [vmem:[%s8549_s14 + $0x244] sm:$0xf] }
 0x468   : > { %4003 = vmatpush.bf16.msrb.mxu1 %v5548_v3  ;;  %v6159_v3 = vld [vmem:[%s8549_s14 + $0x184] sm:$0xf]  ;;  %v5568_v36 = vor.u32 %v6183_v27, %v5565_v28  ;;  %v6134_v27 = vld [vmem:[%s8549_s14 + $0xb4] sm:$0xf0]  ;;  %v5491_v28 = vld [vmem:[%s8549_s14 + $0x1a8] sm:$0xf] }
 0x469   : > { %4014 = vmatpush.bf16.msra.mxu2 %v5708_v39  ;;  %3991 = vmatpush.bf16.msra.mxu0 %v5404_v45  ;;  %v5504_v39 = vor.u32 %v6167_v32, %v5501_v33  ;;  %v5472_v45 = vor.u32 %v6159_v3, %v5469_v31  ;;  %v6143_v50 = vld [vmem:[%s8549_s14 + $0x104] sm:$0xf]  ;;  %v5837_v3 = vld [vmem:[%s8549_s14 + $0x470] sm:$0xf0]  ;;  %v5395_v31 = vld [vmem:[%s8549_s14 + $0xe8] sm:$0xf] }
 0x46a   : > { %3977 = vmatpush.bf16.msrb.mxu3 %v5292_v1  ;;  %v5344_v1 = vor.u32 %v6127_v54, %v5341_v20  ;;  %v5533_v54 = vld [vmem:[%s8549_s14 + $0x210] sm:$0xf0]  ;;  %v6223_v20 = vld [vmem:[%s8549_s14 + $0x384] sm:$0xf] }
 0x46b   : > { %v6207_v47 = vld [vmem:[%s8549_s14 + $0x304] sm:$0xf] }
 0x46c   : > { %4004 = vmatpush.bf16.msrb.mxu1 %v5532_v6  ;;  %v5325_v6 = vld [vmem:[%s8549_s14 + $0x70] sm:$0xf0] }
 0x46d   : > { %v2629_v42 = vpop.permute.xlu0 %2628  ;;  %4015 = vmatpush.bf16.msra.mxu2 %v5692_v51  ;;  %v5803_v51 = vld [vmem:[%s8549_s14 + $0x420] sm:$0xf]  ;;  %v5328_v16 = vor.u32 %v6123_v5, %v5325_v6  ;;  %v6219_v5 = vld [vmem:[%s8549_s14 + $0x364] sm:$0xf]  ;;  %v5709_v6 = vld [vmem:[%s8549_s14 + $0x370] sm:$0xf0] }
 0x46e   : > { %2631 = vst.msk [vmem:[#allocation6 + $0x3] sm:$0x1] %vm7360_vm14, %v2629_v42  ;;  %3978 = vmatpush.bf16.msrb.mxu3 %v5276_v10  ;;  %v5357_v42 = vld [vmem:[%s8549_s14 + $0xb0] sm:$0xf0]  ;;  %v5804_v22 = vor.u32 %v6245_v52, %v5803_v51  ;;  %v6187_v10 = vld [vmem:[%s8549_s14 + $0x264] sm:$0xf] }
 0x46f   : > { %v5360_v53 = vor.u32 %v6131_v41, %v5357_v42  ;;  %v5549_v41 = vld [vmem:[%s8549_s14 + $0x230] sm:$0xf0]  ;;  %v6227_v42 = vld [vmem:[%s8549_s14 + $0x3a4] sm:$0xf] }
 0x471   : > { %4016 = vmatpush.bf16.msra.mxu2 %v5676_v61  ;;  %v5787_v61 = vld [vmem:[%s8549_s14 + $0x400] sm:$0xf] }
 0x475   : > { %4017 = vmatpush.bf16.msra.mxu2 %v5660_v7  ;;  %v7742_v57 = vld [vmem:[#allocation6] sm:$0x1f]  ;;  %v5788_v7 = vor.u32 %v6241_v62, %v5787_v61 }
 0x476   : > { %v2937_v63 = vperm.slane %v7742_v57, 0  ;;  %v2938_v0 = vperm.slane %v7742_v57, 1  ;;  %v2939_v2 = vperm.slane %v7742_v57, 2  ;;  %v2940_v4 = vperm.slane %v7742_v57, 3  ;;  %v5523_v62 = vld [vmem:[%s8549_s14 + $0x1e8] sm:$0xf] }
 0x478   : > { %v7790_v14 = vpack.c.bf16 %v2937_v63, %v2937_v63  ;;  %v7792_v15 = vpack.c.bf16 %v2938_v0, %v2938_v0  ;;  %v7794_v58 = vpack.c.bf16 %v2939_v2, %v2939_v2  ;;  %v7802_v21 = vpack.c.bf16 %v2940_v4, %v2940_v4  ;;  %v6174_v63 = vld [vmem:[%s8549_s14 + $0x1f4] sm:$0xf0] }
 0x479   : > { %v5396_v4 = vor.u32 %v6142_v23, %v5395_v31  ;;  %v5763_v31 = vld [vmem:[%s8549_s14 + $0x3c8] sm:$0xf]  ;;  %v6234_v23 = vld [vmem:[%s8549_s14 + $0x3d4] sm:$0xf0] }
 0x4db   : > { %v2930_v12 = vpop.f32.mrf.mxu2 }
 0x4dc   : > { %v2931_v13 = vadd.f32 %v2930_v12, %v2872_v11  ;;  %v5581_v11 = vld [vmem:[%s8549_s14 + $0x270] sm:$0xf0]  ;;  %v6235_v12 = vld [vmem:[%s8549_s14 + $0x3e4] sm:$0xf] }
 0x4dd   : > { %v5584_v55 = vor.u32 %v6187_v10, %v5581_v11  ;;  %v5507_v10 = vld [vmem:[%s8549_s14 + $0x1c8] sm:$0xf]  ;;  %v6170_v11 = vld [vmem:[%s8549_s14 + $0x1d4] sm:$0xf0] }
 0x4de   : > { %v2934_v19 = vmax.f32 %v2931_v13, 0.0  ;;  %v5773_v13 = vld [vmem:[%s8549_s14 + $0x3f0] sm:$0xf0] }
 0x4e0   : > { %v3096_v24 = vpack.c.bf16 %v2934_v19, %v2934_v19  ;;  %v5309_v19 = vld [vmem:[%s8549_s14 + $0x50] sm:$0xf0] }
 0x4e1   : > { %v5312_v32 = vor.u32 %v6119_v18, %v5309_v19  ;;  %v6215_v18 = vld [vmem:[%s8549_s14 + $0x344] sm:$0xf]  ;;  %v5693_v19 = vld [vmem:[%s8549_s14 + $0x350] sm:$0xf0] }
 0x4e2   : > { %5269 = vmatmul.msk.bf16.vlgmr.msra.gmra.mxu3 %vm8601_vm15, %v3096_v24  ;;  %5270 = vmatmul.msk.bf16.vlgmr.msrb.gmra.mxu0 %vm8602_vm1, %v3096_v24 }
 0x4e3   : > { %5271 = vmatmul.msk.bf16.vlgmr.msra.gmra.mxu1 %vm8603_vm2, %v3096_v24  ;;  %5272 = vmatmul.msk.bf16.vlgmr.msrb.gmra.mxu2 %vm8604_vm5, %v3096_v24  ;;  %v2932_v38 = vpop.f32.mrf.mxu2  ;;  %v5776_v24 = vor.u32 %v6235_v12, %v5773_v13  ;;  %v5712_v13 = vor.u32 %v6219_v5, %v5709_v6  ;;  %v6202_v5 = vld [vmem:[%s8549_s14 + $0x2d4] sm:$0xf0] }
 0x4e4   : > { %4036 = vmatpush.bf16.msrb.mxu0 %v5392_v25  ;;  %4049 = vmatpush.bf16.msra.mxu1 %v5520_v26  ;;  %v6151_v25 = vld [vmem:[%s8549_s14 + $0x144] sm:$0xf]  ;;  %v5437_v26 = vld [vmem:[%s8549_s14 + $0x150] sm:$0xf0]  ;;  %v6154_v6 = vld [vmem:[%s8549_s14 + $0x154] sm:$0xf0] }
 0x4e5   : > { %4062 = vmatpush.bf16.msrb.mxu2 %v5648_v29  ;;  %4027 = vmatpush.bf16.msra.mxu3 %v5836_v30  ;;  %v6231_v29 = vld [vmem:[%s8549_s14 + $0x3c4] sm:$0xf]  ;;  %v5757_v30 = vld [vmem:[%s8549_s14 + $0x3d0] sm:$0xf0]  ;;  %v5440_v33 = vor.u32 %v6151_v25, %v5437_v26  ;;  %v5363_v26 = vld [vmem:[%s8549_s14 + $0xa8] sm:$0xf] }
 0x4e6   : > { %v5760_v37 = vor.u32 %v6231_v29, %v5757_v30  ;;  %v6147_v38 = vld [vmem:[%s8549_s14 + $0x124] sm:$0xf]  ;;  %v5805_v25 = vld [vmem:[%s8549_s14 + $0x430] sm:$0xf0]  ;;  %v6166_v29 = vld [vmem:[%s8549_s14 + $0x1b4] sm:$0xf0]  ;;  %v5696_v30 = vor.u32 %v6215_v18, %v5693_v19 }
 0x4e7   : > { %v6198_v18 = vld [vmem:[%s8549_s14 + $0x2b4] sm:$0xf0] }
 0x4e8   : > { %4037 = vmatpush.bf16.msrb.mxu0 %v5376_v40  ;;  %4050 = vmatpush.bf16.msra.mxu1 %v5504_v39  ;;  %v5421_v40 = vld [vmem:[%s8549_s14 + $0x130] sm:$0xf0]  ;;  %v6179_v39 = vld [vmem:[%s8549_s14 + $0x224] sm:$0xf]  ;;  %v6150_v19 = vld [vmem:[%s8549_s14 + $0x134] sm:$0xf0] }
 0x4e9   : > { %4063 = vmatpush.bf16.msrb.mxu2 %v5632_v43  ;;  %4028 = vmatpush.bf16.msra.mxu3 %v5820_v44  ;;  %v5741_v43 = vld [vmem:[%s8549_s14 + $0x3b0] sm:$0xf0]  ;;  %v5296_v44 = vor.u32 %v6115_v34, %v5293_v35  ;;  %v5424_v46 = vor.u32 %v6147_v38, %v5421_v40  ;;  %v5552_v51 = vor.u32 %v6179_v39, %v5549_v41  ;;  %v5347_v40 = vld [vmem:[%s8549_s14 + $0x88] sm:$0xf]  ;;  %v6130_v39 = vld [vmem:[%s8549_s14 + $0x94] sm:$0xf0] }
 0x4ea   : > { %v5744_v52 = vor.u32 %v6227_v42, %v5741_v43  ;;  %v5364_v34 = vor.u32 %v6134_v27, %v5363_v26  ;;  %v5677_v35 = vld [vmem:[%s8549_s14 + $0x330] sm:$0xf0]  ;;  %v5492_v38 = vor.u32 %v6166_v29, %v5491_v28  ;;  %v5475_v41 = vld [vmem:[%s8549_s14 + $0x188] sm:$0xf]  ;;  %v6162_v42 = vld [vmem:[%s8549_s14 + $0x194] sm:$0xf0] }
 0x4eb   : > { %v5779_v43 = vld [vmem:[%s8549_s14 + $0x3e8] sm:$0xf]  ;;  %v6114_v28 = vld [vmem:[%s8549_s14 + $0x14] sm:$0xf0] }
 0x4ec   : > { %4038 = vmatpush.bf16.msrb.mxu0 %v5360_v53  ;;  %4051 = vmatpush.bf16.msra.mxu1 %v5488_v48  ;;  %v5405_v53 = vld [vmem:[%s8549_s14 + $0x110] sm:$0xf0]  ;;  %v6175_v48 = vld [vmem:[%s8549_s14 + $0x204] sm:$0xf]  ;;  %v5283_v27 = vld [vmem:[%s8549_s14 + $0x8] sm:$0xf] }
 0x4ed   : > { %4064 = vmatpush.bf16.msrb.mxu2 %v5616_v59  ;;  %4029 = vmatpush.bf16.msra.mxu3 %v5804_v22  ;;  %v5725_v59 = vld [vmem:[%s8549_s14 + $0x390] sm:$0xf0]  ;;  %v6251_v22 = vld [vmem:[%s8549_s14 + $0x464] sm:$0xf]  ;;  %v5408_v61 = vor.u32 %v6143_v50, %v5405_v53  ;;  %v5536_v0 = vor.u32 %v6175_v48, %v5533_v54  ;;  %v5348_v50 = vor.u32 %v6130_v39, %v5347_v40  ;;  %v6126_v53 = vld [vmem:[%s8549_s14 + $0x74] sm:$0xf0] }
 0x4ee   : > { %v5840_v2 = vor.u32 %v6251_v22, %v5837_v3  ;;  %v5476_v48 = vor.u32 %v6162_v42, %v5475_v41  ;;  %v6206_v22 = vld [vmem:[%s8549_s14 + $0x2f4] sm:$0xf0]  ;;  %v5411_v29 = vld [vmem:[%s8549_s14 + $0x108] sm:$0xf]  ;;  %v6140_v39 = vld [vmem:[%s8549_s14 + $0xec] sm:$0xf]  ;;  %v5284_v42 = vor.u32 %v6114_v28, %v5283_v27 }
 0x4ef   : > { %v6158_v3 = vld [vmem:[%s8549_s14 + $0x174] sm:$0xf0]  ;;  %v5397_v41 = vld [vmem:[%s8549_s14 + $0xf8] sm:$0xf0] }
 0x4f0   : > { %4039 = vmatpush.bf16.msrb.mxu0 %v5344_v1  ;;  %4052 = vmatpush.bf16.msra.mxu1 %v5472_v45  ;;  %v5728_v1 = vor.u32 %v6223_v20, %v5725_v59  ;;  %v2941_v45 = vperm.slane %v7742_v57, 4  ;;  %v5379_v57 = vld [vmem:[%s8549_s14 + $0xc8] sm:$0xf]  ;;  %v6254_v40 = vld [vmem:[%s8549_s14 + $0x474] sm:$0xf0] }
 0x4f1   : > { %4065 = vmatpush.bf16.msrb.mxu2 %v5600_v56  ;;  %4030 = vmatpush.bf16.msra.mxu3 %v5788_v7  ;;  %v6247_v56 = vld [vmem:[%s8549_s14 + $0x444] sm:$0xf]  ;;  %v5524_v7 = vor.u32 %v6174_v63, %v5523_v62  ;;  %v5459_v20 = vld [vmem:[%s8549_s14 + $0x168] sm:$0xf]  ;;  %v6178_v27 = vld [vmem:[%s8549_s14 + $0x214] sm:$0xf0] }
 0x4f2   : > { %3979 = vmatmul.bf16.vlgmr.msrb.gmra.mxu3 %v7790_v14  ;;  %3992 = vmatmul.bf16.vlgmr.msra.gmra.mxu0 %v7792_v15  ;;  %v7917_v12 = vpack.c.bf16 %v2941_v45, %v2941_v45  ;;  %v5651_v59 = vld [vmem:[%s8549_s14 + $0x2e8] sm:$0xf]  ;;  %v5764_v45 = vor.u32 %v6234_v23, %v5763_v31  ;;  %v6186_v23 = vld [vmem:[%s8549_s14 + $0x254] sm:$0xf0] }
 0x4f3   : > { %4005 = vmatmul.bf16.vlgmr.msrb.gmra.mxu1 %v7794_v58  ;;  %4018 = vmatmul.bf16.vlgmr.msra.gmra.mxu2 %v7802_v21  ;;  %v5652_v62 = vor.u32 %v6206_v22, %v5651_v59  ;;  %v5315_v63 = vld [vmem:[%s8549_s14 + $0x48] sm:$0xf]  ;;  %v5381_v59 = vld [vmem:[%s8549_s14 + $0xd8] sm:$0xf0] }
 0x4f4   : > { %4040 = vmatpush.bf16.msrb.mxu0 %v5328_v16  ;;  %4053 = vmatpush.bf16.msra.mxu1 %v5456_v17  ;;  %v5824_v16 = vor.u32 %v6247_v56, %v5821_v8  ;;  %v5380_v17 = vor.u32 %v6138_v9, %v5379_v57  ;;  %v5747_v56 = vld [vmem:[%s8549_s14 + $0x3a8] sm:$0xf] }
 0x4f5   : > { %4066 = vmatpush.bf16.msrb.mxu2 %v5584_v55  ;;  %4075 = vmatpush.bf16.msrb.mxu3 %v5776_v24  ;;  %v6243_v55 = vld [vmem:[%s8549_s14 + $0x424] sm:$0xf]  ;;  %v5508_v24 = vor.u32 %v6170_v11, %v5507_v10  ;;  %v5299_v9 = vld [vmem:[%s8549_s14 + $0x28] sm:$0xf]  ;;  %v6118_v10 = vld [vmem:[%s8549_s14 + $0x34] sm:$0xf0] }
 0x4f6   : > { %v5571_v31 = vld [vmem:[%s8549_s14 + $0x248] sm:$0xf] }
 0x4f8   : > { %4041 = vmatpush.bf16.msrb.mxu0 %v5312_v32  ;;  %4054 = vmatpush.bf16.msra.mxu1 %v5440_v33  ;;  %v6211_v32 = vld [vmem:[%s8549_s14 + $0x324] sm:$0xf]  ;;  %v5808_v33 = vor.u32 %v6243_v55, %v5805_v25  ;;  %v5731_v55 = vld [vmem:[%s8549_s14 + $0x388] sm:$0xf]  ;;  %v5300_v25 = vor.u32 %v6118_v10, %v5299_v9  ;;  %v6210_v9 = vld [vmem:[%s8549_s14 + $0x314] sm:$0xf0] }
 0x4f9   : > { %4067 = vmatpush.bf16.msrb.mxu2 %v5568_v36  ;;  %4076 = vmatpush.bf16.msrb.mxu3 %v5760_v37  ;;  %v6239_v36 = vld [vmem:[%s8549_s14 + $0x404] sm:$0xf]  ;;  %v5789_v37 = vld [vmem:[%s8549_s14 + $0x410] sm:$0xf0]  ;;  %v5795_v10 = vld [vmem:[%s8549_s14 + $0x408] sm:$0xf] }
 0x4fa   : > { %v5792_v49 = vor.u32 %v6239_v36, %v5789_v37  ;;  %v5715_v36 = vld [vmem:[%s8549_s14 + $0x368] sm:$0xf]  ;;  %v6222_v37 = vld [vmem:[%s8549_s14 + $0x374] sm:$0xf0] }
 0x4fc   : > { %4042 = vmatpush.bf16.msrb.mxu0 %v5296_v44  ;;  %4055 = vmatpush.bf16.msra.mxu1 %v5424_v46  ;;  %v6238_v44 = vld [vmem:[%s8549_s14 + $0x3f4] sm:$0xf0]  ;;  %v5680_v46 = vor.u32 %v6211_v32, %v5677_v35 }
 0x4fd   : > { %4068 = vmatpush.bf16.msrb.mxu2 %v5552_v51  ;;  %4077 = vmatpush.bf16.msrb.mxu3 %v5744_v52  ;;  %v5661_v51 = vld [vmem:[%s8549_s14 + $0x310] sm:$0xf0]  ;;  %v5331_v52 = vld [vmem:[%s8549_s14 + $0x68] sm:$0xf]  ;;  %v5780_v54 = vor.u32 %v6238_v44, %v5779_v43  ;;  %v6194_v35 = vld [vmem:[%s8549_s14 + $0x294] sm:$0xf0] }
 0x500   : > { %4043 = vmatpush.bf16.msrb.mxu0 %v5280_v60  ;;  %4056 = vmatpush.bf16.msra.mxu1 %v5408_v61  ;;  %v5664_v60 = vor.u32 %v6207_v47, %v5661_v51  ;;  %v5332_v61 = vor.u32 %v6126_v53, %v5331_v52  ;;  %v5587_v47 = vld [vmem:[%s8549_s14 + $0x268] sm:$0xf]  ;;  %v5400_v51 = vor.u32 %v6140_v39, %v5397_v41  ;;  %v6218_v53 = vld [vmem:[%s8549_s14 + $0x354] sm:$0xf0]  ;;  %v6232_v39 = vld [vmem:[%s8549_s14 + $0x3cc] sm:$0xf] }
 0x501   : > { %4069 = vmatpush.bf16.msrb.mxu2 %v5536_v0  ;;  %4078 = vmatpush.bf16.msrb.mxu3 %v5728_v1  ;;  %v6122_v0 = vld [vmem:[%s8549_s14 + $0x54] sm:$0xf0]  ;;  %v5460_v1 = vor.u32 %v6158_v3, %v5459_v20  ;;  %v5699_v52 = vld [vmem:[%s8549_s14 + $0x348] sm:$0xf]  ;;  %v6136_v20 = vld [vmem:[%s8549_s14 + $0xcc] sm:$0xf] }
 0x502   : > { %5849 = vmatmul.msk.bf16.vlgmr.msra.gmra.mxu3 %vm8605_vm6, %v7917_v12  ;;  %v5316_v8 = vor.u32 %v6122_v0, %v5315_v63  ;;  %v5700_v3 = vor.u32 %v6218_v53, %v5699_v52  ;;  %v6214_v63 = vld [vmem:[%s8549_s14 + $0x334] sm:$0xf0]  ;;  %v5811_v0 = vld [vmem:[%s8549_s14 + $0x428] sm:$0xf]  ;;  %v5765_v41 = vld [vmem:[%s8549_s14 + $0x3d8] sm:$0xf0] }
 0x503   : > { %4044 = vmatmul.bf16.vlgmr.msrb.gmra.mxu0 %v7790_v14  ;;  %4057 = vmatmul.bf16.vlgmr.msra.gmra.mxu1 %v7792_v15  ;;  %v6196_v52 = vld [vmem:[%s8549_s14 + $0x2ac] sm:$0xf]  ;;  %v5621_v53 = vld [vmem:[%s8549_s14 + $0x2b8] sm:$0xf0] }
 0x504   : > { %4092 = vmatpush.bf16.msra.mxu0 %v5840_v2  ;;  %4101 = vmatpush.bf16.msrb.mxu1 %v5396_v4  ;;  %v5443_v2 = vld [vmem:[%s8549_s14 + $0x148] sm:$0xf] }
 0x505   : > { %4114 = vmatpush.bf16.msra.mxu2 %v5524_v7  ;;  %4079 = vmatpush.bf16.msrb.mxu3 %v5712_v13  ;;  %v5635_v4 = vld [vmem:[%s8549_s14 + $0x2c8] sm:$0xf]  ;;  %v6230_v7 = vld [vmem:[%s8549_s14 + $0x3b4] sm:$0xf0]  ;;  %v5444_v11 = vor.u32 %v6154_v6, %v5443_v2  ;;  %v5365_v2 = vld [vmem:[%s8549_s14 + $0xb8] sm:$0xf0] }
 0x506   : > { %4070 = vmatmul.bf16.vlgmr.msrb.gmra.mxu2 %v7794_v58  ;;  %v5636_v57 = vor.u32 %v6202_v5, %v5635_v4  ;;  %v5748_v13 = vor.u32 %v6230_v7, %v5747_v56  ;;  %v5572_v4 = vor.u32 %v6186_v23, %v5571_v31  ;;  %v5555_v6 = vld [vmem:[%s8549_s14 + $0x228] sm:$0xf]  ;;  %v6182_v56 = vld [vmem:[%s8549_s14 + $0x234] sm:$0xf0]  ;;  %v5624_v31 = vor.u32 %v6196_v52, %v5621_v53  ;;  %v6176_v52 = vld [vmem:[%s8549_s14 + $0x20c] sm:$0xf] }
 0x507   : > { %v5667_v7 = vld [vmem:[%s8549_s14 + $0x308] sm:$0xf] }
 0x508   : > { %4093 = vmatpush.bf16.msra.mxu0 %v5824_v16  ;;  %4102 = vmatpush.bf16.msrb.mxu1 %v5380_v17  ;;  %v5427_v16 = vld [vmem:[%s8549_s14 + $0x128] sm:$0xf] }
 0x509   : > { %4115 = vmatpush.bf16.msra.mxu2 %v5508_v24  ;;  %4080 = vmatpush.bf16.msrb.mxu3 %v5696_v30  ;;  %v5619_v17 = vld [vmem:[%s8549_s14 + $0x2a8] sm:$0xf]  ;;  %v6226_v24 = vld [vmem:[%s8549_s14 + $0x394] sm:$0xf0]  ;;  %v5428_v30 = vor.u32 %v6150_v19, %v5427_v16  ;;  %v5349_v16 = vld [vmem:[%s8549_s14 + $0x98] sm:$0xf0] }
 0x50a   : > { %v5620_v26 = vor.u32 %v6198_v18, %v5619_v17  ;;  %v5732_v32 = vor.u32 %v6226_v24, %v5731_v55  ;;  %v6204_v17 = vld [vmem:[%s8549_s14 + $0x2ec] sm:$0xf]  ;;  %v5556_v18 = vor.u32 %v6182_v56, %v5555_v6  ;;  %v5653_v19 = vld [vmem:[%s8549_s14 + $0x2f8] sm:$0xf0] }
 0x50b   : > { %v6236_v55 = vld [vmem:[%s8549_s14 + $0x3ec] sm:$0xf]  ;;  %v5781_v24 = vld [vmem:[%s8549_s14 + $0x3f8] sm:$0xf0] }
 0x50c   : > { %4094 = vmatpush.bf16.msra.mxu0 %v5808_v33  ;;  %4103 = vmatpush.bf16.msrb.mxu1 %v5364_v34  ;;  %v6146_v33 = vld [vmem:[%s8549_s14 + $0x114] sm:$0xf0]  ;;  %v5603_v34 = vld [vmem:[%s8549_s14 + $0x288] sm:$0xf] }
 0x50d   : > { %4116 = vmatpush.bf16.msra.mxu2 %v5492_v38  ;;  %4081 = vmatpush.bf16.msrb.mxu3 %v5680_v46  ;;  %v5843_v38 = vld [vmem:[%s8549_s14 + $0x468] sm:$0xf]  ;;  %v5604_v43 = vor.u32 %v6194_v35, %v5603_v34  ;;  %v5412_v44 = vor.u32 %v6146_v33, %v5411_v29  ;;  %v5716_v46 = vor.u32 %v6222_v37, %v5715_v36  ;;  %v6124_v35 = vld [vmem:[%s8549_s14 + $0x6c] sm:$0xf]  ;;  %v5333_v36 = vld [vmem:[%s8549_s14 + $0x78] sm:$0xf0] }
 0x50e   : > { %v5656_v33 = vor.u32 %v6204_v17, %v5653_v19  ;;  %v5784_v34 = vor.u32 %v6236_v55, %v5781_v24  ;;  %v6200_v37 = vld [vmem:[%s8549_s14 + $0x2cc] sm:$0xf]  ;;  %v5845_v17 = vld [vmem:[%s8549_s14 + $0x478] sm:$0xf0] }
 0x50f   : > { %v6156_v19 = vld [vmem:[%s8549_s14 + $0x16c] sm:$0xf]  ;;  %v5461_v55 = vld [vmem:[%s8549_s14 + $0x178] sm:$0xf0] }
 0x510   : > { %4095 = vmatpush.bf16.msra.mxu0 %v5792_v49  ;;  %4104 = vmatpush.bf16.msrb.mxu1 %v5348_v50  ;;  %v6190_v49 = vld [vmem:[%s8549_s14 + $0x274] sm:$0xf0]  ;;  %v5844_v50 = vor.u32 %v6254_v40, %v5843_v38  ;;  %v5637_v40 = vld [vmem:[%s8549_s14 + $0x2d8] sm:$0xf0] }
 0x511   : > { %4117 = vmatpush.bf16.msra.mxu2 %v5476_v48  ;;  %4082 = vmatpush.bf16.msrb.mxu3 %v5664_v60  ;;  %v5827_v48 = vld [vmem:[%s8549_s14 + $0x448] sm:$0xf]  ;;  %v5588_v22 = vor.u32 %v6190_v49, %v5587_v47  ;;  %v5640_v47 = vor.u32 %v6200_v37, %v5637_v40  ;;  %v5768_v49 = vor.u32 %v6232_v39, %v5765_v41  ;;  %v6180_v40 = vld [vmem:[%s8549_s14 + $0x22c] sm:$0xf]  ;;  %v5557_v41 = vld [vmem:[%s8549_s14 + $0x238] sm:$0xf0] }
 0x513   : > { %5850 = vmatmul.msk.bf16.vlgmr.msra.gmra.mxu0 %vm8606_vm9, %v7917_v12 }
 0x514   : > { %4140 = vmatpush.bf16.msrb.mxu0 %v5780_v54  ;;  %4105 = vmatpush.bf16.msrb.mxu1 %v5332_v61  ;;  %v6250_v54 = vld [vmem:[%s8549_s14 + $0x454] sm:$0xf0]  ;;  %v5384_v61 = vor.u32 %v6136_v20, %v5381_v59 }
 0x515   : > { %4127 = vmatpush.bf16.msra.mxu3 %v5652_v62  ;;  %4118 = vmatpush.bf16.msra.mxu2 %v5460_v1  ;;  %v5828_v60 = vor.u32 %v6250_v54, %v5827_v48  ;;  %v5683_v62 = vld [vmem:[%s8549_s14 + $0x328] sm:$0xf]  ;;  %v6246_v1 = vld [vmem:[%s8549_s14 + $0x434] sm:$0xf0]  ;;  %v6228_v48 = vld [vmem:[%s8549_s14 + $0x3ac] sm:$0xf] }
 0x516   : > { %4083 = vmatmul.bf16.vlgmr.msrb.gmra.mxu3 %v7802_v21  ;;  %v5684_v5 = vor.u32 %v6214_v63, %v5683_v62  ;;  %v5749_v54 = vld [vmem:[%s8549_s14 + $0x3b8] sm:$0xf0]  ;;  %v6192_v62 = vld [vmem:[%s8549_s14 + $0x28c] sm:$0xf] }
 0x517   : > { %v5752_v23 = vor.u32 %v6228_v48, %v5749_v54  ;;  %v5605_v63 = vld [vmem:[%s8549_s14 + $0x298] sm:$0xf0]  ;;  %v6208_v54 = vld [vmem:[%s8549_s14 + $0x30c] sm:$0xf] }
 0x518   : > { %4141 = vmatpush.bf16.msrb.mxu0 %v5764_v45  ;;  %4106 = vmatpush.bf16.msrb.mxu1 %v5316_v8  ;;  %v6132_v45 = vld [vmem:[%s8549_s14 + $0xac] sm:$0xf]  ;;  %v5812_v8 = vor.u32 %v6246_v1, %v5811_v0  ;;  %v5733_v1 = vld [vmem:[%s8549_s14 + $0x398] sm:$0xf0]  ;;  %v5608_v6 = vor.u32 %v6192_v62, %v5605_v63 }
 0x519   : > { %4128 = vmatpush.bf16.msra.mxu3 %v5636_v57  ;;  %4119 = vmatpush.bf16.msra.mxu2 %v5444_v11  ;;  %v5368_v57 = vor.u32 %v6132_v45, %v5365_v2  ;;  %v6242_v11 = vld [vmem:[%s8549_s14 + $0x414] sm:$0xf0]  ;;  %v6224_v0 = vld [vmem:[%s8549_s14 + $0x38c] sm:$0xf]  ;;  %v5541_v48 = vld [vmem:[%s8549_s14 + $0x218] sm:$0xf0] }
 0x51a   : > { %v5796_v28 = vor.u32 %v6242_v11, %v5795_v10  ;;  %v5736_v56 = vor.u32 %v6224_v0, %v5733_v1  ;;  %v6220_v10 = vld [vmem:[%s8549_s14 + $0x36c] sm:$0xf]  ;;  %v5717_v11 = vld [vmem:[%s8549_s14 + $0x378] sm:$0xf0]  ;;  %v6277_v1 = vld [vmem:[%s8552_s17 + $0x30] sm:$0xff] }
 0x51b   : > { %v6278_v0 = vld [vmem:[%s8552_s17 + $0x38] sm:$0xff] }
 0x51c   : > { %4142 = vmatpush.bf16.msrb.mxu0 %v5748_v13  ;;  %4107 = vmatpush.bf16.msrb.mxu1 %v5300_v25  ;;  %v6128_v13 = vld [vmem:[%s8549_s14 + $0x8c] sm:$0xf]  ;;  %v5668_v25 = vor.u32 %v6210_v9, %v5667_v7  ;;  %v5589_v9 = vld [vmem:[%s8549_s14 + $0x278] sm:$0xf0] }
 0x51d   : > { %4129 = vmatpush.bf16.msra.mxu3 %v5620_v26  ;;  %4120 = vmatpush.bf16.msra.mxu2 %v5428_v30  ;;  %v5539_v26 = vld [vmem:[%s8549_s14 + $0x208] sm:$0xf]  ;;  %v5352_v29 = vor.u32 %v6128_v13, %v5349_v16  ;;  %v6172_v30 = vld [vmem:[%s8549_s14 + $0x1ec] sm:$0xf] }
 0x51e   : > { %v5540_v38 = vor.u32 %v6178_v27, %v5539_v26  ;;  %v6112_v7 = vld [vmem:[%s8549_s14 + $0xc] sm:$0xf] }
 0x51f   : > { %v6252_v16 = vld [vmem:[%s8549_s14 + $0x46c] sm:$0xf] }
 0x520   : > { %4143 = vmatpush.bf16.msrb.mxu0 %v5732_v32  ;;  %4108 = vmatpush.bf16.msrb.mxu1 %v5284_v42  ;;  %v5525_v32 = vld [vmem:[%s8549_s14 + $0x1f8] sm:$0xf0]  ;;  %v6184_v26 = vld [vmem:[%s8549_s14 + $0x24c] sm:$0xf]  ;;  %v5848_v27 = vor.u32 %v6252_v16, %v5845_v17  ;;  %v6271_v16 = vld [vmem:[%s8552_s17] sm:$0xff] }
 0x521   : > { %4130 = vmatpush.bf16.msra.mxu3 %v5604_v43  ;;  %4121 = vmatpush.bf16.msra.mxu2 %v5412_v44  ;;  %v5528_v42 = vor.u32 %v6172_v30, %v5525_v32  ;;  %v5336_v43 = vor.u32 %v6124_v35, %v5333_v36  ;;  %v6168_v44 = vld [vmem:[%s8549_s14 + $0x1cc] sm:$0xf]  ;;  %v5701_v30 = vld [vmem:[%s8549_s14 + $0x358] sm:$0xf0]  ;;  %v5464_v32 = vor.u32 %v6156_v19, %v5461_v55 }
 0x522   : > { %v6152_v35 = vld [vmem:[%s8549_s14 + $0x14c] sm:$0xf]  ;;  %v5445_v36 = vld [vmem:[%s8549_s14 + $0x158] sm:$0xf0] }
 0x523   : > { %4109 = vmatmul.bf16.vlgmr.msrb.gmra.mxu1 %v7790_v14 }
 0x524   : > { %4144 = vmatpush.bf16.msrb.mxu0 %v5716_v46  ;;  %4157 = vmatpush.bf16.msra.mxu1 %v5844_v50  ;;  %v5509_v46 = vld [vmem:[%s8549_s14 + $0x1d8] sm:$0xf0]  ;;  %v6120_v50 = vld [vmem:[%s8549_s14 + $0x4c] sm:$0xf] }
 0x525   : > { %4166 = vmatpush.bf16.msrb.mxu2 %v5400_v51  ;;  %4131 = vmatpush.bf16.msra.mxu3 %v5588_v22  ;;  %v5317_v51 = vld [vmem:[%s8549_s14 + $0x58] sm:$0xf0]  ;;  %v5512_v20 = vor.u32 %v6168_v44, %v5509_v46  ;;  %v6164_v22 = vld [vmem:[%s8549_s14 + $0x1ac] sm:$0xf]  ;;  %v5448_v44 = vor.u32 %v6152_v35, %v5445_v36 }
 0x526   : > { %4122 = vmatmul.bf16.vlgmr.msra.gmra.mxu2 %v7792_v15  ;;  %v5320_v59 = vor.u32 %v6120_v50, %v5317_v51  ;;  %v6244_v46 = vld [vmem:[%s8549_s14 + $0x42c] sm:$0xf]  ;;  %v5429_v50 = vld [vmem:[%s8549_s14 + $0x138] sm:$0xf0] }
 0x527   : > { %v6294_v36 = vld [vmem:[%s8552_s17 + $0xb8] sm:$0xff] }
 0x528   : > { %4145 = vmatpush.bf16.msrb.mxu0 %v5700_v3  ;;  %4158 = vmatpush.bf16.msra.mxu1 %v5828_v60  ;;  %v5493_v3 = vld [vmem:[%s8549_s14 + $0x1b8] sm:$0xf0]  ;;  %v6116_v60 = vld [vmem:[%s8549_s14 + $0x2c] sm:$0xf] }
 0x529   : > { %4167 = vmatpush.bf16.msrb.mxu2 %v5384_v61  ;;  %4132 = vmatpush.bf16.msra.mxu3 %v5572_v4  ;;  %v5301_v61 = vld [vmem:[%s8549_s14 + $0x38] sm:$0xf0]  ;;  %v5496_v45 = vor.u32 %v6164_v22, %v5493_v3  ;;  %v6160_v4 = vld [vmem:[%s8549_s14 + $0x18c] sm:$0xf] }
 0x52a   : > { %v5304_v2 = vor.u32 %v6116_v60, %v5301_v61  ;;  %v6240_v22 = vld [vmem:[%s8549_s14 + $0x40c] sm:$0xf]  ;;  %v5797_v3 = vld [vmem:[%s8549_s14 + $0x418] sm:$0xf0]  ;;  %v5544_v60 = vor.u32 %v6176_v52, %v5541_v48  ;;  %v6291_v48 = vld [vmem:[%s8552_s17 + $0xa0] sm:$0xff] }
 0x52b   : > { %v5800_v62 = vor.u32 %v6240_v22, %v5797_v3  ;;  %v6290_v22 = vld [vmem:[%s8552_s17 + $0x98] sm:$0xff] }
 0x52c   : > { %4146 = vmatpush.bf16.msrb.mxu0 %v5684_v5  ;;  %4159 = vmatpush.bf16.msra.mxu1 %v5812_v8  ;;  %v5477_v5 = vld [vmem:[%s8549_s14 + $0x198] sm:$0xf0] }
 0x52d   : > { %4168 = vmatpush.bf16.msrb.mxu2 %v5368_v57  ;;  %4133 = vmatpush.bf16.msra.mxu3 %v5556_v18  ;;  %v5285_v8 = vld [vmem:[%s8549_s14 + $0x18] sm:$0xf0]  ;;  %v6188_v57 = vld [vmem:[%s8549_s14 + $0x26c] sm:$0xf]  ;;  %v5480_v13 = vor.u32 %v6160_v4, %v5477_v5 }
 0x52e   : > { %v5288_v18 = vor.u32 %v6112_v7, %v5285_v8  ;;  %v5592_v24 = vor.u32 %v6188_v57, %v5589_v9  ;;  %v6285_v57 = vld [vmem:[%s8552_s17 + $0x70] sm:$0xff]  ;;  %v6272_v9 = vld [vmem:[%s8552_s17 + $0x8] sm:$0xff] }
 0x530   : > { %4147 = vmatpush.bf16.msrb.mxu0 %v5668_v25  ;;  %4160 = vmatpush.bf16.msra.mxu1 %v5796_v28  ;;  %v5720_v25 = vor.u32 %v6220_v10, %v5717_v11  ;;  %v5573_v28 = vld [vmem:[%s8549_s14 + $0x258] sm:$0xf0] }
 0x531   : > { %4169 = vmatpush.bf16.msrb.mxu2 %v5352_v29  ;;  %4134 = vmatpush.bf16.msra.mxu3 %v5540_v38  ;;  %v6216_v29 = vld [vmem:[%s8549_s14 + $0x34c] sm:$0xf]  ;;  %v5576_v37 = vor.u32 %v6184_v26, %v5573_v28 }
 0x532   : > { %v5704_v38 = vor.u32 %v6216_v29, %v5701_v30 }
 0x533   : > { %4148 = vmatmul.bf16.vlgmr.msrb.gmra.mxu0 %v7802_v21  ;;  %5851 = vmatmul.msk.bf16.vlgmr.msra.gmra.mxu1 %vm8607_vm10, %v7917_v12 }
 0x534   : > { %4192 = vmatpush.bf16.msra.mxu0 %v5656_v33  ;;  %4205 = vmatpush.bf16.msrb.mxu1 %v5784_v34  ;;  %v6248_v33 = vld [vmem:[%s8549_s14 + $0x44c] sm:$0xf]  ;;  %v5829_v34 = vld [vmem:[%s8549_s14 + $0x458] sm:$0xf0] }
 0x535   : > { %4179 = vmatpush.bf16.msrb.mxu3 %v5528_v42  ;;  %4170 = vmatpush.bf16.msrb.mxu2 %v5336_v43  ;;  %v5832_v39 = vor.u32 %v6248_v33, %v5829_v34  ;;  %v6212_v42 = vld [vmem:[%s8549_s14 + $0x32c] sm:$0xf]  ;;  %v5685_v43 = vld [vmem:[%s8549_s14 + $0x338] sm:$0xf0] }
 0x536   : > { %4135 = vmatmul.bf16.vlgmr.msra.gmra.mxu3 %v7794_v58  ;;  %v5688_v51 = vor.u32 %v6212_v42, %v5685_v43  ;;  %v6279_v42 = vld [vmem:[%s8552_s17 + $0x40] sm:$0xff]  ;;  %v6293_v43 = vld [vmem:[%s8552_s17 + $0xb0] sm:$0xff] }
 0x538   : > { %4193 = vmatpush.bf16.msra.mxu0 %v5640_v47  ;;  %4206 = vmatpush.bf16.msrb.mxu1 %v5768_v49  ;;  %v5813_v47 = vld [vmem:[%s8549_s14 + $0x438] sm:$0xf0]  ;;  %v6148_v49 = vld [vmem:[%s8549_s14 + $0x12c] sm:$0xf] }
 0x539   : > { %4180 = vmatpush.bf16.msrb.mxu3 %v5512_v20  ;;  %4171 = vmatpush.bf16.msrb.mxu2 %v5320_v59  ;;  %v5816_v53 = vor.u32 %v6244_v46, %v5813_v47  ;;  %v5669_v20 = vld [vmem:[%s8549_s14 + $0x318] sm:$0xf0]  ;;  %v5432_v59 = vor.u32 %v6148_v49, %v5429_v50  ;;  %v6292_v47 = vld [vmem:[%s8552_s17 + $0xa8] sm:$0xff] }
 0x53a   : > { %v5672_v61 = vor.u32 %v6208_v54, %v5669_v20 }
 0x53c   : > { %4194 = vmatpush.bf16.msra.mxu0 %v5624_v31  ;;  %4207 = vmatpush.bf16.msrb.mxu1 %v5752_v23  ;;  %v6144_v31 = vld [vmem:[%s8549_s14 + $0x10c] sm:$0xf]  ;;  %v5413_v23 = vld [vmem:[%s8549_s14 + $0x118] sm:$0xf0] }
 0x53d   : > { %4181 = vmatpush.bf16.msrb.mxu3 %v5496_v45  ;;  %4172 = vmatpush.bf16.msrb.mxu2 %v5304_v2  ;;  %v5416_v63 = vor.u32 %v6144_v31, %v5413_v23  ;;  %v6274_v45 = vld [vmem:[%s8552_s17 + $0x18] sm:$0xff] }
 0x53e   : > { %v6286_v2 = vld [vmem:[%s8552_s17 + $0x78] sm:$0xff] }
 0x540   : > { %4195 = vmatpush.bf16.msra.mxu0 %v5608_v6  ;;  %4208 = vmatpush.bf16.msrb.mxu1 %v5736_v56  ;;  %v6273_v6 = vld [vmem:[%s8552_s17 + $0x10] sm:$0xff] }
 0x541   : > { %4182 = vmatpush.bf16.msrb.mxu3 %v5480_v13  ;;  %4173 = vmatpush.bf16.msrb.mxu2 %v5288_v18  ;;  %v6284_v13 = vld [vmem:[%s8552_s17 + $0x68] sm:$0xff]  ;;  %v6283_v18 = vld [vmem:[%s8552_s17 + $0x60] sm:$0xff] }
 0x544   : > { %4196 = vmatpush.bf16.msra.mxu0 %v5592_v24  ;;  %4209 = vmatpush.bf16.msrb.mxu1 %v5720_v25  ;;  %v6282_v25 = vld [vmem:[%s8552_s17 + $0x58] sm:$0xff] }
 0x545   : > { %4222 = vmatpush.bf16.msra.mxu2 %v5848_v27  ;;  %4183 = vmatpush.bf16.msrb.mxu3 %v5464_v32  ;;  %v6281_v32 = vld [vmem:[%s8552_s17 + $0x50] sm:$0xff] }
 0x546   : > { %4174 = vmatmul.bf16.vlgmr.msrb.gmra.mxu2 %v7790_v14  ;;  %v5560_v14 = vor.u32 %v6180_v40, %v5557_v41 }
 0x548   : > { %4197 = vmatpush.bf16.msra.mxu0 %v5576_v37  ;;  %4210 = vmatpush.bf16.msrb.mxu1 %v5704_v38  ;;  %v8431_v37 = vld [vmem:[%s8551_s16] sm:$0xf]  ;;  %v6280_v38 = vld [vmem:[%s8552_s17 + $0x48] sm:$0xff] }
 0x549   : > { %4223 = vmatpush.bf16.msra.mxu2 %v5832_v39  ;;  %4184 = vmatpush.bf16.msrb.mxu3 %v5448_v44  ;;  %v4233_v39 = vperm.slane %v8431_v37, 0 }
 0x54c   : > { %4198 = vmatpush.bf16.msra.mxu0 %v5560_v14  ;;  %4211 = vmatpush.bf16.msrb.mxu1 %v5688_v51 }
 0x54d   : > { %4224 = vmatpush.bf16.msra.mxu2 %v5816_v53  ;;  %4185 = vmatpush.bf16.msrb.mxu3 %v5432_v59 }
 0x550   : > { %4199 = vmatpush.bf16.msra.mxu0 %v5544_v60  ;;  %4212 = vmatpush.bf16.msrb.mxu1 %v5672_v61  ;;  %v4234_v61 = vperm.slane %v8431_v37, 1 }
 0x551   : > { %4225 = vmatpush.bf16.msra.mxu2 %v5800_v62  ;;  %4186 = vmatpush.bf16.msrb.mxu3 %v5416_v63 }
 0x553   : > { %4200 = vmatmul.bf16.vlgmr.msra.gmra.mxu0 %v7794_v58  ;;  %4213 = vmatmul.bf16.vlgmr.msrb.gmra.mxu1 %v7802_v21  ;;  %v6276_v58 = vld [vmem:[%s8552_s17 + $0x28] sm:$0xff] }
 0x554   : > { %4187 = vmatmul.bf16.vlgmr.msrb.gmra.mxu3 %v7792_v15  ;;  %v6275_v15 = vld [vmem:[%s8552_s17 + $0x20] sm:$0xff]  ;;  %4523 = vmatpush.bf16.msrb.mxu0 %v6286_v2  ;;  %v6288_v2 = vld [vmem:[%s8552_s17 + $0x88] sm:$0xff] }
 0x555   : > { %4510 = vmatpush.bf16.msra.mxu3 %v6278_v0  ;;  %4536 = vmatpush.bf16.msra.mxu1 %v6294_v36  ;;  %v6295_v36 = vld [vmem:[%s8552_s17 + $0xc0] sm:$0xff] }
 0x556   : > { %5852 = vmatmul.msk.bf16.vlgmr.msra.gmra.mxu2 %vm8608_vm11, %v7917_v12 }
 0x558   : > { %4524 = vmatpush.bf16.msrb.mxu0 %v6285_v57  ;;  %v6300_v57 = vld [vmem:[%s8552_s17 + $0xe8] sm:$0xff] }
 0x559   : > { %4511 = vmatpush.bf16.msra.mxu3 %v6277_v1  ;;  %4537 = vmatpush.bf16.msra.mxu1 %v6293_v43 }
 0x55c   : > { %4525 = vmatpush.bf16.msrb.mxu0 %v6284_v13 }
 0x55d   : > { %4512 = vmatpush.bf16.msra.mxu3 %v6276_v58  ;;  %4538 = vmatpush.bf16.msra.mxu1 %v6292_v47 }
 0x55f   : > { %v8389_v21 = vpop.f32.mrf.mxu0 }
 0x560   : > { %v8391_v12 = vpop.f32.mrf.mxu1  ;;  %4526 = vmatpush.bf16.msrb.mxu0 %v6283_v18 }
 0x561   : > { %4513 = vmatpush.bf16.msra.mxu3 %v6275_v15  ;;  %4539 = vmatpush.bf16.msra.mxu1 %v6291_v48 }
 0x564   : > { %4527 = vmatpush.bf16.msrb.mxu0 %v6282_v25 }
 0x565   : > { %v3205_v4 = vpop.f32.mrf.mxu3  ;;  %4514 = vmatpush.bf16.msra.mxu3 %v6274_v45  ;;  %4540 = vmatpush.bf16.msra.mxu1 %v6290_v22  ;;  %v6289_v45 = vld [vmem:[%s8552_s17 + $0x90] sm:$0xff] }
 0x566   : > { %v8399_v5 = vpop.f32.mrf.mxu2 }
 0x567   : > { %v3220_v56 = vpop.f32.mrf.mxu0 }
 0x568   : > { %v3233_v7 = vpop.f32.mrf.mxu1  ;;  %4528 = vmatpush.bf16.msrb.mxu0 %v6281_v32  ;;  %v6301_v56 = vld [vmem:[%s8552_s17 + $0xf0] sm:$0xff]  ;;  %v6298_v32 = vld [vmem:[%s8552_s17 + $0xd8] sm:$0xff] }
 0x569   : > { %4515 = vmatpush.bf16.msra.mxu3 %v6273_v6  ;;  %4541 = vmatpush.bf16.msra.mxu1 %v6289_v45 }
 0x56c   : > { %4529 = vmatpush.bf16.msrb.mxu0 %v6280_v38 }
 0x56d   : > { %v3207_v8 = vpop.f32.mrf.mxu3  ;;  %4516 = vmatpush.bf16.msra.mxu3 %v6272_v9  ;;  %4542 = vmatpush.bf16.msra.mxu1 %v6288_v2 }
 0x56e   : > { %v3246_v10 = vpop.f32.mrf.mxu2  ;;  %v6287_v8 = vld [vmem:[%s8552_s17 + $0x80] sm:$0xff] }
 0x56f   : > { %v3993_v11 = vpop.f32.mrf.mxu0 }
 0x570   : > { %v4006_v17 = vpop.f32.mrf.mxu1  ;;  %4530 = vmatpush.bf16.msrb.mxu0 %v6279_v42 }
 0x571   : > { %4517 = vmatpush.bf16.msra.mxu3 %v6271_v16  ;;  %4543 = vmatpush.bf16.msra.mxu1 %v6287_v8 }
 0x575   : > { %v3980_v19 = vpop.f32.mrf.mxu3 }
 0x576   : > { %v4019_v55 = vpop.f32.mrf.mxu2  ;;  %v3981_v27 = vadd.f32 %v3980_v19, %v3205_v4  ;;  %v6302_v4 = vld [vmem:[%s8552_s17 + $0xf8] sm:$0xff] }
 0x577   : > { %v3995_v24 = vpop.f32.mrf.mxu0  ;;  %4549 = vmatpush.bf16.msrb.mxu2 %v6302_v4 }
 0x578   : > { %v4008_v26 = vpop.f32.mrf.mxu1  ;;  %v3994_v28 = vadd.f32 %v3993_v11, %v3981_v27  ;;  %v6299_v11 = vld [vmem:[%s8552_s17 + $0xe0] sm:$0xff] }
 0x579   : > { %v4235_v26 = vperm.slane %v8431_v37, 2 }
 0x57a   : > { %v4007_v33 = vadd.f32 %v4006_v17, %v3994_v28 }
 0x57b   : > { %4550 = vmatpush.bf16.msrb.mxu2 %v6301_v56 }
 0x57c   : > { %v4020_v40 = vadd.f32 %v4019_v55, %v4007_v33 }
 0x57d   : > { %v3982_v29 = vpop.f32.mrf.mxu3 }
 0x57e   : > { %v4021_v30 = vpop.f32.mrf.mxu2 }
 0x57f   : > { %4551 = vmatpush.bf16.msrb.mxu2 %v6300_v57 }
 0x580   : > { %v4045_v34 = vpop.f32.mrf.mxu0  ;;  %v4058_v35 = vpop.f32.mrf.mxu1 }
 0x581   : > { %v4046_v54 = vadd.f32 %v4045_v34, %v8389_v21 }
 0x583   : > { %v4059_v3 = vadd.f32 %v4058_v35, %v4046_v54  ;;  %4552 = vmatpush.bf16.msrb.mxu2 %v6299_v11  ;;  %v6296_v35 = vld [vmem:[%s8552_s17 + $0xc8] sm:$0xff] }
 0x585   : > { %v4032_v41 = vpop.f32.mrf.mxu3 }
 0x586   : > { %v4033_v44 = vadd.f32 %v4032_v41, %v4020_v40 }
 0x587   : > { %4553 = vmatpush.bf16.msrb.mxu2 %v6298_v32 }
 0x588   : > { %v4241_v49 = vadd.f32 %v4233_v39, %v4033_v44  ;;  %v4047_v50 = vpop.f32.mrf.mxu0  ;;  %v4060_v14 = vpop.f32.mrf.mxu1 }
 0x589   : > { %v4071_v46 = vpop.f32.mrf.mxu2  ;;  %v4236_v14 = vperm.slane %v8431_v37, 3 }
 0x58a   : > { %v4245_v51 = vmax.f32 %v4241_v49, 0.0  ;;  %v4072_v31 = vadd.f32 %v4071_v46, %v4059_v3 }
 0x58c   : > { %v4249_v52 = vpack.c.bf16 %v4245_v51, %v4245_v51 }
 0x58d   : > { %v4034_v53 = vpop.f32.mrf.mxu3 }
 0x58e   : > { %4518 = vmatmul.bf16.vlgmr.msra.gmra.mxu3 %v4249_v52 }
 0x590   : > { %v4097_v59 = vpop.f32.mrf.mxu0 }
 0x591   : > { %v4073_v20 = vpop.f32.mrf.mxu2 }
 0x598   : > { %v4099_v62 = vpop.f32.mrf.mxu0 }
 0x599   : > { %v4084_v23 = vpop.f32.mrf.mxu3 }
 0x59a   : > { %v4085_v60 = vadd.f32 %v4084_v23, %v4072_v31 }
 0x59c   : > { %v4098_v63 = vadd.f32 %v4097_v59, %v4085_v60 }
 0x59e   : > { %v4242_v0 = vadd.f32 %v4234_v61, %v4098_v63 }
 0x5a0   : > { %v4246_v1 = vmax.f32 %v4242_v0, 0.0  ;;  %v4110_v58 = vpop.f32.mrf.mxu1 }
 0x5a1   : > { %v4086_v15 = vpop.f32.mrf.mxu3  ;;  %v4111_v16 = vadd.f32 %v4110_v58, %v8391_v12  ;;  %v6297_v12 = vld [vmem:[%s8552_s17 + $0xd0] sm:$0xff] }
 0x5a2   : > { %v4250_v21 = vpack.c.bf16 %v4246_v1, %v4246_v1  ;;  %4554 = vmatpush.bf16.msrb.mxu2 %v6297_v12  ;;  %v6421_v15 = vmov 8.0  }
 0x5a3   : > { %6350 = vrcp.f32 %v6421_v15 }
 0x5a4   : > { %4531 = vmatmul.bf16.vlgmr.msrb.gmra.mxu0 %v4250_v21 }
 0x5a6   : > { %4555 = vmatpush.bf16.msrb.mxu2 %v6296_v35 }
 0x5a8   : > { %v4112_v7 = vpop.f32.mrf.mxu1 }
 0x5a9   : > { %v4123_v6 = vpop.f32.mrf.mxu2  ;;  %v6351_v21 = vpop.eup %6350 }
 0x5aa   : > { %v4124_v18 = vadd.f32 %v4123_v6, %v4111_v16  ;;  %4556 = vmatpush.bf16.msrb.mxu2 %v6295_v36  ;;  %v4567_v45 = vmul.f32 8.0, %v6351_v21  ;;  %vm4571_vm13 = vweird.f32 %v6351_v21 }
 0x5ac   : > { %v4568_v2 = vsub.f32 1.0, %v4567_v45 }
 0x5ae   : > { %v4569_v4 = vmul.f32 %v6351_v21, %v4568_v2 }
 0x5b0   : > { %v4149_v9 = vpop.f32.mrf.mxu0  ;;  %v4162_v13 = vpop.f32.mrf.mxu1  ;;  %v4570_v6 = vadd.f32 %v6351_v21, %v4569_v4 }
 0x5b1   : > { %v4125_v10 = vpop.f32.mrf.mxu2 }
 0x5b2   : > { %v4572_v56 = vsel %vm4571_vm13, %v6351_v21, %v4570_v6 }
 0x5b8   : > { %v4151_v17 = vpop.f32.mrf.mxu0  ;;  %v4164_v24 = vpop.f32.mrf.mxu1 }
 0x5b9   : > { %v4136_v19 = vpop.f32.mrf.mxu3 }
 0x5ba   : > { %v4137_v55 = vadd.f32 %v4136_v19, %v4124_v18 }
 0x5bc   : > { %v4150_v25 = vadd.f32 %v4149_v9, %v4137_v55 }
 0x5be   : > { %v4163_v27 = vadd.f32 %v4162_v13, %v4150_v25 }
 0x5c0   : > { %v4243_v28 = vadd.f32 %v4235_v26, %v4163_v27  ;;  %v4592_v27 = vld [vmem:[%s8554_s19] sm:$0x1] }
 0x5c1   : > { %v4138_v29 = vpop.f32.mrf.mxu3 }
 0x5c2   : > { %v4247_v30 = vmax.f32 %v4243_v28, 0.0  ;;  %v4594_v29 = vld [vmem:[%s8609_s23] sm:$0x1] }
 0x5c4   : > { %v4251_v33 = vpack.c.bf16 %v4247_v30, %v4247_v30 }
 0x5c6   : > { %4544 = vmatmul.bf16.vlgmr.msra.gmra.mxu1 %v4251_v33 }
 0x5c9   : > { %v4175_v34 = vpop.f32.mrf.mxu2 }
 0x5ca   : > { %v4176_v41 = vadd.f32 %v4175_v34, %v8399_v5  ;;  %v4317_v5 = vld [vmem:[%s8553_s18] sm:$0x1] }
 0x5d0   : > { %v4201_v38 = vpop.f32.mrf.mxu0  ;;  %v4214_v40 = vpop.f32.mrf.mxu1 }
 0x5d1   : > { %v4177_v39 = vpop.f32.mrf.mxu2 }
 0x5d7   : > { %v4188_v44 = vpop.f32.mrf.mxu3 }
 0x5d8   : > { %v4203_v42 = vpop.f32.mrf.mxu0  ;;  %v4216_v43 = vpop.f32.mrf.mxu1  ;;  %v4189_v47 = vadd.f32 %v4188_v44, %v4176_v41 }
 0x5d9   : > { %v4227_v46 = vpop.f32.mrf.mxu2 }
 0x5da   : > { %v4202_v49 = vadd.f32 %v4201_v38, %v4189_v47 }
 0x5dc   : > { %v4215_v50 = vadd.f32 %v4214_v40, %v4202_v49 }
 0x5de   : > { %v4228_v51 = vadd.f32 %v4227_v46, %v4215_v50 }
 0x5df   : > { %v4190_v52 = vpop.f32.mrf.mxu3 }
 0x5e0   : > { %v4244_v48 = vadd.f32 %v4236_v14, %v4228_v51 }
 0x5e1   : > { %v4229_v53 = vpop.f32.mrf.mxu2 }
 0x5e2   : > { %v4248_v54 = vmax.f32 %v4244_v48, 0.0 }
 0x5e4   : > { %v4252_v20 = vpack.c.bf16 %v4248_v54, %v4248_v54 }
 0x5e6   : > { %4557 = vmatmul.bf16.vlgmr.msrb.gmra.mxu2 %v4252_v20 }
 0x611   : > { %v4519_v59 = vpop.f32.mrf.mxu3 }
 0x612   : > { %v4520_v3 = vadd.f32 %v4519_v59, %v4317_v5 }
 0x619   : > { %v4521_v22 = vpop.f32.mrf.mxu3 }
 0x621   : > { %v4532_v31 = vpop.f32.mrf.mxu0 }
 0x622   : > { %v4533_v23 = vadd.f32 %v4532_v31, %v4520_v3 }
 0x629   : > { %v4534_v60 = vpop.f32.mrf.mxu0 }
 0x643   : > { %v4545_v61 = vpop.f32.mrf.mxu1 }
 0x644   : > { %v4546_v37 = vadd.f32 %v4545_v61, %v4533_v23 }
 0x64b   : > { %v4547_v62 = vpop.f32.mrf.mxu1 }
 0x669   : > { %v4558_v63 = vpop.f32.mrf.mxu2 }
 0x66a   : > { %v4559_v0 = vadd.f32 %v4558_v63, %v4546_v37 }
 0x66c   : > { %v4563_v1 = vsel %vm4562_vm12, %v4559_v0, 0.0 }
 0x66d   : > { %4564 = vadd.xlane.f32.xlu1 %v4563_v1 }
 0x671   : > { %v4560_v58 = vpop.f32.mrf.mxu2 }
 0x6e0   : > { %v4565_v7 = vpop.xlane.xlu1 %4564 }
 0x6e1   : > { %v4573_v8 = vmul.f32 %v4572_v56, %v4565_v7 }
 0x6e3   : > { %v4574_v57 = vsub.f32 %v4559_v0, %v4573_v8 }
 0x6e5   : > { %v4575_v9 = vmul.f32 %v4574_v57, %v4574_v57 }
 0x6e7   : > { %v4576_v10 = vsel %vm4562_vm12, %v4575_v9, 0.0 }
 0x6e8   : > { %4577 = vadd.xlane.f32.xlu2 %v4576_v10 }
 0x75b   : > { %v4578_v11 = vpop.xlane.xlu2 %4577 }
 0x75c   : > { %v4579_v13 = vmul.f32 %v4578_v11, %v4572_v56 }
 0x75e   : > { %v4580_v16 = vadd.f32 1e-05, %v4579_v13 }
 0x760   : > { %6352 = vrsqrt.f32 %v4580_v16  ;;  %vm4587_vm4 = vweird.f32 %v4580_v16 }
 0x766   : > { %v6353_v17 = vpop.eup %6352 }
 0x767   : > { %v4582_v18 = vmul.f32 %v6353_v17, %v4580_v16  ;;  %vm4588_vm3 = vweird.f32 %v6353_v17 }
 0x768   : > { %vm4589_vm7 = vmor %vm4587_vm4, %vm4588_vm3 }
 0x769   : > { %v4583_v19 = vmul.f32 %v6353_v17, %v4582_v18 }
 0x76b   : > { %v4584_v55 = vmul.f32 0.5, %v4583_v19 }
 0x76d   : > { %v4585_v24 = vsub.f32 1.5, %v4584_v55 }
 0x76f   : > { %v4586_v25 = vmul.f32 %v6353_v17, %v4585_v24 }
 0x771   : > { %v4590_v26 = vsel %vm4589_vm7, %v6353_v17, %v4586_v25 }
 0x772   : > { %v4591_v28 = vmul.f32 %v4590_v26, %v4574_v57 }
 0x774   : > { %v4593_v30 = vmul.f32 %v4592_v27, %v4591_v28 }
 0x776   : > { %v4595_v32 = vadd.f32 %v4594_v29, %v4593_v30 }
 0x778   : > { %4596 = vst.msk [vmem:[%s659_s29] sm:$0x1] %vm4562_vm12, %v4595_v32 }
 0x779   : > { %6381 = shalt.err (!%p6378_p3)
}
 0x77a   : > { %6304 = dma.vmem_to_hbm [thread:$0]  (%p6570_p5), %s4609_s22, 16, %s4611_s2, %s4598_s3  }
 0x77b PF: > { %s8610_s4 = sld [smem:[#allocation12_spill]] }
 0x77c   : > { %s8611_s23 = sld [smem:[#allocation10_spill]] }
 0x781   : > { %p6310_p4 = scmp.ge.s32.totalorder %s8610_s4, 2 }
 0x782   : > { %s4622_s6 = sand.u32 1, %s8611_s23  }
 0x783   : > { %p6307_p7 = pnand %p6310_p4, %p6574_p6  ;;  %s4623_s28 = scalar_lea.sflag [#allocation8], %s4622_s6 }
 0x785   : > { %p6308_p8 = pneg %p6307_p7 }
 0x787   : > { %6399 = dma.done.wait (%p6308_p8), %s4623_s28, 16  }
 0x788   : > { %6401 = vsyncadd (%p6308_p8), %s4623_s28, 4294967280  ;;  %s8613_s27 = sld [smem:[#allocation13_spill]]  ;;  %s8616_s2 = smov %s6408_s25 }
 0x789   : > { %s8614_s1 = sld [smem:[#allocation11_spill]] }
 0x78a   : > { %s8615_s26 = sld [smem:[#allocation14_spill]] }
 0x78e   : > { %p31_p9 = scmp.ge.s32.totalorder %s8613_s27, 4  }
 0x78f   : > { %s8617_s25 = smov %s8614_s1 }
 0x790   :  { %33 = sbr.rel (!%p31_p9) target bundleno = 12 (0xc), region = 149 }
 0x795   :  { %4628 = vsyncpa [#allocation8], 1 }
 0x796   :  { %4630 = vsyncpa [#allocation8 + $0x1], 1 }

</bundles_post_ra>
